<compile_context>
chip_gen: v7x
topology: tpu7x:2x2x1
jax: 0.10.0
libtpu: 0.0.40
codegen_flags: <defaults>
</compile_context>

<pallas_src>
import functools
import math

import jax
import jax.numpy as jnp
from jax import lax
from jax.experimental import pallas as pl
from jax.experimental.pallas import tpu as pltpu

_BF16 = jnp.bfloat16


def _vmem():
    return pl.BlockSpec(memory_space=pltpu.MemorySpace.VMEM)


def _smem():
    return pl.BlockSpec(memory_space=pltpu.MemorySpace.SMEM)


def _bdot(a, b):
    """bf16 MXU matmul with f32 accumulation (no-op cast for pre-cast bf16 weights)."""
    return jnp.dot(a.astype(_BF16), b.astype(_BF16), preferred_element_type=jnp.float32)


# ----------------------------- kernel bodies (shared helpers) -----------------------------

def _gcn_layer(a, x, wc, bc, wsag, bsag):
    """GCNConv (self-loops + symmetric norm, never materialized) + ReLU + GraphConv scorer.

    a     [N, N] f32 symmetric 0/1 adjacency
    x     [N, F] node features
    wc/bc GCNConv weight [F, H] bf16 / bias [1, H] f32
    wsag  [H, 2] bf16: column 0 = w_rel, column 1 = w_root (GraphConv(H, 1) scorer)
    bsag  scalar scorer bias
    returns h [N, H] f32, score [N, 1] f32
    """
    # A_hat @ (XW) = D^-1/2 (A+I) D^-1/2 XW  ==  d * (A @ (d*XW) + d*XW),  d = rsqrt(rowsum(A)+1).
    deg = jnp.sum(a, axis=1, keepdims=True) + 1.0                 # [N, 1], self-loop included
    d = lax.rsqrt(deg)
    xw = _bdot(x, wc)                                             # [N, H]
    y = xw * d                                                    # D^-1/2 X W
    h = jnp.maximum(d * (_bdot(a, y) + y) + bc, 0.0)              # GCNConv + ReLU
    # SAGPooling scorer (GraphConv, aggr='add', out_channels=1), reassociated:
    #   score = A @ (H @ w_rel) + H @ w_root + b     (O(N^2) instead of O(N^2 * H))
    y2 = _bdot(h, wsag)                                           # [N, 2] = [H@w_rel | H@w_root]
    score = _bdot(a, y2[:, 0:1]) + y2[:, 1:2] + bsag              # [N, 1]
    return h, score


def _gather_rows(ref, perm_ref, kk):
    """Row gather via dynamic-slice loads from a VMEM ref; perm lives in SMEM.

    kk is small and static at these sizes.
    TODO(synk): at production K switch to a grid-level DMA row-gather
    (PrefetchScalarGridSpec + pl.Element index_map) instead of this unroll.
    """
    return jnp.concatenate([ref[pl.ds(perm_ref[i], 1), :] for i in range(kk)], axis=0)


def _gather_gate(perm_ref, h_ref, s_ref, kk):
    """SAGPooling selection: X_new = H[perm] * tanh(score[perm])."""
    hp = _gather_rows(h_ref, perm_ref, kk)                        # [K, H]
    sp = _gather_rows(s_ref, perm_ref, kk)                        # [K, 1]
    return hp * jnp.tanh(sp)


def _permute_adj(perm_ref, a_ref, kk):
    """A_new = A[perm][:, perm]; rows via gather, columns via one-hot matmul (exact f32, K^2*N).

    TODO(synk): replace the column one-hot matmul with a lane dynamic-gather when available.
    """
    n = a_ref.shape[1]
    pa = _gather_rows(a_ref, perm_ref, kk)                        # [K, N] = P @ A
    riota = lax.broadcasted_iota(jnp.int32, (n, 1), 0)
    p_t = jnp.concatenate([(riota == perm_ref[j]).astype(jnp.float32) for j in range(kk)],
                          axis=1)                                 # [N, K] one-hot columns
    return jnp.dot(pa, p_t, preferred_element_type=jnp.float32)   # P A P^T, bit-exact 0/1


def _global_pool(x_new, num_graphs, k):
    """Per-graph global max/mean pool over contiguous equal-sized [k, H] row blocks.

    Returns dense [B, H] values so callers issue one full-block store per output
    (no per-graph masked single-row stores).
    """
    inv_k = 1.0 / float(k)
    mx, mn = [], []
    for g in range(num_graphs):                                   # static unroll, tiny B
        seg = x_new[g * k:(g + 1) * k, :]
        mx.append(jnp.max(seg, axis=0, keepdims=True))
        mn.append(jnp.sum(seg, axis=0, keepdims=True) * inv_k)
    return jnp.concatenate(mx, axis=0), jnp.concatenate(mn, axis=0)


# ----------------------------- Pallas kernels -----------------------------

def gcn_score_kernel(a_ref, x_ref, wc_ref, bc_ref, wsag_ref, bsag_ref, h_ref, s_ref):
    h, s = _gcn_layer(a_ref[...], x_ref[...], wc_ref[...], bc_ref[...],
                      wsag_ref[...], bsag_ref[0])
    h_ref[...] = h
    s_ref[...] = s


def pool_gcn_score_kernel(perm_ref, a_ref, h_ref, s_ref, wc_ref, bc_ref, wsag_ref, bsag_ref,
                          mx_ref, mn_ref, a_new_ref, h_new_ref, s_new_ref, *, num_graphs, k):
    kk = num_graphs * k
    # SAGPooling of the previous layer + global max/mean pool ...
    x_new = _gather_gate(perm_ref, h_ref, s_ref, kk)
    mx, mn = _global_pool(x_new, num_graphs, k)
    mx_ref[...] = mx
    mn_ref[...] = mn
    a_new = _permute_adj(perm_ref, a_ref, kk)
    a_new_ref[...] = a_new
    # ... fused with the NEXT layer's GCNConv + scorer (A/X never round-trip to HBM in between).
    h2, s2 = _gcn_layer(a_new, x_new, wc_ref[...], bc_ref[...], wsag_ref[...], bsag_ref[0])
    h_new_ref[...] = h2
    s_new_ref[...] = s2


def pool_mlp_kernel(perm_ref, h_ref, s_ref, mx0_ref, mn0_ref, mx1_ref, mn1_ref, hls_ref,
                    w1mx_ref, w1mn_ref, w1hls_ref, b1_ref, w2_ref, b2_ref, w3_ref, b3_ref,
                    o_ref, *, num_graphs, k):
    kk = num_graphs * k
    # Final layer's SAGPooling selection + global pool (never leaves VMEM) ...
    x_new = _gather_gate(perm_ref, h_ref, s_ref, kk)
    mx2, mn2 = _global_pool(x_new, num_graphs, k)
    # ... fused with h_list sum, [h, hls_attr] concat (via split W1 row blocks) and the MLP head.
    mxs = mx0_ref[...] + mx1_ref[...] + mx2
    mns = mn0_ref[...] + mn1_ref[...] + mn2
    h1 = jnp.maximum(_bdot(mxs, w1mx_ref[...]) + _bdot(mns, w1mn_ref[...])
                     + _bdot(hls_ref[...], w1hls_ref[...]) + b1_ref[...], 0.0)
    h2 = jnp.maximum(_bdot(h1, w2_ref[...]) + b2_ref[...], 0.0)
    o_ref[...] = _bdot(h2, w3_ref[...]) + b3_ref[0]


# ----------------------------- pallas_call wrappers -----------------------------
# TODO(synk): grid-less full-VMEM blocks are only valid at small N; see module TODO for the
# row-tiled BlockSpec / dimension_semantics plan needed at production scale (v7x especially).

def _gcn_score_call(a, x, conv, pool):
    (wc, bc), (wsag, bsag) = conv, pool
    n, hd = a.shape[0], wc.shape[1]
    return pl.pallas_call(
        gcn_score_kernel,
        out_shape=(jax.ShapeDtypeStruct((n, hd), jnp.float32),
                   jax.ShapeDtypeStruct((n, 1), jnp.float32)),
        in_specs=[_vmem()] * 5 + [_smem()],
        out_specs=(_vmem(), _vmem()),
    )(a, x, wc, bc, wsag, bsag)


def _pool_gcn_score_call(perm, a, h, s, conv, pool, *, num_graphs, k):
    (wc, bc), (wsag, bsag) = conv, pool
    kk, hd = num_graphs * k, wc.shape[1]
    kern = functools.partial(pool_gcn_score_kernel, num_graphs=num_graphs, k=k)
    return pl.pallas_call(
        kern,
        out_shape=(jax.ShapeDtypeStruct((num_graphs, hd), jnp.float32),   # max pool
                   jax.ShapeDtypeStruct((num_graphs, hd), jnp.float32),   # mean pool
                   jax.ShapeDtypeStruct((kk, kk), jnp.float32),           # permuted A
                   jax.ShapeDtypeStruct((kk, hd), jnp.float32),           # next-layer H
                   jax.ShapeDtypeStruct((kk, 1), jnp.float32)),           # next-layer score
        in_specs=[_smem()] + [_vmem()] * 6 + [_smem()],
        out_specs=tuple(_vmem() for _ in range(5)),
    )(perm, a, h, s, wc, bc, wsag, bsag)


def _pool_mlp_call(perm, h, s, mx0, mn0, mx1, mn1, hls_attr, mlps, *, num_graphs, k):
    kern = functools.partial(pool_mlp_kernel, num_graphs=num_graphs, k=k)
    b = hls_attr.shape[0]
    return pl.pallas_call(
        kern,
        out_shape=jax.ShapeDtypeStruct((b, mlps["w3"].shape[1]), jnp.float32),
        in_specs=[_smem()] + [_vmem()] * 14 + [_smem()],
        out_specs=_vmem(),
    )(perm, h, s, mx0, mn0, mx1, mn1, hls_attr,
      mlps["w1_max"], mlps["w1_mean"], mlps["w1_hls"], mlps["b1"],
      mlps["w2"], mlps["b2"], mlps["w3"], mlps["b3"])


# ----------------------------- JAX glue (structure-dependent) -----------------------------

def _topk_perm(score_col, num_graphs, n_per_graph, pool_ratio):
    # TODO(synk): data-dependent per-graph top-k (SAGPooling's sort) stays in JAX glue
    # (no sort primitive in Mosaic); the permutation it produces is applied inside the kernels.
    k = int(math.ceil(pool_ratio * n_per_graph))
    s = score_col.reshape(num_graphs, n_per_graph)
    _, idx = lax.top_k(s, k)                                          # per-graph top-k
    perm = idx + jnp.arange(num_graphs, dtype=idx.dtype)[:, None] * n_per_graph
    return perm.reshape(-1).astype(jnp.int32), k


def hiernet_forward(x, a, hls_attr, params, *, num_graphs, n_per_graph, pool_ratio=0.5):
    # drop_out=0.0 (eval mode) => dropout is identity.
    convs, pools = params["convs"], params["pools"]
    # layer 0: GCNConv + ReLU + SAG scorer (fused)
    h, s = _gcn_score_call(a, x, convs[0], pools[0])
    pooled = []
    n = n_per_graph
    for layer in (1, 2):
        perm, k = _topk_perm(s, num_graphs, n, pool_ratio)
        # pool layer-1 + GCNConv/ReLU/scorer of this layer, all in one kernel
        mx, mn, a, h, s = _pool_gcn_score_call(perm, a, h, s, convs[layer], pools[layer],
                                               num_graphs=num_graphs, k=k)
        pooled.append((mx, mn))
        n = k
    # final layer's pool + h_list sum + concat([h, hls_attr]) + 3-layer MLP, all fused
    perm, k = _topk_perm(s, num_graphs, n, pool_ratio)
    (mx0, mn0), (mx1, mn1) = pooled
    return _pool_mlp_call(perm, h, s, mx0, mn0, mx1, mn1, hls_attr, params["mlps"],
                          num_graphs=num_graphs, k=k)


# ----------------------------- parameter / input construction -----------------------------

def make_params(key, in_channels, hidden, hls_dim):
    keys = jax.random.split(key, 32)
    ki = iter(range(32))

    def nrm(shape, scale=0.1):
        return (scale * jax.random.normal(keys[next(ki)], shape)).astype(jnp.float32)

    convs, pools = [], []
    for layer in range(3):
        cin = in_channels if layer == 0 else hidden
        # Static weights pre-cast to bf16 once here (MXU operands); biases stay f32.
        convs.append((nrm((cin, hidden)).astype(_BF16), nrm((1, hidden))))      # GCNConv W, b
        # SAGPooling GNN = GraphConv(hidden -> 1): [w_rel | w_root] stacked as [H, 2]
        # plus a scalar bias (passed through SMEM).
        pools.append((nrm((hidden, 2)).astype(_BF16), nrm((1,))))
    d0 = hidden * 2 + hls_dim
    w1, b1 = nrm((d0, 64)), nrm((1, 64))                                        # Linear(2H+hls, 64)
    w2, b2 = nrm((64, 64)), nrm((1, 64))                                        # Linear(64, 64)
    w3, b3 = nrm((64, 1)), nrm((1,))                                            # Linear(64, 1)
    mlps = {
        # W1 split along its input rows: [max-pool | mean-pool | hls_attr] blocks, so the kernel
        # never has to concatenate activations.
        "w1_max": w1[:hidden].astype(_BF16),
        "w1_mean": w1[hidden:2 * hidden].astype(_BF16),
        "w1_hls": w1[2 * hidden:].astype(_BF16),
        "b1": b1, "w2": w2.astype(_BF16), "b2": b2, "w3": w3.astype(_BF16), "b3": b3,
    }
    return {"convs": convs, "pools": pools, "mlps": mlps}


def make_block_adjacency(key, num_graphs, n_per_graph):
    """Symmetric block-diagonal 0/1 adjacency (undirected graphs stored contiguously)."""
    n = num_graphs * n_per_graph
    a = jnp.zeros((n, n), dtype=jnp.float32)
    for g in range(num_graphs):
        key, sub = jax.random.split(key)
        r = jax.random.bernoulli(sub, 0.4, (n_per_graph, n_per_graph))
        adj = jnp.logical_or(r, r.T).astype(jnp.float32)
        adj = adj * (1.0 - jnp.eye(n_per_graph, dtype=jnp.float32))
        s = g * n_per_graph
        a = a.at[s:s + n_per_graph, s:s + n_per_graph].set(adj)
    return a


if __name__ == "__main__":
    in_channels, hidden_channels, hls_dim = 4, 32, 8
    num_graphs, n_per_graph = 2, 8            # 16 nodes total, batch = [0]*8 + [1]*8

    root = jax.random.PRNGKey(0)
    k_x, k_a, k_h, k_p = jax.random.split(root, 4)

    x = jax.random.normal(k_x, (num_graphs * n_per_graph, in_channels), dtype=jnp.float32)
    a = make_block_adjacency(k_a, num_graphs, n_per_graph)
    hls_attr = jax.random.normal(k_h, (num_graphs, hls_dim), dtype=jnp.float32)
    params = make_params(k_p, in_channels, hidden_channels, hls_dim)

    fwd = jax.jit(hiernet_forward, static_argnames=("num_graphs", "n_per_graph", "pool_ratio"))
    out = fwd(x, a, hls_attr, params,
              num_graphs=num_graphs, n_per_graph=n_per_graph, pool_ratio=0.5)
    out = jax.block_until_ready(out)
    assert out.shape == (num_graphs, 1)
    print("KERNEL_OK")
</pallas_src>

<mosaic_0001>
module attributes {stable_mosaic.version = 11 : i64} {
  func.func @gcn_score_kernel(%arg0: memref<16x16xf32, #tpu.memory_space<vmem>>, %arg1: memref<16x4xf32, #tpu.memory_space<vmem>>, %arg2: memref<4x32xbf16, #tpu.memory_space<vmem>>, %arg3: memref<1x32xf32, #tpu.memory_space<vmem>>, %arg4: memref<32x2xbf16, #tpu.memory_space<vmem>>, %arg5: memref<1xf32, #tpu.memory_space<smem>>, %arg6: memref<16x32xf32, #tpu.memory_space<vmem>>, %arg7: memref<16x1xf32, #tpu.memory_space<vmem>>) attributes {dimension_semantics = [], scalar_prefetch = 0 : i64, scratch_operands = 0 : i64, tpu.core_type = #tpu.core_type<tc>} {
    %c0 = arith.constant 0 : index
    %c0_0 = arith.constant 0 : index
    %0 = vector.load %arg0[%c0, %c0_0] : memref<16x16xf32, #tpu.memory_space<vmem>>, vector<16x16xf32>
    %c0_1 = arith.constant 0 : index
    %c0_2 = arith.constant 0 : index
    %1 = vector.load %arg1[%c0_1, %c0_2] : memref<16x4xf32, #tpu.memory_space<vmem>>, vector<16x4xf32>
    %c0_3 = arith.constant 0 : index
    %c0_4 = arith.constant 0 : index
    %2 = vector.load %arg2[%c0_3, %c0_4] : memref<4x32xbf16, #tpu.memory_space<vmem>>, vector<4x32xbf16>
    %c0_5 = arith.constant 0 : index
    %c0_6 = arith.constant 0 : index
    %3 = vector.load %arg3[%c0_5, %c0_6] : memref<1x32xf32, #tpu.memory_space<vmem>>, vector<1x32xf32>
    %c0_7 = arith.constant 0 : index
    %c0_8 = arith.constant 0 : index
    %4 = vector.load %arg4[%c0_7, %c0_8] : memref<32x2xbf16, #tpu.memory_space<vmem>>, vector<32x2xbf16>
    %c0_9 = arith.constant 0 : index
    %5 = memref.load %arg5[%c0_9] : memref<1xf32, #tpu.memory_space<smem>>
    %cst = arith.constant dense<0.000000e+00> : vector<16xf32>
    %6 = vector.multi_reduction <add>, %0, %cst [1] : vector<16x16xf32> to vector<16xf32>
    %7 = vector.shape_cast %6 : vector<16xf32> to vector<16x1xf32>
    %cst_10 = arith.constant 1.000000e+00 : f32
    %8 = vector.broadcast %cst_10 : f32 to vector<16x1xf32>
    %9 = arith.addf %7, %8 : vector<16x1xf32>
    %10 = math.rsqrt %9 : vector<16x1xf32>
    %11 = arith.truncf %1 : vector<16x4xf32> to vector<16x4xbf16>
    %cst_11 = arith.constant dense<0.000000e+00> : vector<16x32xf32>
    %12 = tpu.matmul %11, %2, %cst_11 {dimension_numbers = #tpu.dot_dimension_numbers<[1], [0], [0], [1], [0, 0, 1, 1], [], []>} : vector<16x4xbf16>, vector<4x32xbf16>, vector<16x32xf32> -> vector<16x32xf32>
    %13 = vector.broadcast %10 : vector<16x1xf32> to vector<16x32xf32>
    %14 = arith.mulf %12, %13 : vector<16x32xf32>
    %15 = arith.truncf %0 : vector<16x16xf32> to vector<16x16xbf16>
    %16 = arith.truncf %14 : vector<16x32xf32> to vector<16x32xbf16>
    %cst_12 = arith.constant dense<0.000000e+00> : vector<16x32xf32>
    %17 = tpu.matmul %15, %16, %cst_12 {dimension_numbers = #tpu.dot_dimension_numbers<[1], [0], [0], [1], [0, 0, 1, 1], [], []>} : vector<16x16xbf16>, vector<16x32xbf16>, vector<16x32xf32> -> vector<16x32xf32>
    %18 = arith.addf %17, %14 : vector<16x32xf32>
    %19 = vector.broadcast %10 : vector<16x1xf32> to vector<16x32xf32>
    %20 = arith.mulf %19, %18 : vector<16x32xf32>
    %21 = vector.broadcast %3 : vector<1x32xf32> to vector<16x32xf32>
    %22 = arith.addf %20, %21 : vector<16x32xf32>
    %cst_13 = arith.constant 0.000000e+00 : f32
    %23 = vector.broadcast %cst_13 : f32 to vector<16x32xf32>
    %24 = arith.maximumf %22, %23 : vector<16x32xf32>
    %25 = arith.truncf %24 : vector<16x32xf32> to vector<16x32xbf16>
    %cst_14 = arith.constant dense<0.000000e+00> : vector<16x2xf32>
    %26 = tpu.matmul %25, %4, %cst_14 {dimension_numbers = #tpu.dot_dimension_numbers<[1], [0], [0], [1], [0, 0, 1, 1], [], []>} : vector<16x32xbf16>, vector<32x2xbf16>, vector<16x2xf32> -> vector<16x2xf32>
    %27 = vector.extract_strided_slice %26 {offsets = [0, 0], sizes = [16, 1], strides = [1, 1]} : vector<16x2xf32> to vector<16x1xf32>
    %28 = arith.truncf %0 : vector<16x16xf32> to vector<16x16xbf16>
    %29 = arith.truncf %27 : vector<16x1xf32> to vector<16x1xbf16>
    %cst_15 = arith.constant dense<0.000000e+00> : vector<16x1xf32>
    %30 = tpu.matmul %28, %29, %cst_15 {dimension_numbers = #tpu.dot_dimension_numbers<[1], [0], [0], [1], [0, 0, 1, 1], [], []>} : vector<16x16xbf16>, vector<16x1xbf16>, vector<16x1xf32> -> vector<16x1xf32>
    %31 = vector.extract_strided_slice %26 {offsets = [0, 1], sizes = [16, 1], strides = [1, 1]} : vector<16x2xf32> to vector<16x1xf32>
    %32 = arith.addf %30, %31 : vector<16x1xf32>
    %33 = vector.broadcast %5 : f32 to vector<16x1xf32>
    %34 = arith.addf %32, %33 : vector<16x1xf32>
    %c0_16 = arith.constant 0 : index
    %c0_17 = arith.constant 0 : index
    %35 = vector.load %arg6[%c0_16, %c0_17] : memref<16x32xf32, #tpu.memory_space<vmem>>, vector<16x32xf32>
    tpu.vector_store %arg6[%c0_16, %c0_17], %24 {strides = array<i32>} : memref<16x32xf32, #tpu.memory_space<vmem>>, vector<16x32xf32>,
    %c0_18 = arith.constant 0 : index
    %c0_19 = arith.constant 0 : index
    %36 = vector.load %arg7[%c0_18, %c0_19] : memref<16x1xf32, #tpu.memory_space<vmem>>, vector<16x1xf32>
    tpu.vector_store %arg7[%c0_18, %c0_19], %34 {strides = array<i32>} : memref<16x1xf32, #tpu.memory_space<vmem>>, vector<16x1xf32>,
    return
  }
}

module attributes {stable_mosaic.version = 11 : i64} {
  func.func @pool_gcn_score_kernel(%arg0: memref<8xi32, #tpu.memory_space<smem>>, %arg1: memref<16x16xf32, #tpu.memory_space<vmem>>, %arg2: memref<16x32xf32, #tpu.memory_space<vmem>>, %arg3: memref<16x1xf32, #tpu.memory_space<vmem>>, %arg4: memref<32x32xbf16, #tpu.memory_space<vmem>>, %arg5: memref<1x32xf32, #tpu.memory_space<vmem>>, %arg6: memref<32x2xbf16, #tpu.memory_space<vmem>>, %arg7: memref<1xf32, #tpu.memory_space<smem>>, %arg8: memref<2x32xf32, #tpu.memory_space<vmem>>, %arg9: memref<2x32xf32, #tpu.memory_space<vmem>>, %arg10: memref<8x8xf32, #tpu.memory_space<vmem>>, %arg11: memref<8x32xf32, #tpu.memory_space<vmem>>, %arg12: memref<8x1xf32, #tpu.memory_space<vmem>>) attributes {dimension_semantics = [], scalar_prefetch = 0 : i64, scratch_operands = 0 : i64, tpu.core_type = #tpu.core_type<tc>} {
    %c0 = arith.constant 0 : index
    %0 = memref.load %arg0[%c0] : memref<8xi32, #tpu.memory_space<smem>>
    %1 = arith.index_cast %0 : i32 to index
    %c0_0 = arith.constant 0 : index
    %2 = vector.load %arg2[%1, %c0_0] : memref<16x32xf32, #tpu.memory_space<vmem>>, vector<1x32xf32>
    %c1 = arith.constant 1 : index
    %3 = memref.load %arg0[%c1] : memref<8xi32, #tpu.memory_space<smem>>
    %4 = arith.index_cast %3 : i32 to index
    %c0_1 = arith.constant 0 : index
    %5 = vector.load %arg2[%4, %c0_1] : memref<16x32xf32, #tpu.memory_space<vmem>>, vector<1x32xf32>
    %c2 = arith.constant 2 : index
    %6 = memref.load %arg0[%c2] : memref<8xi32, #tpu.memory_space<smem>>
    %7 = arith.index_cast %6 : i32 to index
    %c0_2 = arith.constant 0 : index
    %8 = vector.load %arg2[%7, %c0_2] : memref<16x32xf32, #tpu.memory_space<vmem>>, vector<1x32xf32>
    %c3 = arith.constant 3 : index
    %9 = memref.load %arg0[%c3] : memref<8xi32, #tpu.memory_space<smem>>
    %10 = arith.index_cast %9 : i32 to index
    %c0_3 = arith.constant 0 : index
    %11 = vector.load %arg2[%10, %c0_3] : memref<16x32xf32, #tpu.memory_space<vmem>>, vector<1x32xf32>
    %c4 = arith.constant 4 : index
    %12 = memref.load %arg0[%c4] : memref<8xi32, #tpu.memory_space<smem>>
    %13 = arith.index_cast %12 : i32 to index
    %c0_4 = arith.constant 0 : index
    %14 = vector.load %arg2[%13, %c0_4] : memref<16x32xf32, #tpu.memory_space<vmem>>, vector<1x32xf32>
    %c5 = arith.constant 5 : index
    %15 = memref.load %arg0[%c5] : memref<8xi32, #tpu.memory_space<smem>>
    %16 = arith.index_cast %15 : i32 to index
    %c0_5 = arith.constant 0 : index
    %17 = vector.load %arg2[%16, %c0_5] : memref<16x32xf32, #tpu.memory_space<vmem>>, vector<1x32xf32>
    %c6 = arith.constant 6 : index
    %18 = memref.load %arg0[%c6] : memref<8xi32, #tpu.memory_space<smem>>
    %19 = arith.index_cast %18 : i32 to index
    %c0_6 = arith.constant 0 : index
    %20 = vector.load %arg2[%19, %c0_6] : memref<16x32xf32, #tpu.memory_space<vmem>>, vector<1x32xf32>
    %c7 = arith.constant 7 : index
    %21 = memref.load %arg0[%c7] : memref<8xi32, #tpu.memory_space<smem>>
    %22 = arith.index_cast %21 : i32 to index
    %c0_7 = arith.constant 0 : index
    %23 = vector.load %arg2[%22, %c0_7] : memref<16x32xf32, #tpu.memory_space<vmem>>, vector<1x32xf32>
    %24 = tpu.concatenate %2, %5, %8, %11, %14, %17, %20, %23 in 0 : vector<1x32xf32>, vector<1x32xf32>, vector<1x32xf32>, vector<1x32xf32>, vector<1x32xf32>, vector<1x32xf32>, vector<1x32xf32>, vector<1x32xf32> -> vector<8x32xf32>
    %c0_8 = arith.constant 0 : index
    %25 = memref.load %arg0[%c0_8] : memref<8xi32, #tpu.memory_space<smem>>
    %26 = arith.index_cast %25 : i32 to index
    %c0_9 = arith.constant 0 : index
    %27 = vector.load %arg3[%26, %c0_9] : memref<16x1xf32, #tpu.memory_space<vmem>>, vector<1x1xf32>
    %c1_10 = arith.constant 1 : index
    %28 = memref.load %arg0[%c1_10] : memref<8xi32, #tpu.memory_space<smem>>
    %29 = arith.index_cast %28 : i32 to index
    %c0_11 = arith.constant 0 : index
    %30 = vector.load %arg3[%29, %c0_11] : memref<16x1xf32, #tpu.memory_space<vmem>>, vector<1x1xf32>
    %c2_12 = arith.constant 2 : index
    %31 = memref.load %arg0[%c2_12] : memref<8xi32, #tpu.memory_space<smem>>
    %32 = arith.index_cast %31 : i32 to index
    %c0_13 = arith.constant 0 : index
    %33 = vector.load %arg3[%32, %c0_13] : memref<16x1xf32, #tpu.memory_space<vmem>>, vector<1x1xf32>
    %c3_14 = arith.constant 3 : index
    %34 = memref.load %arg0[%c3_14] : memref<8xi32, #tpu.memory_space<smem>>
    %35 = arith.index_cast %34 : i32 to index
    %c0_15 = arith.constant 0 : index
    %36 = vector.load %arg3[%35, %c0_15] : memref<16x1xf32, #tpu.memory_space<vmem>>, vector<1x1xf32>
    %c4_16 = arith.constant 4 : index
    %37 = memref.load %arg0[%c4_16] : memref<8xi32, #tpu.memory_space<smem>>
    %38 = arith.index_cast %37 : i32 to index
    %c0_17 = arith.constant 0 : index
    %39 = vector.load %arg3[%38, %c0_17] : memref<16x1xf32, #tpu.memory_space<vmem>>, vector<1x1xf32>
    %c5_18 = arith.constant 5 : index
    %40 = memref.load %arg0[%c5_18] : memref<8xi32, #tpu.memory_space<smem>>
    %41 = arith.index_cast %40 : i32 to index
    %c0_19 = arith.constant 0 : index
    %42 = vector.load %arg3[%41, %c0_19] : memref<16x1xf32, #tpu.memory_space<vmem>>, vector<1x1xf32>
    %c6_20 = arith.constant 6 : index
    %43 = memref.load %arg0[%c6_20] : memref<8xi32, #tpu.memory_space<smem>>
    %44 = arith.index_cast %43 : i32 to index
    %c0_21 = arith.constant 0 : index
    %45 = vector.load %arg3[%44, %c0_21] : memref<16x1xf32, #tpu.memory_space<vmem>>, vector<1x1xf32>
    %c7_22 = arith.constant 7 : index
    %46 = memref.load %arg0[%c7_22] : memref<8xi32, #tpu.memory_space<smem>>
    %47 = arith.index_cast %46 : i32 to index
    %c0_23 = arith.constant 0 : index
    %48 = vector.load %arg3[%47, %c0_23] : memref<16x1xf32, #tpu.memory_space<vmem>>, vector<1x1xf32>
    %49 = tpu.concatenate %27, %30, %33, %36, %39, %42, %45, %48 in 0 : vector<1x1xf32>, vector<1x1xf32>, vector<1x1xf32>, vector<1x1xf32>, vector<1x1xf32>, vector<1x1xf32>, vector<1x1xf32>, vector<1x1xf32> -> vector<8x1xf32>
    %50 = math.tanh %49 : vector<8x1xf32>
    %51 = vector.broadcast %50 : vector<8x1xf32> to vector<8x32xf32>
    %52 = arith.mulf %24, %51 : vector<8x32xf32>
    %53 = vector.extract_strided_slice %52 {offsets = [0, 0], sizes = [4, 32], strides = [1, 1]} : vector<8x32xf32> to vector<4x32xf32>
    %cst = arith.constant dense<0xFF800000> : vector<32xf32>
    %54 = vector.multi_reduction <maximumf>, %53, %cst [0] : vector<4x32xf32> to vector<32xf32>
    %55 = vector.shape_cast %54 : vector<32xf32> to vector<1x32xf32>
    %cst_24 = arith.constant dense<0.000000e+00> : vector<32xf32>
    %56 = vector.multi_reduction <add>, %53, %cst_24 [0] : vector<4x32xf32> to vector<32xf32>
    %57 = vector.shape_cast %56 : vector<32xf32> to vector<1x32xf32>
    %cst_25 = arith.constant 2.500000e-01 : f32
    %58 = vector.broadcast %cst_25 : f32 to vector<1x32xf32>
    %59 = arith.mulf %57, %58 : vector<1x32xf32>
    %60 = vector.extract_strided_slice %52 {offsets = [4, 0], sizes = [4, 32], strides = [1, 1]} : vector<8x32xf32> to vector<4x32xf32>
    %cst_26 = arith.constant dense<0xFF800000> : vector<32xf32>
    %61 = vector.multi_reduction <maximumf>, %60, %cst_26 [0] : vector<4x32xf32> to vector<32xf32>
    %62 = vector.shape_cast %61 : vector<32xf32> to vector<1x32xf32>
    %cst_27 = arith.constant dense<0.000000e+00> : vector<32xf32>
    %63 = vector.multi_reduction <add>, %60, %cst_27 [0] : vector<4x32xf32> to vector<32xf32>
    %64 = vector.shape_cast %63 : vector<32xf32> to vector<1x32xf32>
    %cst_28 = arith.constant 2.500000e-01 : f32
    %65 = vector.broadcast %cst_28 : f32 to vector<1x32xf32>
    %66 = arith.mulf %64, %65 : vector<1x32xf32>
    %67 = tpu.concatenate %55, %62 in 0 : vector<1x32xf32>, vector<1x32xf32> -> vector<2x32xf32>
    %68 = tpu.concatenate %59, %66 in 0 : vector<1x32xf32>, vector<1x32xf32> -> vector<2x32xf32>
    %c0_29 = arith.constant 0 : index
    %c0_30 = arith.constant 0 : index
    %69 = vector.load %arg8[%c0_29, %c0_30] : memref<2x32xf32, #tpu.memory_space<vmem>>, vector<2x32xf32>
    tpu.vector_store %arg8[%c0_29, %c0_30], %67 {strides = array<i32>} : memref<2x32xf32, #tpu.memory_space<vmem>>, vector<2x32xf32>,
    %c0_31 = arith.constant 0 : index
    %c0_32 = arith.constant 0 : index
    %70 = vector.load %arg9[%c0_31, %c0_32] : memref<2x32xf32, #tpu.memory_space<vmem>>, vector<2x32xf32>
    tpu.vector_store %arg9[%c0_31, %c0_32], %68 {strides = array<i32>} : memref<2x32xf32, #tpu.memory_space<vmem>>, vector<2x32xf32>,
    %c0_33 = arith.constant 0 : index
    %71 = memref.load %arg0[%c0_33] : memref<8xi32, #tpu.memory_space<smem>>
    %72 = arith.index_cast %71 : i32 to index
    %c0_34 = arith.constant 0 : index
    %73 = vector.load %arg1[%72, %c0_34] : memref<16x16xf32, #tpu.memory_space<vmem>>, vector<1x16xf32>
    %c1_35 = arith.constant 1 : index
    %74 = memref.load %arg0[%c1_35] : memref<8xi32, #tpu.memory_space<smem>>
    %75 = arith.index_cast %74 : i32 to index
    %c0_36 = arith.constant 0 : index
    %76 = vector.load %arg1[%75, %c0_36] : memref<16x16xf32, #tpu.memory_space<vmem>>, vector<1x16xf32>
    %c2_37 = arith.constant 2 : index
    %77 = memref.load %arg0[%c2_37] : memref<8xi32, #tpu.memory_space<smem>>
    %78 = arith.index_cast %77 : i32 to index
    %c0_38 = arith.constant 0 : index
    %79 = vector.load %arg1[%78, %c0_38] : memref<16x16xf32, #tpu.memory_space<vmem>>, vector<1x16xf32>
    %c3_39 = arith.constant 3 : index
    %80 = memref.load %arg0[%c3_39] : memref<8xi32, #tpu.memory_space<smem>>
    %81 = arith.index_cast %80 : i32 to index
    %c0_40 = arith.constant 0 : index
    %82 = vector.load %arg1[%81, %c0_40] : memref<16x16xf32, #tpu.memory_space<vmem>>, vector<1x16xf32>
    %c4_41 = arith.constant 4 : index
    %83 = memref.load %arg0[%c4_41] : memref<8xi32, #tpu.memory_space<smem>>
    %84 = arith.index_cast %83 : i32 to index
    %c0_42 = arith.constant 0 : index
    %85 = vector.load %arg1[%84, %c0_42] : memref<16x16xf32, #tpu.memory_space<vmem>>, vector<1x16xf32>
    %c5_43 = arith.constant 5 : index
    %86 = memref.load %arg0[%c5_43] : memref<8xi32, #tpu.memory_space<smem>>
    %87 = arith.index_cast %86 : i32 to index
    %c0_44 = arith.constant 0 : index
    %88 = vector.load %arg1[%87, %c0_44] : memref<16x16xf32, #tpu.memory_space<vmem>>, vector<1x16xf32>
    %c6_45 = arith.constant 6 : index
    %89 = memref.load %arg0[%c6_45] : memref<8xi32, #tpu.memory_space<smem>>
    %90 = arith.index_cast %89 : i32 to index
    %c0_46 = arith.constant 0 : index
    %91 = vector.load %arg1[%90, %c0_46] : memref<16x16xf32, #tpu.memory_space<vmem>>, vector<1x16xf32>
    %c7_47 = arith.constant 7 : index
    %92 = memref.load %arg0[%c7_47] : memref<8xi32, #tpu.memory_space<smem>>
    %93 = arith.index_cast %92 : i32 to index
    %c0_48 = arith.constant 0 : index
    %94 = vector.load %arg1[%93, %c0_48] : memref<16x16xf32, #tpu.memory_space<vmem>>, vector<1x16xf32>
    %95 = tpu.concatenate %73, %76, %79, %82, %85, %88, %91, %94 in 0 : vector<1x16xf32>, vector<1x16xf32>, vector<1x16xf32>, vector<1x16xf32>, vector<1x16xf32>, vector<1x16xf32>, vector<1x16xf32>, vector<1x16xf32> -> vector<8x16xf32>
    %96 = tpu.iota {dimensions = array<i32: 0>} : vector<16x1xi32>
    %c0_49 = arith.constant 0 : index
    %97 = memref.load %arg0[%c0_49] : memref<8xi32, #tpu.memory_space<smem>>
    %98 = vector.broadcast %97 : i32 to vector<16x1xi32>
    %99 = arith.cmpi eq, %96, %98 : vector<16x1xi32>
    %100 = arith.extui %99 : vector<16x1xi1> to vector<16x1xi32>
    %101 = arith.sitofp %100 : vector<16x1xi32> to vector<16x1xf32>
    %c1_50 = arith.constant 1 : index
    %102 = memref.load %arg0[%c1_50] : memref<8xi32, #tpu.memory_space<smem>>
    %103 = vector.broadcast %102 : i32 to vector<16x1xi32>
    %104 = arith.cmpi eq, %96, %103 : vector<16x1xi32>
    %105 = arith.extui %104 : vector<16x1xi1> to vector<16x1xi32>
    %106 = arith.sitofp %105 : vector<16x1xi32> to vector<16x1xf32>
    %c2_51 = arith.constant 2 : index
    %107 = memref.load %arg0[%c2_51] : memref<8xi32, #tpu.memory_space<smem>>
    %108 = vector.broadcast %107 : i32 to vector<16x1xi32>
    %109 = arith.cmpi eq, %96, %108 : vector<16x1xi32>
    %110 = arith.extui %109 : vector<16x1xi1> to vector<16x1xi32>
    %111 = arith.sitofp %110 : vector<16x1xi32> to vector<16x1xf32>
    %c3_52 = arith.constant 3 : index
    %112 = memref.load %arg0[%c3_52] : memref<8xi32, #tpu.memory_space<smem>>
    %113 = vector.broadcast %112 : i32 to vector<16x1xi32>
    %114 = arith.cmpi eq, %96, %113 : vector<16x1xi32>
    %115 = arith.extui %114 : vector<16x1xi1> to vector<16x1xi32>
    %116 = arith.sitofp %115 : vector<16x1xi32> to vector<16x1xf32>
    %c4_53 = arith.constant 4 : index
    %117 = memref.load %arg0[%c4_53] : memref<8xi32, #tpu.memory_space<smem>>
    %118 = vector.broadcast %117 : i32 to vector<16x1xi32>
    %119 = arith.cmpi eq, %96, %118 : vector<16x1xi32>
    %120 = arith.extui %119 : vector<16x1xi1> to vector<16x1xi32>
    %121 = arith.sitofp %120 : vector<16x1xi32> to vector<16x1xf32>
    %c5_54 = arith.constant 5 : index
    %122 = memref.load %arg0[%c5_54] : memref<8xi32, #tpu.memory_space<smem>>
    %123 = vector.broadcast %122 : i32 to vector<16x1xi32>
    %124 = arith.cmpi eq, %96, %123 : vector<16x1xi32>
    %125 = arith.extui %124 : vector<16x1xi1> to vector<16x1xi32>
    %126 = arith.sitofp %125 : vector<16x1xi32> to vector<16x1xf32>
    %c6_55 = arith.constant 6 : index
    %127 = memref.load %arg0[%c6_55] : memref<8xi32, #tpu.memory_space<smem>>
    %128 = vector.broadcast %127 : i32 to vector<16x1xi32>
    %129 = arith.cmpi eq, %96, %128 : vector<16x1xi32>
    %130 = arith.extui %129 : vector<16x1xi1> to vector<16x1xi32>
    %131 = arith.sitofp %130 : vector<16x1xi32> to vector<16x1xf32>
    %c7_56 = arith.constant 7 : index
    %132 = memref.load %arg0[%c7_56] : memref<8xi32, #tpu.memory_space<smem>>
    %133 = vector.broadcast %132 : i32 to vector<16x1xi32>
    %134 = arith.cmpi eq, %96, %133 : vector<16x1xi32>
    %135 = arith.extui %134 : vector<16x1xi1> to vector<16x1xi32>
    %136 = arith.sitofp %135 : vector<16x1xi32> to vector<16x1xf32>
    %137 = tpu.concatenate %101, %106, %111, %116, %121, %126, %131, %136 in 1 : vector<16x1xf32>, vector<16x1xf32>, vector<16x1xf32>, vector<16x1xf32>, vector<16x1xf32>, vector<16x1xf32>, vector<16x1xf32>, vector<16x1xf32> -> vector<16x8xf32>
    %cst_57 = arith.constant dense<0.000000e+00> : vector<8x8xf32>
    %138 = tpu.matmul %95, %137, %cst_57 {dimension_numbers = #tpu.dot_dimension_numbers<[1], [0], [0], [1], [0, 0, 1, 1], [], []>} : vector<8x16xf32>, vector<16x8xf32>, vector<8x8xf32> -> vector<8x8xf32>
    %c0_58 = arith.constant 0 : index
    %c0_59 = arith.constant 0 : index
    %139 = vector.load %arg10[%c0_58, %c0_59] : memref<8x8xf32, #tpu.memory_space<vmem>>, vector<8x8xf32>
    tpu.vector_store %arg10[%c0_58, %c0_59], %138 {strides = array<i32>} : memref<8x8xf32, #tpu.memory_space<vmem>>, vector<8x8xf32>,
    %c0_60 = arith.constant 0 : index
    %c0_61 = arith.constant 0 : index
    %140 = vector.load %arg4[%c0_60, %c0_61] : memref<32x32xbf16, #tpu.memory_space<vmem>>, vector<32x32xbf16>
    %c0_62 = arith.constant 0 : index
    %c0_63 = arith.constant 0 : index
    %141 = vector.load %arg5[%c0_62, %c0_63] : memref<1x32xf32, #tpu.memory_space<vmem>>, vector<1x32xf32>
    %c0_64 = arith.constant 0 : index
    %c0_65 = arith.constant 0 : index
    %142 = vector.load %arg6[%c0_64, %c0_65] : memref<32x2xbf16, #tpu.memory_space<vmem>>, vector<32x2xbf16>
    %c0_66 = arith.constant 0 : index
    %143 = memref.load %arg7[%c0_66] : memref<1xf32, #tpu.memory_space<smem>>
    %cst_67 = arith.constant dense<0.000000e+00> : vector<8xf32>
    %144 = vector.multi_reduction <add>, %138, %cst_67 [1] : vector<8x8xf32> to vector<8xf32>
    %145 = vector.shape_cast %144 : vector<8xf32> to vector<8x1xf32>
    %cst_68 = arith.constant 1.000000e+00 : f32
    %146 = vector.broadcast %cst_68 : f32 to vector<8x1xf32>
    %147 = arith.addf %145, %146 : vector<8x1xf32>
    %148 = math.rsqrt %147 : vector<8x1xf32>
    %149 = arith.truncf %52 : vector<8x32xf32> to vector<8x32xbf16>
    %cst_69 = arith.constant dense<0.000000e+00> : vector<8x32xf32>
    %150 = tpu.matmul %149, %140, %cst_69 {dimension_numbers = #tpu.dot_dimension_numbers<[1], [0], [0], [1], [0, 0, 1, 1], [], []>} : vector<8x32xbf16>, vector<32x32xbf16>, vector<8x32xf32> -> vector<8x32xf32>
    %151 = vector.broadcast %148 : vector<8x1xf32> to vector<8x32xf32>
    %152 = arith.mulf %150, %151 : vector<8x32xf32>
    %153 = arith.truncf %138 : vector<8x8xf32> to vector<8x8xbf16>
    %154 = arith.truncf %152 : vector<8x32xf32> to vector<8x32xbf16>
    %cst_70 = arith.constant dense<0.000000e+00> : vector<8x32xf32>
    %155 = tpu.matmul %153, %154, %cst_70 {dimension_numbers = #tpu.dot_dimension_numbers<[1], [0], [0], [1], [0, 0, 1, 1], [], []>} : vector<8x8xbf16>, vector<8x32xbf16>, vector<8x32xf32> -> vector<8x32xf32>
    %156 = arith.addf %155, %152 : vector<8x32xf32>
    %157 = vector.broadcast %148 : vector<8x1xf32> to vector<8x32xf32>
    %158 = arith.mulf %157, %156 : vector<8x32xf32>
    %159 = vector.broadcast %141 : vector<1x32xf32> to vector<8x32xf32>
    %160 = arith.addf %158, %159 : vector<8x32xf32>
    %cst_71 = arith.constant 0.000000e+00 : f32
    %161 = vector.broadcast %cst_71 : f32 to vector<8x32xf32>
    %162 = arith.maximumf %160, %161 : vector<8x32xf32>
    %163 = arith.truncf %162 : vector<8x32xf32> to vector<8x32xbf16>
    %cst_72 = arith.constant dense<0.000000e+00> : vector<8x2xf32>
    %164 = tpu.matmul %163, %142, %cst_72 {dimension_numbers = #tpu.dot_dimension_numbers<[1], [0], [0], [1], [0, 0, 1, 1], [], []>} : vector<8x32xbf16>, vector<32x2xbf16>, vector<8x2xf32> -> vector<8x2xf32>
    %165 = vector.extract_strided_slice %164 {offsets = [0, 0], sizes = [8, 1], strides = [1, 1]} : vector<8x2xf32> to vector<8x1xf32>
    %166 = arith.truncf %138 : vector<8x8xf32> to vector<8x8xbf16>
    %167 = arith.truncf %165 : vector<8x1xf32> to vector<8x1xbf16>
    %cst_73 = arith.constant dense<0.000000e+00> : vector<8x1xf32>
    %168 = tpu.matmul %166, %167, %cst_73 {dimension_numbers = #tpu.dot_dimension_numbers<[1], [0], [0], [1], [0, 0, 1, 1], [], []>} : vector<8x8xbf16>, vector<8x1xbf16>, vector<8x1xf32> -> vector<8x1xf32>
    %169 = vector.extract_strided_slice %164 {offsets = [0, 1], sizes = [8, 1], strides = [1, 1]} : vector<8x2xf32> to vector<8x1xf32>
    %170 = arith.addf %168, %169 : vector<8x1xf32>
    %171 = vector.broadcast %143 : f32 to vector<8x1xf32>
    %172 = arith.addf %170, %171 : vector<8x1xf32>
    %c0_74 = arith.constant 0 : index
    %c0_75 = arith.constant 0 : index
    %173 = vector.load %arg11[%c0_74, %c0_75] : memref<8x32xf32, #tpu.memory_space<vmem>>, vector<8x32xf32>
    tpu.vector_store %arg11[%c0_74, %c0_75], %162 {strides = array<i32>} : memref<8x32xf32, #tpu.memory_space<vmem>>, vector<8x32xf32>,
    %c0_76 = arith.constant 0 : index
    %c0_77 = arith.constant 0 : index
    %174 = vector.load %arg12[%c0_76, %c0_77] : memref<8x1xf32, #tpu.memory_space<vmem>>, vector<8x1xf32>
    tpu.vector_store %arg12[%c0_76, %c0_77], %172 {strides = array<i32>} : memref<8x1xf32, #tpu.memory_space<vmem>>, vector<8x1xf32>,
    return
  }
}

module attributes {stable_mosaic.version = 11 : i64} {
  func.func @pool_gcn_score_kernel(%arg0: memref<4xi32, #tpu.memory_space<smem>>, %arg1: memref<8x8xf32, #tpu.memory_space<vmem>>, %arg2: memref<8x32xf32, #tpu.memory_space<vmem>>, %arg3: memref<8x1xf32, #tpu.memory_space<vmem>>, %arg4: memref<32x32xbf16, #tpu.memory_space<vmem>>, %arg5: memref<1x32xf32, #tpu.memory_space<vmem>>, %arg6: memref<32x2xbf16, #tpu.memory_space<vmem>>, %arg7: memref<1xf32, #tpu.memory_space<smem>>, %arg8: memref<2x32xf32, #tpu.memory_space<vmem>>, %arg9: memref<2x32xf32, #tpu.memory_space<vmem>>, %arg10: memref<4x4xf32, #tpu.memory_space<vmem>>, %arg11: memref<4x32xf32, #tpu.memory_space<vmem>>, %arg12: memref<4x1xf32, #tpu.memory_space<vmem>>) attributes {dimension_semantics = [], scalar_prefetch = 0 : i64, scratch_operands = 0 : i64, tpu.core_type = #tpu.core_type<tc>} {
    %c0 = arith.constant 0 : index
    %0 = memref.load %arg0[%c0] : memref<4xi32, #tpu.memory_space<smem>>
    %1 = arith.index_cast %0 : i32 to index
    %c0_0 = arith.constant 0 : index
    %2 = vector.load %arg2[%1, %c0_0] : memref<8x32xf32, #tpu.memory_space<vmem>>, vector<1x32xf32>
    %c1 = arith.constant 1 : index
    %3 = memref.load %arg0[%c1] : memref<4xi32, #tpu.memory_space<smem>>
    %4 = arith.index_cast %3 : i32 to index
    %c0_1 = arith.constant 0 : index
    %5 = vector.load %arg2[%4, %c0_1] : memref<8x32xf32, #tpu.memory_space<vmem>>, vector<1x32xf32>
    %c2 = arith.constant 2 : index
    %6 = memref.load %arg0[%c2] : memref<4xi32, #tpu.memory_space<smem>>
    %7 = arith.index_cast %6 : i32 to index
    %c0_2 = arith.constant 0 : index
    %8 = vector.load %arg2[%7, %c0_2] : memref<8x32xf32, #tpu.memory_space<vmem>>, vector<1x32xf32>
    %c3 = arith.constant 3 : index
    %9 = memref.load %arg0[%c3] : memref<4xi32, #tpu.memory_space<smem>>
    %10 = arith.index_cast %9 : i32 to index
    %c0_3 = arith.constant 0 : index
    %11 = vector.load %arg2[%10, %c0_3] : memref<8x32xf32, #tpu.memory_space<vmem>>, vector<1x32xf32>
    %12 = tpu.concatenate %2, %5, %8, %11 in 0 : vector<1x32xf32>, vector<1x32xf32>, vector<1x32xf32>, vector<1x32xf32> -> vector<4x32xf32>
    %c0_4 = arith.constant 0 : index
    %13 = memref.load %arg0[%c0_4] : memref<4xi32, #tpu.memory_space<smem>>
    %14 = arith.index_cast %13 : i32 to index
    %c0_5 = arith.constant 0 : index
    %15 = vector.load %arg3[%14, %c0_5] : memref<8x1xf32, #tpu.memory_space<vmem>>, vector<1x1xf32>
    %c1_6 = arith.constant 1 : index
    %16 = memref.load %arg0[%c1_6] : memref<4xi32, #tpu.memory_space<smem>>
    %17 = arith.index_cast %16 : i32 to index
    %c0_7 = arith.constant 0 : index
    %18 = vector.load %arg3[%17, %c0_7] : memref<8x1xf32, #tpu.memory_space<vmem>>, vector<1x1xf32>
    %c2_8 = arith.constant 2 : index
    %19 = memref.load %arg0[%c2_8] : memref<4xi32, #tpu.memory_space<smem>>
    %20 = arith.index_cast %19 : i32 to index
    %c0_9 = arith.constant 0 : index
    %21 = vector.load %arg3[%20, %c0_9] : memref<8x1xf32, #tpu.memory_space<vmem>>, vector<1x1xf32>
    %c3_10 = arith.constant 3 : index
    %22 = memref.load %arg0[%c3_10] : memref<4xi32, #tpu.memory_space<smem>>
    %23 = arith.index_cast %22 : i32 to index
    %c0_11 = arith.constant 0 : index
    %24 = vector.load %arg3[%23, %c0_11] : memref<8x1xf32, #tpu.memory_space<vmem>>, vector<1x1xf32>
    %25 = tpu.concatenate %15, %18, %21, %24 in 0 : vector<1x1xf32>, vector<1x1xf32>, vector<1x1xf32>, vector<1x1xf32> -> vector<4x1xf32>
    %26 = math.tanh %25 : vector<4x1xf32>
    %27 = vector.broadcast %26 : vector<4x1xf32> to vector<4x32xf32>
    %28 = arith.mulf %12, %27 : vector<4x32xf32>
    %29 = vector.extract_strided_slice %28 {offsets = [0, 0], sizes = [2, 32], strides = [1, 1]} : vector<4x32xf32> to vector<2x32xf32>
    %cst = arith.constant dense<0xFF800000> : vector<32xf32>
    %30 = vector.multi_reduction <maximumf>, %29, %cst [0] : vector<2x32xf32> to vector<32xf32>
    %31 = vector.shape_cast %30 : vector<32xf32> to vector<1x32xf32>
    %cst_12 = arith.constant dense<0.000000e+00> : vector<32xf32>
    %32 = vector.multi_reduction <add>, %29, %cst_12 [0] : vector<2x32xf32> to vector<32xf32>
    %33 = vector.shape_cast %32 : vector<32xf32> to vector<1x32xf32>
    %cst_13 = arith.constant 5.000000e-01 : f32
    %34 = vector.broadcast %cst_13 : f32 to vector<1x32xf32>
    %35 = arith.mulf %33, %34 : vector<1x32xf32>
    %36 = vector.extract_strided_slice %28 {offsets = [2, 0], sizes = [2, 32], strides = [1, 1]} : vector<4x32xf32> to vector<2x32xf32>
    %cst_14 = arith.constant dense<0xFF800000> : vector<32xf32>
    %37 = vector.multi_reduction <maximumf>, %36, %cst_14 [0] : vector<2x32xf32> to vector<32xf32>
    %38 = vector.shape_cast %37 : vector<32xf32> to vector<1x32xf32>
    %cst_15 = arith.constant dense<0.000000e+00> : vector<32xf32>
    %39 = vector.multi_reduction <add>, %36, %cst_15 [0] : vector<2x32xf32> to vector<32xf32>
    %40 = vector.shape_cast %39 : vector<32xf32> to vector<1x32xf32>
    %cst_16 = arith.constant 5.000000e-01 : f32
    %41 = vector.broadcast %cst_16 : f32 to vector<1x32xf32>
    %42 = arith.mulf %40, %41 : vector<1x32xf32>
    %43 = tpu.concatenate %31, %38 in 0 : vector<1x32xf32>, vector<1x32xf32> -> vector<2x32xf32>
    %44 = tpu.concatenate %35, %42 in 0 : vector<1x32xf32>, vector<1x32xf32> -> vector<2x32xf32>
    %c0_17 = arith.constant 0 : index
    %c0_18 = arith.constant 0 : index
    %45 = vector.load %arg8[%c0_17, %c0_18] : memref<2x32xf32, #tpu.memory_space<vmem>>, vector<2x32xf32>
    tpu.vector_store %arg8[%c0_17, %c0_18], %43 {strides = array<i32>} : memref<2x32xf32, #tpu.memory_space<vmem>>, vector<2x32xf32>,
    %c0_19 = arith.constant 0 : index
    %c0_20 = arith.constant 0 : index
    %46 = vector.load %arg9[%c0_19, %c0_20] : memref<2x32xf32, #tpu.memory_space<vmem>>, vector<2x32xf32>
    tpu.vector_store %arg9[%c0_19, %c0_20], %44 {strides = array<i32>} : memref<2x32xf32, #tpu.memory_space<vmem>>, vector<2x32xf32>,
    %c0_21 = arith.constant 0 : index
    %47 = memref.load %arg0[%c0_21] : memref<4xi32, #tpu.memory_space<smem>>
    %48 = arith.index_cast %47 : i32 to index
    %c0_22 = arith.constant 0 : index
    %49 = vector.load %arg1[%48, %c0_22] : memref<8x8xf32, #tpu.memory_space<vmem>>, vector<1x8xf32>
    %c1_23 = arith.constant 1 : index
    %50 = memref.load %arg0[%c1_23] : memref<4xi32, #tpu.memory_space<smem>>
    %51 = arith.index_cast %50 : i32 to index
    %c0_24 = arith.constant 0 : index
    %52 = vector.load %arg1[%51, %c0_24] : memref<8x8xf32, #tpu.memory_space<vmem>>, vector<1x8xf32>
    %c2_25 = arith.constant 2 : index
    %53 = memref.load %arg0[%c2_25] : memref<4xi32, #tpu.memory_space<smem>>
    %54 = arith.index_cast %53 : i32 to index
    %c0_26 = arith.constant 0 : index
    %55 = vector.load %arg1[%54, %c0_26] : memref<8x8xf32, #tpu.memory_space<vmem>>, vector<1x8xf32>
    %c3_27 = arith.constant 3 : index
    %56 = memref.load %arg0[%c3_27] : memref<4xi32, #tpu.memory_space<smem>>
    %57 = arith.index_cast %56 : i32 to index
    %c0_28 = arith.constant 0 : index
    %58 = vector.load %arg1[%57, %c0_28] : memref<8x8xf32, #tpu.memory_space<vmem>>, vector<1x8xf32>
    %59 = tpu.concatenate %49, %52, %55, %58 in 0 : vector<1x8xf32>, vector<1x8xf32>, vector<1x8xf32>, vector<1x8xf32> -> vector<4x8xf32>
    %60 = tpu.iota {dimensions = array<i32: 0>} : vector<8x1xi32>
    %c0_29 = arith.constant 0 : index
    %61 = memref.load %arg0[%c0_29] : memref<4xi32, #tpu.memory_space<smem>>
    %62 = vector.broadcast %61 : i32 to vector<8x1xi32>
    %63 = arith.cmpi eq, %60, %62 : vector<8x1xi32>
    %64 = arith.extui %63 : vector<8x1xi1> to vector<8x1xi32>
    %65 = arith.sitofp %64 : vector<8x1xi32> to vector<8x1xf32>
    %c1_30 = arith.constant 1 : index
    %66 = memref.load %arg0[%c1_30] : memref<4xi32, #tpu.memory_space<smem>>
    %67 = vector.broadcast %66 : i32 to vector<8x1xi32>
    %68 = arith.cmpi eq, %60, %67 : vector<8x1xi32>
    %69 = arith.extui %68 : vector<8x1xi1> to vector<8x1xi32>
    %70 = arith.sitofp %69 : vector<8x1xi32> to vector<8x1xf32>
    %c2_31 = arith.constant 2 : index
    %71 = memref.load %arg0[%c2_31] : memref<4xi32, #tpu.memory_space<smem>>
    %72 = vector.broadcast %71 : i32 to vector<8x1xi32>
    %73 = arith.cmpi eq, %60, %72 : vector<8x1xi32>
    %74 = arith.extui %73 : vector<8x1xi1> to vector<8x1xi32>
    %75 = arith.sitofp %74 : vector<8x1xi32> to vector<8x1xf32>
    %c3_32 = arith.constant 3 : index
    %76 = memref.load %arg0[%c3_32] : memref<4xi32, #tpu.memory_space<smem>>
    %77 = vector.broadcast %76 : i32 to vector<8x1xi32>
    %78 = arith.cmpi eq, %60, %77 : vector<8x1xi32>
    %79 = arith.extui %78 : vector<8x1xi1> to vector<8x1xi32>
    %80 = arith.sitofp %79 : vector<8x1xi32> to vector<8x1xf32>
    %81 = tpu.concatenate %65, %70, %75, %80 in 1 : vector<8x1xf32>, vector<8x1xf32>, vector<8x1xf32>, vector<8x1xf32> -> vector<8x4xf32>
    %cst_33 = arith.constant dense<0.000000e+00> : vector<4x4xf32>
    %82 = tpu.matmul %59, %81, %cst_33 {dimension_numbers = #tpu.dot_dimension_numbers<[1], [0], [0], [1], [0, 0, 1, 1], [], []>} : vector<4x8xf32>, vector<8x4xf32>, vector<4x4xf32> -> vector<4x4xf32>
    %c0_34 = arith.constant 0 : index
    %c0_35 = arith.constant 0 : index
    %83 = vector.load %arg10[%c0_34, %c0_35] : memref<4x4xf32, #tpu.memory_space<vmem>>, vector<4x4xf32>
    tpu.vector_store %arg10[%c0_34, %c0_35], %82 {strides = array<i32>} : memref<4x4xf32, #tpu.memory_space<vmem>>, vector<4x4xf32>,
    %c0_36 = arith.constant 0 : index
    %c0_37 = arith.constant 0 : index
    %84 = vector.load %arg4[%c0_36, %c0_37] : memref<32x32xbf16, #tpu.memory_space<vmem>>, vector<32x32xbf16>
    %c0_38 = arith.constant 0 : index
    %c0_39 = arith.constant 0 : index
    %85 = vector.load %arg5[%c0_38, %c0_39] : memref<1x32xf32, #tpu.memory_space<vmem>>, vector<1x32xf32>
    %c0_40 = arith.constant 0 : index
    %c0_41 = arith.constant 0 : index
    %86 = vector.load %arg6[%c0_40, %c0_41] : memref<32x2xbf16, #tpu.memory_space<vmem>>, vector<32x2xbf16>
    %c0_42 = arith.constant 0 : index
    %87 = memref.load %arg7[%c0_42] : memref<1xf32, #tpu.memory_space<smem>>
    %cst_43 = arith.constant dense<0.000000e+00> : vector<4xf32>
    %88 = vector.multi_reduction <add>, %82, %cst_43 [1] : vector<4x4xf32> to vector<4xf32>
    %89 = vector.shape_cast %88 : vector<4xf32> to vector<4x1xf32>
    %cst_44 = arith.constant 1.000000e+00 : f32
    %90 = vector.broadcast %cst_44 : f32 to vector<4x1xf32>
    %91 = arith.addf %89, %90 : vector<4x1xf32>
    %92 = math.rsqrt %91 : vector<4x1xf32>
    %93 = arith.truncf %28 : vector<4x32xf32> to vector<4x32xbf16>
    %cst_45 = arith.constant dense<0.000000e+00> : vector<4x32xf32>
    %94 = tpu.matmul %93, %84, %cst_45 {dimension_numbers = #tpu.dot_dimension_numbers<[1], [0], [0], [1], [0, 0, 1, 1], [], []>} : vector<4x32xbf16>, vector<32x32xbf16>, vector<4x32xf32> -> vector<4x32xf32>
    %95 = vector.broadcast %92 : vector<4x1xf32> to vector<4x32xf32>
    %96 = arith.mulf %94, %95 : vector<4x32xf32>
    %97 = arith.truncf %82 : vector<4x4xf32> to vector<4x4xbf16>
    %98 = arith.truncf %96 : vector<4x32xf32> to vector<4x32xbf16>
    %cst_46 = arith.constant dense<0.000000e+00> : vector<4x32xf32>
    %99 = tpu.matmul %97, %98, %cst_46 {dimension_numbers = #tpu.dot_dimension_numbers<[1], [0], [0], [1], [0, 0, 1, 1], [], []>} : vector<4x4xbf16>, vector<4x32xbf16>, vector<4x32xf32> -> vector<4x32xf32>
    %100 = arith.addf %99, %96 : vector<4x32xf32>
    %101 = vector.broadcast %92 : vector<4x1xf32> to vector<4x32xf32>
    %102 = arith.mulf %101, %100 : vector<4x32xf32>
    %103 = vector.broadcast %85 : vector<1x32xf32> to vector<4x32xf32>
    %104 = arith.addf %102, %103 : vector<4x32xf32>
    %cst_47 = arith.constant 0.000000e+00 : f32
    %105 = vector.broadcast %cst_47 : f32 to vector<4x32xf32>
    %106 = arith.maximumf %104, %105 : vector<4x32xf32>
    %107 = arith.truncf %106 : vector<4x32xf32> to vector<4x32xbf16>
    %cst_48 = arith.constant dense<0.000000e+00> : vector<4x2xf32>
    %108 = tpu.matmul %107, %86, %cst_48 {dimension_numbers = #tpu.dot_dimension_numbers<[1], [0], [0], [1], [0, 0, 1, 1], [], []>} : vector<4x32xbf16>, vector<32x2xbf16>, vector<4x2xf32> -> vector<4x2xf32>
    %109 = vector.extract_strided_slice %108 {offsets = [0, 0], sizes = [4, 1], strides = [1, 1]} : vector<4x2xf32> to vector<4x1xf32>
    %110 = arith.truncf %82 : vector<4x4xf32> to vector<4x4xbf16>
    %111 = arith.truncf %109 : vector<4x1xf32> to vector<4x1xbf16>
    %cst_49 = arith.constant dense<0.000000e+00> : vector<4x1xf32>
    %112 = tpu.matmul %110, %111, %cst_49 {dimension_numbers = #tpu.dot_dimension_numbers<[1], [0], [0], [1], [0, 0, 1, 1], [], []>} : vector<4x4xbf16>, vector<4x1xbf16>, vector<4x1xf32> -> vector<4x1xf32>
    %113 = vector.extract_strided_slice %108 {offsets = [0, 1], sizes = [4, 1], strides = [1, 1]} : vector<4x2xf32> to vector<4x1xf32>
    %114 = arith.addf %112, %113 : vector<4x1xf32>
    %115 = vector.broadcast %87 : f32 to vector<4x1xf32>
    %116 = arith.addf %114, %115 : vector<4x1xf32>
    %c0_50 = arith.constant 0 : index
    %c0_51 = arith.constant 0 : index
    %117 = vector.load %arg11[%c0_50, %c0_51] : memref<4x32xf32, #tpu.memory_space<vmem>>, vector<4x32xf32>
    tpu.vector_store %arg11[%c0_50, %c0_51], %106 {strides = array<i32>} : memref<4x32xf32, #tpu.memory_space<vmem>>, vector<4x32xf32>,
    %c0_52 = arith.constant 0 : index
    %c0_53 = arith.constant 0 : index
    %118 = vector.load %arg12[%c0_52, %c0_53] : memref<4x1xf32, #tpu.memory_space<vmem>>, vector<4x1xf32>
    tpu.vector_store %arg12[%c0_52, %c0_53], %116 {strides = array<i32>} : memref<4x1xf32, #tpu.memory_space<vmem>>, vector<4x1xf32>,
    return
  }
}

module attributes {stable_mosaic.version = 11 : i64} {
  func.func @pool_mlp_kernel(%arg0: memref<2xi32, #tpu.memory_space<smem>>, %arg1: memref<4x32xf32, #tpu.memory_space<vmem>>, %arg2: memref<4x1xf32, #tpu.memory_space<vmem>>, %arg3: memref<2x32xf32, #tpu.memory_space<vmem>>, %arg4: memref<2x32xf32, #tpu.memory_space<vmem>>, %arg5: memref<2x32xf32, #tpu.memory_space<vmem>>, %arg6: memref<2x32xf32, #tpu.memory_space<vmem>>, %arg7: memref<2x8xf32, #tpu.memory_space<vmem>>, %arg8: memref<32x64xbf16, #tpu.memory_space<vmem>>, %arg9: memref<32x64xbf16, #tpu.memory_space<vmem>>, %arg10: memref<8x64xbf16, #tpu.memory_space<vmem>>, %arg11: memref<1x64xf32, #tpu.memory_space<vmem>>, %arg12: memref<64x64xbf16, #tpu.memory_space<vmem>>, %arg13: memref<1x64xf32, #tpu.memory_space<vmem>>, %arg14: memref<64x1xbf16, #tpu.memory_space<vmem>>, %arg15: memref<1xf32, #tpu.memory_space<smem>>, %arg16: memref<2x1xf32, #tpu.memory_space<vmem>>) attributes {dimension_semantics = [], scalar_prefetch = 0 : i64, scratch_operands = 0 : i64, tpu.core_type = #tpu.core_type<tc>} {
    %c0 = arith.constant 0 : index
    %0 = memref.load %arg0[%c0] : memref<2xi32, #tpu.memory_space<smem>>
    %1 = arith.index_cast %0 : i32 to index
    %c0_0 = arith.constant 0 : index
    %2 = vector.load %arg1[%1, %c0_0] : memref<4x32xf32, #tpu.memory_space<vmem>>, vector<1x32xf32>
    %c1 = arith.constant 1 : index
    %3 = memref.load %arg0[%c1] : memref<2xi32, #tpu.memory_space<smem>>
    %4 = arith.index_cast %3 : i32 to index
    %c0_1 = arith.constant 0 : index
    %5 = vector.load %arg1[%4, %c0_1] : memref<4x32xf32, #tpu.memory_space<vmem>>, vector<1x32xf32>
    %6 = tpu.concatenate %2, %5 in 0 : vector<1x32xf32>, vector<1x32xf32> -> vector<2x32xf32>
    %c0_2 = arith.constant 0 : index
    %7 = memref.load %arg0[%c0_2] : memref<2xi32, #tpu.memory_space<smem>>
    %8 = arith.index_cast %7 : i32 to index
    %c0_3 = arith.constant 0 : index
    %9 = vector.load %arg2[%8, %c0_3] : memref<4x1xf32, #tpu.memory_space<vmem>>, vector<1x1xf32>
    %c1_4 = arith.constant 1 : index
    %10 = memref.load %arg0[%c1_4] : memref<2xi32, #tpu.memory_space<smem>>
    %11 = arith.index_cast %10 : i32 to index
    %c0_5 = arith.constant 0 : index
    %12 = vector.load %arg2[%11, %c0_5] : memref<4x1xf32, #tpu.memory_space<vmem>>, vector<1x1xf32>
    %13 = tpu.concatenate %9, %12 in 0 : vector<1x1xf32>, vector<1x1xf32> -> vector<2x1xf32>
    %14 = math.tanh %13 : vector<2x1xf32>
    %15 = vector.broadcast %14 : vector<2x1xf32> to vector<2x32xf32>
    %16 = arith.mulf %6, %15 : vector<2x32xf32>
    %17 = vector.extract_strided_slice %16 {offsets = [0, 0], sizes = [1, 32], strides = [1, 1]} : vector<2x32xf32> to vector<1x32xf32>
    %cst = arith.constant dense<0xFF800000> : vector<32xf32>
    %18 = vector.multi_reduction <maximumf>, %17, %cst [0] : vector<1x32xf32> to vector<32xf32>
    %19 = vector.shape_cast %18 : vector<32xf32> to vector<1x32xf32>
    %cst_6 = arith.constant dense<0.000000e+00> : vector<32xf32>
    %20 = vector.multi_reduction <add>, %17, %cst_6 [0] : vector<1x32xf32> to vector<32xf32>
    %21 = vector.shape_cast %20 : vector<32xf32> to vector<1x32xf32>
    %cst_7 = arith.constant 1.000000e+00 : f32
    %22 = vector.broadcast %cst_7 : f32 to vector<1x32xf32>
    %23 = arith.mulf %21, %22 : vector<1x32xf32>
    %24 = vector.extract_strided_slice %16 {offsets = [1, 0], sizes = [1, 32], strides = [1, 1]} : vector<2x32xf32> to vector<1x32xf32>
    %cst_8 = arith.constant dense<0xFF800000> : vector<32xf32>
    %25 = vector.multi_reduction <maximumf>, %24, %cst_8 [0] : vector<1x32xf32> to vector<32xf32>
    %26 = vector.shape_cast %25 : vector<32xf32> to vector<1x32xf32>
    %cst_9 = arith.constant dense<0.000000e+00> : vector<32xf32>
    %27 = vector.multi_reduction <add>, %24, %cst_9 [0] : vector<1x32xf32> to vector<32xf32>
    %28 = vector.shape_cast %27 : vector<32xf32> to vector<1x32xf32>
    %cst_10 = arith.constant 1.000000e+00 : f32
    %29 = vector.broadcast %cst_10 : f32 to vector<1x32xf32>
    %30 = arith.mulf %28, %29 : vector<1x32xf32>
    %31 = tpu.concatenate %19, %26 in 0 : vector<1x32xf32>, vector<1x32xf32> -> vector<2x32xf32>
    %32 = tpu.concatenate %23, %30 in 0 : vector<1x32xf32>, vector<1x32xf32> -> vector<2x32xf32>
    %c0_11 = arith.constant 0 : index
    %c0_12 = arith.constant 0 : index
    %33 = vector.load %arg3[%c0_11, %c0_12] : memref<2x32xf32, #tpu.memory_space<vmem>>, vector<2x32xf32>
    %c0_13 = arith.constant 0 : index
    %c0_14 = arith.constant 0 : index
    %34 = vector.load %arg5[%c0_13, %c0_14] : memref<2x32xf32, #tpu.memory_space<vmem>>, vector<2x32xf32>
    %35 = arith.addf %33, %34 : vector<2x32xf32>
    %36 = arith.addf %35, %31 : vector<2x32xf32>
    %c0_15 = arith.constant 0 : index
    %c0_16 = arith.constant 0 : index
    %37 = vector.load %arg4[%c0_15, %c0_16] : memref<2x32xf32, #tpu.memory_space<vmem>>, vector<2x32xf32>
    %c0_17 = arith.constant 0 : index
    %c0_18 = arith.constant 0 : index
    %38 = vector.load %arg6[%c0_17, %c0_18] : memref<2x32xf32, #tpu.memory_space<vmem>>, vector<2x32xf32>
    %39 = arith.addf %37, %38 : vector<2x32xf32>
    %40 = arith.addf %39, %32 : vector<2x32xf32>
    %c0_19 = arith.constant 0 : index
    %c0_20 = arith.constant 0 : index
    %41 = vector.load %arg8[%c0_19, %c0_20] : memref<32x64xbf16, #tpu.memory_space<vmem>>, vector<32x64xbf16>
    %42 = arith.truncf %36 : vector<2x32xf32> to vector<2x32xbf16>
    %cst_21 = arith.constant dense<0.000000e+00> : vector<2x64xf32>
    %43 = tpu.matmul %42, %41, %cst_21 {dimension_numbers = #tpu.dot_dimension_numbers<[1], [0], [0], [1], [0, 0, 1, 1], [], []>} : vector<2x32xbf16>, vector<32x64xbf16>, vector<2x64xf32> -> vector<2x64xf32>
    %c0_22 = arith.constant 0 : index
    %c0_23 = arith.constant 0 : index
    %44 = vector.load %arg9[%c0_22, %c0_23] : memref<32x64xbf16, #tpu.memory_space<vmem>>, vector<32x64xbf16>
    %45 = arith.truncf %40 : vector<2x32xf32> to vector<2x32xbf16>
    %cst_24 = arith.constant dense<0.000000e+00> : vector<2x64xf32>
    %46 = tpu.matmul %45, %44, %cst_24 {dimension_numbers = #tpu.dot_dimension_numbers<[1], [0], [0], [1], [0, 0, 1, 1], [], []>} : vector<2x32xbf16>, vector<32x64xbf16>, vector<2x64xf32> -> vector<2x64xf32>
    %47 = arith.addf %43, %46 : vector<2x64xf32>
    %c0_25 = arith.constant 0 : index
    %c0_26 = arith.constant 0 : index
    %48 = vector.load %arg7[%c0_25, %c0_26] : memref<2x8xf32, #tpu.memory_space<vmem>>, vector<2x8xf32>
    %c0_27 = arith.constant 0 : index
    %c0_28 = arith.constant 0 : index
    %49 = vector.load %arg10[%c0_27, %c0_28] : memref<8x64xbf16, #tpu.memory_space<vmem>>, vector<8x64xbf16>
    %50 = arith.truncf %48 : vector<2x8xf32> to vector<2x8xbf16>
    %cst_29 = arith.constant dense<0.000000e+00> : vector<2x64xf32>
    %51 = tpu.matmul %50, %49, %cst_29 {dimension_numbers = #tpu.dot_dimension_numbers<[1], [0], [0], [1], [0, 0, 1, 1], [], []>} : vector<2x8xbf16>, vector<8x64xbf16>, vector<2x64xf32> -> vector<2x64xf32>
    %52 = arith.addf %47, %51 : vector<2x64xf32>
    %c0_30 = arith.constant 0 : index
    %c0_31 = arith.constant 0 : index
    %53 = vector.load %arg11[%c0_30, %c0_31] : memref<1x64xf32, #tpu.memory_space<vmem>>, vector<1x64xf32>
    %54 = vector.broadcast %53 : vector<1x64xf32> to vector<2x64xf32>
    %55 = arith.addf %52, %54 : vector<2x64xf32>
    %cst_32 = arith.constant 0.000000e+00 : f32
    %56 = vector.broadcast %cst_32 : f32 to vector<2x64xf32>
    %57 = arith.maximumf %55, %56 : vector<2x64xf32>
    %c0_33 = arith.constant 0 : index
    %c0_34 = arith.constant 0 : index
    %58 = vector.load %arg12[%c0_33, %c0_34] : memref<64x64xbf16, #tpu.memory_space<vmem>>, vector<64x64xbf16>
    %59 = arith.truncf %57 : vector<2x64xf32> to vector<2x64xbf16>
    %cst_35 = arith.constant dense<0.000000e+00> : vector<2x64xf32>
    %60 = tpu.matmul %59, %58, %cst_35 {dimension_numbers = #tpu.dot_dimension_numbers<[1], [0], [0], [1], [0, 0, 1, 1], [], []>} : vector<2x64xbf16>, vector<64x64xbf16>, vector<2x64xf32> -> vector<2x64xf32>
    %c0_36 = arith.constant 0 : index
    %c0_37 = arith.constant 0 : index
    %61 = vector.load %arg13[%c0_36, %c0_37] : memref<1x64xf32, #tpu.memory_space<vmem>>, vector<1x64xf32>
    %62 = vector.broadcast %61 : vector<1x64xf32> to vector<2x64xf32>
    %63 = arith.addf %60, %62 : vector<2x64xf32>
    %cst_38 = arith.constant 0.000000e+00 : f32
    %64 = vector.broadcast %cst_38 : f32 to vector<2x64xf32>
    %65 = arith.maximumf %63, %64 : vector<2x64xf32>
    %c0_39 = arith.constant 0 : index
    %c0_40 = arith.constant 0 : index
    %66 = vector.load %arg14[%c0_39, %c0_40] : memref<64x1xbf16, #tpu.memory_space<vmem>>, vector<64x1xbf16>
    %67 = arith.truncf %65 : vector<2x64xf32> to vector<2x64xbf16>
    %cst_41 = arith.constant dense<0.000000e+00> : vector<2x1xf32>
    %68 = tpu.matmul %67, %66, %cst_41 {dimension_numbers = #tpu.dot_dimension_numbers<[1], [0], [0], [1], [0, 0, 1, 1], [], []>} : vector<2x64xbf16>, vector<64x1xbf16>, vector<2x1xf32> -> vector<2x1xf32>
    %c0_42 = arith.constant 0 : index
    %69 = memref.load %arg15[%c0_42] : memref<1xf32, #tpu.memory_space<smem>>
    %70 = vector.broadcast %69 : f32 to vector<2x1xf32>
    %71 = arith.addf %68, %70 : vector<2x1xf32>
    %c0_43 = arith.constant 0 : index
    %c0_44 = arith.constant 0 : index
    %72 = vector.load %arg16[%c0_43, %c0_44] : memref<2x1xf32, #tpu.memory_space<vmem>>, vector<2x1xf32>
    tpu.vector_store %arg16[%c0_43, %c0_44], %71 {strides = array<i32>} : memref<2x1xf32, #tpu.memory_space<vmem>>, vector<2x1xf32>,
    return
  }
}

</mosaic_0001>

<bundles_post_ra>
// kernel: custom-call
= control target key start
LH: loop header
LB: loop body
LE: loop exit
PB: predicated region body
PF: predicated region fallthrough
CT: control target
= control target key end

     0   :  { %5 = vsyncpa [#allocation9], 0  ;;  %s1165_s0 = inlined_call_operand.vmem [shape: f32[2,2], index: 0, kind: input, shape index: {}]   ;;  %s1166_s1 = inlined_call_operand.hbm [shape: f32[2,1], index: 1, kind: output, shape index: {0}]   ;;  %s1167_s2 = inlined_call_operand.vmem [shape: s32[2,1], index: 2, kind: output, shape index: {1}]  }
   0x1   :  { %v28_v0 = vld [vmem:[%s1165_s0] sm:$0x3]  ;;  %v46_v1 = vlaneseq  ;;  %v1039_v23 = vmov 2147483648   ;;  %v1040_v24 = vmov 2147483647   ;;  %s1044_s6 = smov [#allocation8]  }
   0x2   :  { %29 = vst [vmem:[#allocation16] sm:$0x3] %v28_v0  ;;  %75 = vst [vmem:[#allocation13] sm:$0xff] %v1039_v23  ;;  %s936_s7 = sshll.u32 %s1044_s6, 4  ;;  %s937_s7 = int_to_ptr.vmem [resolvable:$true] %s936_s7 }
   0x3   :  { %v1064_v2 = vshrl.u32 %v46_v1, 7  ;;  %v47_v3 = vand.u32 127, %v46_v1  ;;  %76 = vst [vmem:[#allocation15] sm:$0xff] %v1040_v24  ;;  %s1015_s8 = scalar_lea.vmem %s937_s7, 32  ;;  %p1020_p3 = scmp.lt.s32.totalorder %s937_s7, %s937_s7 }
   0x4   :  { %p1016_p2 = scmp.ne.s32.totalorder %s937_s7, %s1015_s8  ;;  %p1021_p4 = scmp.lt.s32.totalorder %s1015_s8, %s1015_s8 }
   0x5   :  { %v50_v4 = vshrl.u32 %v1064_v2, 1 }
   0x6   :  { %p1022_p5 = por %p1021_p4, %p1020_p3 }
   0x7   :  { %v52_v5 = vmul.u32 128, %v50_v4 }
   0x8   :  { %p1023_p6 = pnand %p1022_p5, %p1016_p2 }
   0x9   :  { %v53_v6 = vadd.s32 %v52_v5, %v47_v3  ;;  %v55_v7 = vld [vmem:[#allocation16] sm:$0xff] }
   0xa   :  { %vm56_vm0 = vcmp.lt.s32.totalorder %v55_v7, 0  ;;  %v57_v8 = vsub.s32 2147483647, %v55_v7 }
   0xb   :  { %vm60_vm1 = vcmp.lt.s32.totalorder %v53_v6, 2  ;;  %v88_v9 = vrot.slane %v53_v6, 2 }
   0xc   :  { %v58_v10 = vsel %vm56_vm0, %v57_v8, %v55_v7 }
   0xd   :  { %v61_v11 = vsel %vm60_vm1, %v58_v10, 2147483648  ;;  %vm92_vm2 = vcmp.lt.s32.totalorder %v88_v9, %v53_v6 }
   0xe   :  { %62 = vst [vmem:[#allocation16] sm:$0xff] %v61_v11  ;;  %v87_v12 = vrot.slane %v61_v11, 2 }
  0x10   :  { %vm90_vm3 = vcmp.gt.s32.totalorder %v87_v12, %v61_v11  ;;  %vm91_vm4 = vcmp.eq.s32.totalorder %v87_v12, %v61_v11 }
  0x11   :  { %vm93_vm5 = vmand %vm91_vm4, %vm92_vm2 }
  0x12   :  { %vm94_vm6 = vmor %vm90_vm3, %vm93_vm5 }
  0x13   :  { %v95_v13 = vsel %vm94_vm6, %v87_v12, %v61_v11  ;;  %v96_v14 = vsel %vm94_vm6, %v88_v9, %v53_v6 }
  0x14   :  { %v98_v15 = vrot.slane %v95_v13, 2  ;;  %v99_v16 = vrot.slane %v96_v14, 2 }
  0x16   :  { %vm101_vm7 = vcmp.gt.s32.totalorder %v98_v15, %v95_v13  ;;  %vm102_vm8 = vcmp.eq.s32.totalorder %v98_v15, %v95_v13  ;;  %vm103_vm9 = vcmp.lt.s32.totalorder %v99_v16, %v96_v14 }
  0x17   :  { %vm104_vm10 = vmand %vm102_vm8, %vm103_vm9 }
  0x18   :  { %vm105_vm11 = vmor %vm101_vm7, %vm104_vm10 }
  0x19   :  { %v106_v17 = vsel %vm105_vm11, %v98_v15, %v95_v13  ;;  %v107_v18 = vsel %vm105_vm11, %v99_v16, %v96_v14 }
  0x1a   :  { %v109_v19 = vrot.slane %v106_v17, 2  ;;  %v110_v20 = vrot.slane %v107_v18, 2 }
  0x1c   :  { %vm112_vm12 = vcmp.gt.s32.totalorder %v109_v19, %v106_v17  ;;  %vm113_vm13 = vcmp.eq.s32.totalorder %v109_v19, %v106_v17  ;;  %vm114_vm14 = vcmp.lt.s32.totalorder %v110_v20, %v107_v18 }
  0x1d   :  { %vm115_vm15 = vmand %vm113_vm13, %vm114_vm14 }
  0x1e   :  { %vm116_vm0 = vmor %vm112_vm12, %vm115_vm15 }
  0x1f   :  { %v118_v21 = vsel %vm116_vm0, %v110_v20, %v107_v18  ;;  %v117_v22 = vsel %vm116_vm0, %v109_v19, %v106_v17 }
  0x20   :  { %152 = vxpose.xlu1.b32.start [1/16] %v118_v21, 128  ;;  %120 = vxpose.xlu0.b32.start [1/16] %v117_v22, 128 }
  0x24   :  { %153 = vxpose.xlu1.b32.cont [2/16] %v118_v21, 128  ;;  %121 = vxpose.xlu0.b32.cont [2/16] %v117_v22, 128 }
  0x28   :  { %154 = vxpose.xlu1.b32.cont [3/16] %v118_v21, 128  ;;  %122 = vxpose.xlu0.b32.cont [3/16] %v117_v22, 128 }
  0x2c   :  { %155 = vxpose.xlu1.b32.cont [4/16] %v118_v21, 128  ;;  %123 = vxpose.xlu0.b32.cont [4/16] %v117_v22, 128 }
  0x30   :  { %156 = vxpose.xlu1.b32.cont [5/16] %v118_v21, 128  ;;  %124 = vxpose.xlu0.b32.cont [5/16] %v117_v22, 128 }
  0x34   :  { %157 = vxpose.xlu1.b32.cont [6/16] %v118_v21, 128  ;;  %125 = vxpose.xlu0.b32.cont [6/16] %v117_v22, 128 }
  0x38   :  { %158 = vxpose.xlu1.b32.cont [7/16] %v118_v21, 128  ;;  %126 = vxpose.xlu0.b32.cont [7/16] %v117_v22, 128 }
  0x3c   :  { %159 = vxpose.xlu1.b32.cont [8/16] %v118_v21, 128  ;;  %127 = vxpose.xlu0.b32.cont [8/16] %v117_v22, 128 }
  0x40   :  { %160 = vxpose.xlu1.b32.cont [9/16] %v118_v21, 128  ;;  %128 = vxpose.xlu0.b32.cont [9/16] %v117_v22, 128 }
  0x44   :  { %161 = vxpose.xlu1.b32.cont [10/16] %v118_v21, 128  ;;  %129 = vxpose.xlu0.b32.cont [10/16] %v117_v22, 128 }
  0x48   :  { %162 = vxpose.xlu1.b32.cont [11/16] %v118_v21, 128  ;;  %130 = vxpose.xlu0.b32.cont [11/16] %v117_v22, 128 }
  0x4c   :  { %163 = vxpose.xlu1.b32.cont [12/16] %v118_v21, 128  ;;  %131 = vxpose.xlu0.b32.cont [12/16] %v117_v22, 128 }
  0x50   :  { %164 = vxpose.xlu1.b32.cont [13/16] %v118_v21, 128  ;;  %132 = vxpose.xlu0.b32.cont [13/16] %v117_v22, 128 }
  0x54   :  { %165 = vxpose.xlu1.b32.cont [14/16] %v118_v21, 128  ;;  %133 = vxpose.xlu0.b32.cont [14/16] %v117_v22, 128 }
  0x58   :  { %166 = vxpose.xlu1.b32.cont [15/16] %v118_v21, 128  ;;  %134 = vxpose.xlu0.b32.cont [15/16] %v117_v22, 128 }
  0x5c   :  { %167 = vxpose.xlu1.b32.end [16/16] %v118_v21, 128  ;;  %135 = vxpose.xlu0.b32.end [16/16] %v117_v22, 128 }
  0xa0   :  { %v168_v25 = vpop.trf.xlu1  ;;  %v136_v26 = vpop.trf.xlu0 }
  0xa4   :  { %v169_v27 = vpop.trf.xlu1  ;;  %v137_v28 = vpop.trf.xlu0 }
  0xa5   :  { %vm188_vm1 = vcmp.lt.s32.totalorder %v169_v27, %v168_v25  ;;  %vm186_vm2 = vcmp.gt.s32.totalorder %v137_v28, %v136_v26  ;;  %vm187_vm3 = vcmp.eq.s32.totalorder %v137_v28, %v136_v26 }
  0xa6   :  { %vm189_vm4 = vmand %vm187_vm3, %vm188_vm1 }
  0xa7   :  { %vm190_vm5 = vmor %vm186_vm2, %vm189_vm4 }
  0xa8   :  { %v191_v29 = vsel %vm190_vm5, %v137_v28, %v136_v26  ;;  %v170_v30 = vpop.trf.xlu1  ;;  %v192_v31 = vsel %vm190_vm5, %v169_v27, %v168_v25  ;;  %v138_v32 = vpop.trf.xlu0 }
  0xa9   :  { %vm197_vm6 = vcmp.lt.s32.totalorder %v170_v30, %v192_v31  ;;  %vm195_vm7 = vcmp.gt.s32.totalorder %v138_v32, %v191_v29  ;;  %vm196_vm8 = vcmp.eq.s32.totalorder %v138_v32, %v191_v29 }
  0xaa   :  { %vm198_vm9 = vmand %vm196_vm8, %vm197_vm6 }
  0xab   :  { %vm199_vm10 = vmor %vm195_vm7, %vm198_vm9 }
  0xac   :  { %v200_v33 = vsel %vm199_vm10, %v138_v32, %v191_v29  ;;  %v171_v34 = vpop.trf.xlu1  ;;  %v201_v35 = vsel %vm199_vm10, %v170_v30, %v192_v31  ;;  %v139_v36 = vpop.trf.xlu0 }
  0xad   :  { %vm206_vm11 = vcmp.lt.s32.totalorder %v171_v34, %v201_v35  ;;  %vm204_vm12 = vcmp.gt.s32.totalorder %v139_v36, %v200_v33  ;;  %vm205_vm13 = vcmp.eq.s32.totalorder %v139_v36, %v200_v33 }
  0xae   :  { %vm207_vm14 = vmand %vm205_vm13, %vm206_vm11 }
  0xaf   :  { %vm208_vm15 = vmor %vm204_vm12, %vm207_vm14 }
  0xb0   :  { %v209_v37 = vsel %vm208_vm15, %v139_v36, %v200_v33  ;;  %v172_v38 = vpop.trf.xlu1  ;;  %v210_v39 = vsel %vm208_vm15, %v171_v34, %v201_v35  ;;  %v140_v40 = vpop.trf.xlu0 }
  0xb1   :  { %vm215_vm0 = vcmp.lt.s32.totalorder %v172_v38, %v210_v39  ;;  %vm213_vm1 = vcmp.gt.s32.totalorder %v140_v40, %v209_v37  ;;  %vm214_vm2 = vcmp.eq.s32.totalorder %v140_v40, %v209_v37 }
  0xb2   :  { %vm216_vm3 = vmand %vm214_vm2, %vm215_vm0 }
  0xb3   :  { %vm217_vm4 = vmor %vm213_vm1, %vm216_vm3 }
  0xb4   :  { %v218_v41 = vsel %vm217_vm4, %v140_v40, %v209_v37  ;;  %v173_v42 = vpop.trf.xlu1  ;;  %v219_v43 = vsel %vm217_vm4, %v172_v38, %v210_v39  ;;  %v141_v44 = vpop.trf.xlu0 }
  0xb5   :  { %vm224_vm5 = vcmp.lt.s32.totalorder %v173_v42, %v219_v43  ;;  %vm222_vm6 = vcmp.gt.s32.totalorder %v141_v44, %v218_v41  ;;  %vm223_vm7 = vcmp.eq.s32.totalorder %v141_v44, %v218_v41 }
  0xb6   :  { %vm225_vm8 = vmand %vm223_vm7, %vm224_vm5 }
  0xb7   :  { %vm226_vm9 = vmor %vm222_vm6, %vm225_vm8 }
  0xb8   :  { %v227_v45 = vsel %vm226_vm9, %v141_v44, %v218_v41  ;;  %v174_v46 = vpop.trf.xlu1  ;;  %v228_v47 = vsel %vm226_vm9, %v173_v42, %v219_v43  ;;  %v142_v48 = vpop.trf.xlu0 }
  0xb9   :  { %vm233_vm10 = vcmp.lt.s32.totalorder %v174_v46, %v228_v47  ;;  %vm231_vm11 = vcmp.gt.s32.totalorder %v142_v48, %v227_v45  ;;  %vm232_vm12 = vcmp.eq.s32.totalorder %v142_v48, %v227_v45 }
  0xba   :  { %vm234_vm13 = vmand %vm232_vm12, %vm233_vm10 }
  0xbb   :  { %vm235_vm14 = vmor %vm231_vm11, %vm234_vm13 }
  0xbc   :  { %v236_v49 = vsel %vm235_vm14, %v142_v48, %v227_v45  ;;  %v175_v50 = vpop.trf.xlu1  ;;  %v237_v51 = vsel %vm235_vm14, %v174_v46, %v228_v47  ;;  %v143_v52 = vpop.trf.xlu0 }
  0xbd   :  { %vm242_vm15 = vcmp.lt.s32.totalorder %v175_v50, %v237_v51  ;;  %vm240_vm0 = vcmp.gt.s32.totalorder %v143_v52, %v236_v49  ;;  %vm241_vm1 = vcmp.eq.s32.totalorder %v143_v52, %v236_v49 }
  0xbe   :  { %vm243_vm2 = vmand %vm241_vm1, %vm242_vm15 }
  0xbf   :  { %vm244_vm3 = vmor %vm240_vm0, %vm243_vm2 }
  0xc0   :  { %v245_v53 = vsel %vm244_vm3, %v143_v52, %v236_v49  ;;  %v176_v54 = vpop.trf.xlu1  ;;  %v246_v55 = vsel %vm244_vm3, %v175_v50, %v237_v51  ;;  %v144_v56 = vpop.trf.xlu0 }
  0xc1   :  { %vm251_vm4 = vcmp.lt.s32.totalorder %v176_v54, %v246_v55  ;;  %vm249_vm5 = vcmp.gt.s32.totalorder %v144_v56, %v245_v53  ;;  %vm250_vm6 = vcmp.eq.s32.totalorder %v144_v56, %v245_v53 }
  0xc2   :  { %vm252_vm7 = vmand %vm250_vm6, %vm251_vm4 }
  0xc3   :  { %vm253_vm8 = vmor %vm249_vm5, %vm252_vm7 }
  0xc4   :  { %v254_v57 = vsel %vm253_vm8, %v144_v56, %v245_v53  ;;  %v177_v58 = vpop.trf.xlu1  ;;  %v255_v59 = vsel %vm253_vm8, %v176_v54, %v246_v55  ;;  %v145_v60 = vpop.trf.xlu0  ;;  %v1041_v54 = vmov 839939668  }
  0xc5   :  { %vm260_vm9 = vcmp.lt.s32.totalorder %v177_v58, %v255_v59  ;;  %vm258_vm10 = vcmp.gt.s32.totalorder %v145_v60, %v254_v57  ;;  %vm259_vm11 = vcmp.eq.s32.totalorder %v145_v60, %v254_v57  ;;  %v520_v55 = vunpack.c.l.s4 %v1041_v54 }
  0xc6   :  { %vm261_vm12 = vmand %vm259_vm11, %vm260_vm9 }
  0xc7   :  { %vm262_vm13 = vmor %vm258_vm10, %vm261_vm12  ;;  %v521_v56 = vunpack.c.0.s8 %v520_v55 }
  0xc8   :  { %v263_v61 = vsel %vm262_vm13, %v145_v60, %v254_v57  ;;  %v178_v62 = vpop.trf.xlu1  ;;  %v264_v63 = vsel %vm262_vm13, %v177_v58, %v255_v59  ;;  %v146_v0 = vpop.trf.xlu0  ;;  %v1042_v57 = vmov 1417023538  }
  0xc9   :  { %vm269_vm14 = vcmp.lt.s32.totalorder %v178_v62, %v264_v63  ;;  %vm267_vm15 = vcmp.gt.s32.totalorder %v146_v0, %v263_v61  ;;  %vm268_vm0 = vcmp.eq.s32.totalorder %v146_v0, %v263_v61  ;;  %v548_v58 = vunpack.c.l.s4 %v1042_v57 }
  0xca   :  { %vm270_vm1 = vmand %vm268_vm0, %vm269_vm14 }
  0xcb   :  { %vm271_vm2 = vmor %vm267_vm15, %vm270_vm1 }
  0xcc   :  { %v272_v3 = vsel %vm271_vm2, %v146_v0, %v263_v61  ;;  %v179_v4 = vpop.trf.xlu1  ;;  %v273_v5 = vsel %vm271_vm2, %v178_v62, %v264_v63  ;;  %v147_v6 = vpop.trf.xlu0  ;;  %v1070_v61 = vsub.s32 %v521_v56, %v1064_v2  ;;  %v541_v62 = vand.u32 4, %v1064_v2 }
  0xcd   :  { %vm278_vm3 = vcmp.lt.s32.totalorder %v179_v4, %v273_v5  ;;  %vm276_vm4 = vcmp.gt.s32.totalorder %v147_v6, %v272_v3  ;;  %vm277_vm5 = vcmp.eq.s32.totalorder %v147_v6, %v272_v3  ;;  %v549_v63 = vunpack.c.0.s8 %v548_v58 }
  0xce   :  { %vm279_vm6 = vmand %vm277_vm5, %vm278_vm3 }
  0xcf   :  { %vm280_vm7 = vmor %vm276_vm4, %vm279_vm6 }
  0xd0   :  { %v281_v7 = vsel %vm280_vm7, %v147_v6, %v272_v3  ;;  %v180_v8 = vpop.trf.xlu1  ;;  %v282_v9 = vsel %vm280_vm7, %v179_v4, %v273_v5  ;;  %v148_v10 = vpop.trf.xlu0 }
  0xd1   :  { %vm287_vm8 = vcmp.lt.s32.totalorder %v180_v8, %v282_v9  ;;  %vm285_vm9 = vcmp.gt.s32.totalorder %v148_v10, %v281_v7  ;;  %vm286_vm10 = vcmp.eq.s32.totalorder %v148_v10, %v281_v7 }
  0xd2   :  { %vm288_vm11 = vmand %vm286_vm10, %vm287_vm8 }
  0xd3   :  { %vm289_vm12 = vmor %vm285_vm9, %vm288_vm11 }
  0xd4   :  { %v290_v11 = vsel %vm289_vm12, %v148_v10, %v281_v7  ;;  %v181_v12 = vpop.trf.xlu1  ;;  %v291_v13 = vsel %vm289_vm12, %v180_v8, %v282_v9  ;;  %v149_v14 = vpop.trf.xlu0 }
  0xd5   :  { %vm296_vm13 = vcmp.lt.s32.totalorder %v181_v12, %v291_v13  ;;  %vm294_vm14 = vcmp.gt.s32.totalorder %v149_v14, %v290_v11  ;;  %vm295_vm15 = vcmp.eq.s32.totalorder %v149_v14, %v290_v11 }
  0xd6   :  { %vm297_vm0 = vmand %vm295_vm15, %vm296_vm13 }
  0xd7   :  { %vm298_vm1 = vmor %vm294_vm14, %vm297_vm0 }
  0xd8   :  { %v299_v15 = vsel %vm298_vm1, %v149_v14, %v290_v11  ;;  %v182_v16 = vpop.trf.xlu1  ;;  %v300_v17 = vsel %vm298_vm1, %v181_v12, %v291_v13  ;;  %v150_v18 = vpop.trf.xlu0  ;;  %v1043_v11 = vmov 1732584193   ;;  %v1082_v13 = vsub.s32 %v549_v63, %v1064_v2 }
  0xd9   :  { %vm305_vm2 = vcmp.lt.s32.totalorder %v182_v16, %v300_v17  ;;  %vm303_vm3 = vcmp.gt.s32.totalorder %v150_v18, %v299_v15  ;;  %vm304_vm4 = vcmp.eq.s32.totalorder %v150_v18, %v299_v15  ;;  %v576_v12 = vunpack.c.l.s4 %v1043_v11 }
  0xda   :  { %vm306_vm5 = vmand %vm304_vm4, %vm305_vm2  ;;  %v569_v14 = vand.u32 2, %v1064_v2 }
  0xdb   :  { %vm307_vm6 = vmor %vm303_vm3, %vm306_vm5 }
  0xdc   :  { %v308_v19 = vsel %vm307_vm6, %v150_v18, %v299_v15  ;;  %v183_v20 = vpop.trf.xlu1  ;;  %v309_v21 = vsel %vm307_vm6, %v182_v16, %v300_v17  ;;  %v151_v22 = vpop.trf.xlu0  ;;  %v577_v15 = vunpack.c.0.s8 %v576_v12 }
  0xdd   :  { %vm314_vm7 = vcmp.lt.s32.totalorder %v183_v20, %v309_v21  ;;  %vm312_vm8 = vcmp.gt.s32.totalorder %v151_v22, %v308_v19  ;;  %vm313_vm9 = vcmp.eq.s32.totalorder %v151_v22, %v308_v19 }
  0xde   :  { %vm315_vm10 = vmand %vm313_vm9, %vm314_vm7 }
  0xdf   :  { %vm316_vm11 = vmor %vm312_vm8, %vm315_vm10 }
  0xe0   :  { %v317_v24 = vsel %vm316_vm11, %v151_v22, %v308_v19  ;;  %v318_v25 = vsel %vm316_vm11, %v183_v20, %v309_v21  ;;  %v1096_v22 = vsub.s32 %v577_v15, %v1064_v2 }
  0xe1   :  { %v320_v26 = vrot.slane %v317_v24, 1  ;;  %v321_v27 = vrot.slane %v318_v25, 1 }
  0xe3   :  { %vm323_vm12 = vcmp.gt.s32.totalorder %v320_v26, %v317_v24  ;;  %vm324_vm13 = vcmp.eq.s32.totalorder %v320_v26, %v317_v24  ;;  %vm325_vm14 = vcmp.lt.s32.totalorder %v321_v27, %v318_v25 }
  0xe4   :  { %vm326_vm15 = vmand %vm324_vm13, %vm325_vm14 }
  0xe5   :  { %vm327_vm0 = vmor %vm323_vm12, %vm326_vm15 }
  0xe6   :  { %v328_v28 = vsel %vm327_vm0, %v320_v26, %v317_v24  ;;  %v329_v29 = vsel %vm327_vm0, %v321_v27, %v318_v25  ;;  %v597_v27 = vand.u32 1, %v1064_v2 }
  0xe7   :  { %v331_v30 = vrot.slane %v328_v28, 1  ;;  %v332_v31 = vrot.slane %v329_v29, 1 }
  0xe9   :  { %vm334_vm1 = vcmp.gt.s32.totalorder %v331_v30, %v328_v28  ;;  %vm335_vm2 = vcmp.eq.s32.totalorder %v331_v30, %v328_v28  ;;  %vm336_vm3 = vcmp.lt.s32.totalorder %v332_v31, %v329_v29 }
  0xea   :  { %vm337_vm4 = vmand %vm335_vm2, %vm336_vm3 }
  0xeb   :  { %vm338_vm5 = vmor %vm334_vm1, %vm337_vm4 }
  0xec   :  { %v339_v32 = vsel %vm338_vm5, %v331_v30, %v328_v28  ;;  %v340_v33 = vsel %vm338_vm5, %v332_v31, %v329_v29 }
  0xed   :  { %v342_v34 = vrot.slane %v339_v32, 1  ;;  %v343_v35 = vrot.slane %v340_v33, 1 }
  0xef   :  { %vm347_vm6 = vcmp.lt.s32.totalorder %v343_v35, %v340_v33  ;;  %vm345_vm7 = vcmp.gt.s32.totalorder %v342_v34, %v339_v32  ;;  %vm346_vm8 = vcmp.eq.s32.totalorder %v342_v34, %v339_v32 }
  0xf0   :  { %vm348_vm9 = vmand %vm346_vm8, %vm347_vm6 }
  0xf1   :  { %vm349_vm10 = vmor %vm345_vm7, %vm348_vm9 }
  0xf2   :  { %v350_v36 = vsel %vm349_vm10, %v342_v34, %v339_v32  ;;  %v351_v37 = vsel %vm349_vm10, %v343_v35, %v340_v33 }
  0xf3   :  { %v353_v38 = vrot.slane %v350_v36, 1  ;;  %v354_v39 = vrot.slane %v351_v37, 1 }
  0xf5   :  { %vm356_vm11 = vcmp.gt.s32.totalorder %v353_v38, %v350_v36  ;;  %vm357_vm12 = vcmp.eq.s32.totalorder %v353_v38, %v350_v36  ;;  %vm358_vm13 = vcmp.lt.s32.totalorder %v354_v39, %v351_v37 }
  0xf6   :  { %vm359_vm14 = vmand %vm357_vm12, %vm358_vm13 }
  0xf7   :  { %vm360_vm15 = vmor %vm356_vm11, %vm359_vm14 }
  0xf8   :  { %v361_v40 = vsel %vm360_vm15, %v353_v38, %v350_v36  ;;  %v362_v41 = vsel %vm360_vm15, %v354_v39, %v351_v37 }
  0xf9   :  { %v364_v42 = vrot.slane %v361_v40, 1  ;;  %v365_v43 = vrot.slane %v362_v41, 1 }
  0xfb   :  { %vm367_vm0 = vcmp.gt.s32.totalorder %v364_v42, %v361_v40  ;;  %vm368_vm1 = vcmp.eq.s32.totalorder %v364_v42, %v361_v40  ;;  %vm369_vm2 = vcmp.lt.s32.totalorder %v365_v43, %v362_v41 }
  0xfc   :  { %vm370_vm3 = vmand %vm368_vm1, %vm369_vm2 }
  0xfd   :  { %vm371_vm4 = vmor %vm367_vm0, %vm370_vm3 }
  0xfe   :  { %v372_v44 = vsel %vm371_vm4, %v364_v42, %v361_v40  ;;  %v373_v45 = vsel %vm371_vm4, %v365_v43, %v362_v41  ;;  %vm1077_vm4 = vcmp.ne.s32.totalorder %v541_v62, 0 }
  0xff   :  { %v375_v46 = vrot.slane %v372_v44, 1  ;;  %v376_v47 = vrot.slane %v373_v45, 1 }
 0x101   :  { %vm378_vm5 = vcmp.gt.s32.totalorder %v375_v46, %v372_v44  ;;  %vm379_vm6 = vcmp.eq.s32.totalorder %v375_v46, %v372_v44  ;;  %vm380_vm7 = vcmp.lt.s32.totalorder %v376_v47, %v373_v45 }
 0x102   :  { %vm381_vm8 = vmand %vm379_vm6, %vm380_vm7 }
 0x103   :  { %vm382_vm9 = vmor %vm378_vm5, %vm381_vm8 }
 0x104   :  { %v383_v48 = vsel %vm382_vm9, %v375_v46, %v372_v44  ;;  %v384_v49 = vsel %vm382_vm9, %v376_v47, %v373_v45 }
 0x105   :  { %v386_v50 = vrot.slane %v383_v48, 1  ;;  %v387_v51 = vrot.slane %v384_v49, 1 }
 0x107   :  { %vm389_vm10 = vcmp.gt.s32.totalorder %v386_v50, %v383_v48  ;;  %vm390_vm11 = vcmp.eq.s32.totalorder %v386_v50, %v383_v48  ;;  %vm391_vm12 = vcmp.lt.s32.totalorder %v387_v51, %v384_v49 }
 0x108   :  { %vm392_vm13 = vmand %vm390_vm11, %vm391_vm12 }
 0x109   :  { %vm393_vm14 = vmor %vm389_vm10, %vm392_vm13 }
 0x10a   :  { %v395_v52 = vsel %vm393_vm14, %v387_v51, %v384_v49  ;;  %v394_v53 = vsel %vm393_vm14, %v386_v50, %v383_v48 }
 0x10b   :  { %402 = vxpose.xlu0.b32.start.end [1/1] (short) (narrow) %v395_v52, 8  ;;  %398 = vst [vmem:[#allocation13] sm:$0x1] %v394_v53  ;;  %400 = vst [vmem:[#allocation15] sm:$0x1] %v395_v52 }
 0x112   :  { %v483_v59 = vld [vmem:[#allocation13 + $0x7] ss:$-1 sm:$0xff]  ;;  %v489_v60 = vld [vmem:[#allocation15 + $0x7] ss:$-1 sm:$0xff] }
 0x113   :  { %vm1001_vm15 = vcmp.lt.s32.totalorder %v483_v59, 2147483648  ;;  %vm1002_vm0 = vcmp.eq.s32.totalorder %v483_v59, 2147483648  ;;  %vm1003_vm1 = vcmp.gt.s32.totalorder %v489_v60, 2147483647 }
 0x114   :  { %vm504_vm2 = vmand %vm1002_vm0, %vm1003_vm1  ;;  %vm1089_vm0 = vcmp.ne.s32.totalorder %v569_v14, 0 }
 0x115   :  { %vm505_vm3 = vmor %vm1001_vm15, %vm504_vm2 }
 0x116   :  { %v506_v0 = vsel %vm505_vm3, 2147483648, %v483_v59  ;;  %v508_v3 = vsel %vm505_vm3, %v483_v59, 2147483648  ;;  %v510_v4 = vsel %vm505_vm3, 2147483647, %v489_v60  ;;  %v512_v5 = vsel %vm505_vm3, %v489_v60, 2147483647 }
 0x117   :  { %v525_v6 = vrot.slane %v506_v0, %v1070_v61  ;;  %v532_v7 = vrot.slane %v510_v4, %v1070_v61  ;;  %v706_v8 = vrot.slane %v508_v3, %v1070_v61  ;;  %v713_v9 = vrot.slane %v512_v5, %v1070_v61 }
 0x119   :  { %vm534_vm5 = vcmp.gt.s32.totalorder %v506_v0, %v525_v6  ;;  %vm535_vm6 = vcmp.eq.s32.totalorder %v506_v0, %v525_v6  ;;  %vm536_vm7 = vcmp.lt.s32.totalorder %v510_v4, %v532_v7  ;;  %vm716_vm9 = vcmp.eq.s32.totalorder %v508_v3, %v706_v8 }
 0x11a   :  { %vm537_vm8 = vmand %vm535_vm6, %vm536_vm7  ;;  %vm717_vm10 = vcmp.lt.s32.totalorder %v512_v5, %v713_v9  ;;  %vm715_vm12 = vcmp.gt.s32.totalorder %v508_v3, %v706_v8 }
 0x11b   :  { %vm538_vm11 = vmor %vm534_vm5, %vm537_vm8 }
 0x11c   :  { %vm543_vm13 = vmxor %vm538_vm11, %vm1077_vm4 }
 0x11d   :  { %v544_v16 = vsel %vm543_vm13, %v506_v0, %v525_v6  ;;  %v545_v17 = vsel %vm543_vm13, %v510_v4, %v532_v7  ;;  %vm718_vm14 = vmand %vm716_vm9, %vm717_vm10 }
 0x11e   :  { %v553_v18 = vrot.slane %v544_v16, %v1082_v13  ;;  %v560_v19 = vrot.slane %v545_v17, %v1082_v13  ;;  %vm719_vm15 = vmor %vm715_vm12, %vm718_vm14  ;;  %vm1105_vm14 = vcmp.ne.s32.totalorder %v597_v27, 0 }
 0x11f   :  { %vm724_vm1 = vmxor %vm719_vm15, %vm1077_vm4 }
 0x120   :  { %vm562_vm2 = vcmp.gt.s32.totalorder %v544_v16, %v553_v18  ;;  %vm563_vm3 = vcmp.eq.s32.totalorder %v544_v16, %v553_v18  ;;  %vm564_vm5 = vcmp.lt.s32.totalorder %v545_v17, %v560_v19  ;;  %v725_v21 = vsel %vm724_vm1, %v508_v3, %v706_v8 }
 0x121   :  { %vm565_vm6 = vmand %vm563_vm3, %vm564_vm5  ;;  %v726_v24 = vsel %vm724_vm1, %v512_v5, %v713_v9  ;;  %v734_v25 = vrot.slane %v725_v21, %v1082_v13 }
 0x122   :  { %vm566_vm7 = vmor %vm562_vm2, %vm565_vm6  ;;  %v741_v26 = vrot.slane %v726_v24, %v1082_v13 }
 0x123   :  { %vm571_vm8 = vmxor %vm566_vm7, %vm1089_vm0  ;;  %vm743_vm9 = vcmp.gt.s32.totalorder %v725_v21, %v734_v25  ;;  %vm744_vm10 = vcmp.eq.s32.totalorder %v725_v21, %v734_v25 }
 0x124   :  { %v572_v28 = vsel %vm571_vm8, %v544_v16, %v553_v18  ;;  %v573_v29 = vsel %vm571_vm8, %v545_v17, %v560_v19  ;;  %vm745_vm11 = vcmp.lt.s32.totalorder %v726_v24, %v741_v26 }
 0x125   :  { %v581_v30 = vrot.slane %v572_v28, %v1096_v22  ;;  %v588_v31 = vrot.slane %v573_v29, %v1096_v22  ;;  %vm746_vm12 = vmand %vm744_vm10, %vm745_vm11 }
 0x126   :  { %vm747_vm13 = vmor %vm743_vm9, %vm746_vm12 }
 0x127   :  { %vm590_vm15 = vcmp.gt.s32.totalorder %v572_v28, %v581_v30  ;;  %vm591_vm1 = vcmp.eq.s32.totalorder %v572_v28, %v581_v30  ;;  %vm592_vm2 = vcmp.lt.s32.totalorder %v573_v29, %v588_v31  ;;  %vm752_vm3 = vmxor %vm747_vm13, %vm1089_vm0 }
 0x128   :  { %vm593_vm5 = vmand %vm591_vm1, %vm592_vm2  ;;  %v753_v2 = vsel %vm752_vm3, %v725_v21, %v734_v25  ;;  %v754_v33 = vsel %vm752_vm3, %v726_v24, %v741_v26 }
 0x129   :  { %vm594_vm6 = vmor %vm590_vm15, %vm593_vm5  ;;  %v762_v34 = vrot.slane %v753_v2, %v1096_v22  ;;  %v769_v35 = vrot.slane %v754_v33, %v1096_v22 }
 0x12a   :  { %vm599_vm7 = vmxor %vm594_vm6, %vm1105_vm14 }
 0x12b   :  { %v600_v36 = vsel %vm599_vm7, %v572_v28, %v581_v30  ;;  %v601_v37 = vsel %vm599_vm7, %v573_v29, %v588_v31  ;;  %vm771_vm8 = vcmp.gt.s32.totalorder %v753_v2, %v762_v34  ;;  %vm772_vm9 = vcmp.eq.s32.totalorder %v753_v2, %v762_v34 }
 0x12c   :  { %v615_v38 = vrot.slane %v600_v36, %v1070_v61  ;;  %v622_v39 = vrot.slane %v601_v37, %v1070_v61  ;;  %vm773_vm10 = vcmp.lt.s32.totalorder %v754_v33, %v769_v35 }
 0x12d   :  { %vm774_vm11 = vmand %vm772_vm9, %vm773_vm10 }
 0x12e   :  { %vm624_vm12 = vcmp.gt.s32.totalorder %v600_v36, %v615_v38  ;;  %vm625_vm13 = vcmp.eq.s32.totalorder %v600_v36, %v615_v38  ;;  %vm626_vm15 = vcmp.lt.s32.totalorder %v601_v37, %v622_v39  ;;  %vm775_vm1 = vmor %vm771_vm8, %vm774_vm11 }
 0x12f   :  { %vm627_vm2 = vmand %vm625_vm13, %vm626_vm15 }
 0x130   :  { %vm628_vm3 = vmor %vm624_vm12, %vm627_vm2 }
 0x131   :  { %vm633_vm5 = vmxor %vm628_vm3, %vm1077_vm4 }
 0x132   :  { %v634_v40 = vsel %vm633_vm5, %v600_v36, %v615_v38  ;;  %v635_v41 = vsel %vm633_vm5, %v601_v37, %v622_v39  ;;  %vm780_vm6 = vmxor %vm775_vm1, %vm1105_vm14 }
 0x133   :  { %v643_v42 = vrot.slane %v634_v40, %v1082_v13  ;;  %v650_v43 = vrot.slane %v635_v41, %v1082_v13  ;;  %v781_v44 = vsel %vm780_vm6, %v753_v2, %v762_v34  ;;  %v782_v45 = vsel %vm780_vm6, %v754_v33, %v769_v35 }
 0x134   :  { %v796_v46 = vrot.slane %v781_v44, %v1070_v61  ;;  %v803_v47 = vrot.slane %v782_v45, %v1070_v61 }
 0x135   :  { %vm652_vm7 = vcmp.gt.s32.totalorder %v634_v40, %v643_v42  ;;  %vm653_vm8 = vcmp.eq.s32.totalorder %v634_v40, %v643_v42  ;;  %vm654_vm9 = vcmp.lt.s32.totalorder %v635_v41, %v650_v43 }
 0x136   :  { %vm655_vm10 = vmand %vm653_vm8, %vm654_vm9  ;;  %vm806_vm11 = vcmp.eq.s32.totalorder %v781_v44, %v796_v46  ;;  %vm807_vm12 = vcmp.lt.s32.totalorder %v782_v45, %v803_v47  ;;  %vm805_vm15 = vcmp.gt.s32.totalorder %v781_v44, %v796_v46 }
 0x137   :  { %vm656_vm13 = vmor %vm652_vm7, %vm655_vm10 }
 0x138   :  { %vm661_vm1 = vmxor %vm656_vm13, %vm1089_vm0 }
 0x139   :  { %v662_v48 = vsel %vm661_vm1, %v634_v40, %v643_v42  ;;  %v663_v49 = vsel %vm661_vm1, %v635_v41, %v650_v43  ;;  %vm808_vm2 = vmand %vm806_vm11, %vm807_vm12 }
 0x13a   :  { %v671_v50 = vrot.slane %v662_v48, %v1096_v22  ;;  %v678_v51 = vrot.slane %v663_v49, %v1096_v22  ;;  %vm809_vm3 = vmor %vm805_vm15, %vm808_vm2 }
 0x13b   :  { %vm814_vm5 = vmxor %vm809_vm3, %vm1077_vm4 }
 0x13c   :  { %vm680_vm6 = vcmp.gt.s32.totalorder %v662_v48, %v671_v50  ;;  %vm681_vm8 = vcmp.eq.s32.totalorder %v662_v48, %v671_v50  ;;  %vm682_vm9 = vcmp.lt.s32.totalorder %v663_v49, %v678_v51  ;;  %v815_v52 = vsel %vm814_vm5, %v781_v44, %v796_v46 }
 0x13d   :  { %vm683_vm7 = vmand %vm681_vm8, %vm682_vm9  ;;  %v816_v53 = vsel %vm814_vm5, %v782_v45, %v803_v47  ;;  %v824_v54 = vrot.slane %v815_v52, %v1082_v13 }
 0x13e   :  { %vm684_vm10 = vmor %vm680_vm6, %vm683_vm7  ;;  %v831_v55 = vrot.slane %v816_v53, %v1082_v13 }
 0x13f   :  { %vm689_vm11 = vmxor %vm684_vm10, %vm1105_vm14  ;;  %vm833_vm12 = vcmp.gt.s32.totalorder %v815_v52, %v824_v54  ;;  %vm834_vm13 = vcmp.eq.s32.totalorder %v815_v52, %v824_v54 }
 0x140   :  { %v1135_v56 = vsel %vm689_vm11, %v662_v48, %v671_v50  ;;  %v691_v57 = vsel %vm689_vm11, %v663_v49, %v678_v51  ;;  %vm835_vm4 = vcmp.lt.s32.totalorder %v816_v53, %v831_v55 }
 0x141   :  { %vm836_vm15 = vmand %vm834_vm13, %vm835_vm4  ;;  %902 = vxpose.xlu0.b32.start.end [1/1] (short) (narrow) %v691_v57, 8  ;;  %vm878_vm10 = vcmp.lt.s32.totalorder %v1135_v56, 0  ;;  %v879_v7 = vsub.s32 2147483647, %v1135_v56 }
 0x142   :  { %vm837_vm1 = vmor %vm833_vm12, %vm836_vm15 }
 0x143   :  { %vm842_vm2 = vmxor %vm837_vm1, %vm1089_vm0  ;;  %v880_v8 = vsel %vm878_vm10, %v879_v7, %v1135_v56 }
 0x144   :  { %v843_v58 = vsel %vm842_vm2, %v815_v52, %v824_v54  ;;  %v844_v59 = vsel %vm842_vm2, %v816_v53, %v831_v55 }
 0x145   :  { %v852_v60 = vrot.slane %v843_v58, %v1096_v22  ;;  %v859_v61 = vrot.slane %v844_v59, %v1096_v22  ;;  %883 = vxpose.xlu0.b32.start.end [1/1] (short) (narrow) %v880_v8, 8 }
 0x147   :  { %vm861_vm3 = vcmp.gt.s32.totalorder %v843_v58, %v852_v60  ;;  %vm862_vm5 = vcmp.eq.s32.totalorder %v843_v58, %v852_v60  ;;  %vm863_vm6 = vcmp.lt.s32.totalorder %v844_v59, %v859_v61 }
 0x148   :  { %vm864_vm8 = vmand %vm862_vm5, %vm863_vm6 }
 0x149   :  { %vm865_vm9 = vmor %vm861_vm3, %vm864_vm8 }
 0x14a   :  { %vm870_vm7 = vmxor %vm865_vm9, %vm1105_vm14 }
 0x14b   :  { %v871_v62 = vsel %vm870_vm7, %v843_v58, %v852_v60  ;;  %v872_v63 = vsel %vm870_vm7, %v844_v59, %v859_v61 }
 0x14c   :  { %874 = vst [vmem:[#allocation13] sm:$0xff] %v871_v62  ;;  %875 = vst [vmem:[#allocation15] sm:$0xff] %v872_v63 }
 0x18b   :  { %v418_v0 = vpop.trf.xlu0 }
 0x18c   :  { %v457_v3 = vrot.slane %v418_v0, 1  ;;  %1004 = vpush %v418_v0 }
 0x18e   :  { %1006 = vpush %v457_v3 }
 0x1bd   :  { %s1005_s0 = spop %1004 }
 0x1be   :  { %s435_s11 = sshrl.u32 %s1005_s0, 9  ;;  %s437_s12 = ssub.s32 0, %s1005_s0 }
 0x1bf   :  { %p436_p0 = scmp.lt.s32.totalorder %s1005_s0, 0  ;;  %s993_s13 = smin.u32 %s1005_s0, %s437_s12 }
 0x1c0   :  { %s439_s14 = sand.u32 511, %s993_s13   ;;  %s995_s15 = sshll.u32 %s435_s11, 3 }
 0x1c1   :  { %s440_s16 = ssub.s32 0, %s439_s14  ;;  %s1007_s17 = spop %1006  ;;  %v903_v9 = vpop.trf.xlu0 }
 0x1c2   :  { %s1175_s16 = smov (!%p436_p0, %s440_s16), %s439_s14  ;;  %s461_s21 = ssub.s32 0, %s1007_s17  ;;  %919 = vst [vmem:[#allocation10] sm:$0xff] %v903_v9 }
 0x1c3   :  { %s442_s18 = sshrl.u32 %s1175_s16, 7  ;;  %s444_s19 = sand.u32 127, %s1175_s16  }
 0x1c4   :  { %s994_s20 = sshll.u32 %s442_s18, 8  ;;  %s997_s23 = smin.u32 %s1007_s17, %s461_s21 }
 0x1c5   :  { %s445_s22 = sadd.s32 %s994_s20, %s444_s19  ;;  %p460_p1 = scmp.lt.s32.totalorder %s1007_s17, 0  ;;  %v884_v10 = vpop.trf.xlu0 }
 0x1c6   :  { %v447_v4 = vstv %s445_s22  ;;  %s463_s24 = sand.u32 511, %s997_s23   ;;  %s451_s26 = scalar_lea.vmem [#allocation16], %s995_s15  ;;  %900 = vst [vmem:[#allocation7] sm:$0xff] %v884_v10 }
 0x1c7   :  { %vm449_vm0 = vcmp.eq.s32.totalorder %v46_v1, %v447_v4  ;;  %s464_s25 = ssub.s32 0, %s463_s24  ;;  %s459_s27 = sshrl.u32 %s1007_s17, 9 }
 0x1c8   :  { %452 = vst.msk [vmem:[%s451_s26] sm:$0xff] %vm449_vm0, %v1039_v23  ;;  %s1177_s25 = smov (!%p460_p1, %s464_s25), %s463_s24  ;;  %s999_s4 = sshll.u32 %s459_s27, 3 }
 0x1c9   :  { %s466_s28 = sshrl.u32 %s1177_s25, 7  ;;  %s468_s29 = sand.u32 127, %s1177_s25   ;;  %v929_v11 = vld [vmem:[#allocation10] sm:$0x3] }
 0x1ca   :  { %s998_s30 = sshll.u32 %s466_s28, 8  ;;  %s475_s5 = scalar_lea.vmem [#allocation16], %s999_s4  ;;  %931 = vst [vmem:[#allocation11] sm:$0x3] %v929_v11 }
 0x1cb   :  { %s469_s3 = sadd.s32 %s998_s30, %s468_s29 }
 0x1cc   :  { %v471_v5 = vstv %s469_s3 }
 0x1cd   :  { %v472_v6 = vadd.s32 128, %v471_v5 }
 0x1cf   :  { %vm473_vm14 = vcmp.eq.s32.totalorder %v46_v1, %v472_v6  ;;  %v923_v1 = vld [vmem:[#allocation7] sm:$0x3] }
 0x1d0   :  { %476 = vst.msk [vmem:[%s475_s5] sm:$0xff] %vm473_vm14, %v1039_v23  ;;  %925 = vst [vmem:[#allocation8] sm:$0x3] %v923_v1 }
 0x1d1   :  { %1026 = shalt.err (!%p1023_p6)
}
 0x1d2   :  { %s1027_s0 = scalar_lea.hbm %s1166_s1, 32 }
 0x1d3   :  { %p1028_p7 = scmp.ne.s32.totalorder %s1166_s1, %s1027_s0  ;;  %p1031_p8 = scmp.lt.u32.totalorder %s1027_s0, %s1166_s1 }
 0x1d5   :  { %p1033_p9 = pnand %p1031_p8, %p1028_p7 }
 0x1d7   :  { %1036 = shalt.err (!%p1033_p9)
}
 0x1d8   :  { %939 = dma.vmem_to_hbm [thread:$0]  %s937_s7, 32, %s1166_s1, [#allocation9]   ;;  %v955_v23 = vld [vmem:[#allocation11] sm:$0x3] }
 0x1d9   :  { %956 = vst [vmem:[%s1167_s2] sm:$0x3] %v955_v23 }
 0x1da   :  { %1037 = dma.done.wait [#allocation9], 32  }
 0x1db   :  { %1038 = vsyncadd [#allocation9], 4294967264 }
 0x1dc   :  { %972 = vsyncpa [#allocation9], 1 }

// kernel: hiernet_forward.4
= control target key start
LH: loop header
LB: loop body
LE: loop exit
PB: predicated region body
PF: predicated region fallthrough
CT: control target
= control target key end

     0   :  { %vm54_vm0 = vcmask 1041408   ;;  %v334_v0 = vmov 0.0   ;;  %vm335_vm1 = vmmov 0   ;;  %vm38_vm2 = vcmask 130048   ;;  %s424_s2 = inlined_call_operand.vmem [shape: bf16[4,32], index: 2, kind: input, shape index: {}]   ;;  %s425_s1 = inlined_call_operand.vmem [shape: f32[16,4], index: 1, kind: input, shape index: {}]   ;;  %s426_s0 = inlined_call_operand.vmem [shape: f32[16,16], index: 0, kind: input, shape index: {}]   ;;  %s427_s4 = inlined_call_operand.vmem [shape: bf16[32,2], index: 4, kind: input, shape index: {}]   ;;  %s428_s3 = inlined_call_operand.vmem [shape: f32[1,32], index: 3, kind: input, shape index: {}]   ;;  %s429_s6 = inlined_call_operand.vmem [shape: f32[16,32], index: 6, kind: output, shape index: {0}]   ;;  %s430_s5 = inlined_call_operand.<no memory space> [shape: f32[1], index: 5, kind: input, shape index: {}]   ;;  %s431_s7 = inlined_call_operand.vmem [shape: f32[16,1], index: 7, kind: output, shape index: {1}]  }
   0x1   :  { %299 = vmatprep.subr.bf16.mxu0 %v334_v0  ;;  %v31_v1 = vld [vmem:[%s424_s2] sm:$0x3]  ;;  %301 = vmatprep.mubr.msk.bf16.mxu0 %vm335_vm1, %v334_v0  ;;  %v30_v3 = vld [vmem:[%s425_s1 + $0x8] sm:$0xff]  ;;  %vm50_vm3 = vcmask 31744   ;;  %vm172_vm4 = vcmask 261120   ;;  %v267_v47 = vstv %s430_s5  ;;  %vm272_vm5 = vcmask 7168  }
   0x2   :  { %v29_v2 = vld [vmem:[%s425_s1] sm:$0xff]  ;;  %v56_v4 = vsel %vm54_vm0, %v31_v1, 0  ;;  %v28_v7 = vld [vmem:[%s426_s0 + $0x8] sm:$0xff]  ;;  %305 = vmatprep.subr.bf16.mxu1 %v334_v0  ;;  %307 = vmatprep.mubr.msk.bf16.mxu1 %vm335_vm1, %v334_v0 }
   0x3   :  { %v49_v5 = vpack.c.bf16 %v30_v3, %v29_v2  ;;  %v27_v6 = vld [vmem:[%s426_s0] sm:$0xff]  ;;  %300 = vmatpush3.bf16.msra.mxu0 %v56_v4  ;;  %v42_v10 = vsel %vm38_vm2, %v28_v7, 0.0  ;;  %v329_v25 = vld [vmem:[%s427_s4 + $0x8] sm:$0xff]  }
   0x4   :  { %v39_v8 = vsel %vm38_vm2, %v27_v6, 0.0  ;;  %v101_v9 = vpack.c.bf16 %v28_v7, %v27_v6  ;;  %311 = vmatprep.subr.bf16.mxu0 %v334_v0  ;;  %v328_v24 = vld [vmem:[%s427_s4] sm:$0xff]  }
   0x5   :  { %40 = vadd.xlane.f32.xlu0 %v39_v8  ;;  %v285_v29 = vld [vmem:[%s428_s3] ss:$0 sm:$0xff]  ;;  %s336_s3 = smov 127  }
   0x6   :  { %302 = vmatmul.mubr.msk.bf16.vlgmr.msra.gmra.mrb[0].mxu0 %vm50_vm3, %v49_v5 }
   0x7   :  { %315 = vmatprep.mubr.msk.bf16.mxu0 %vm335_vm1, %v334_v0  ;;  %312 = vmatpush3.bf16.msra.mxu0 %v328_v24 }
   0x8   :  { %313 = vmatprep.subr.bf16.mxu0 %v334_v0 }
   0x9   :  { %43 = vadd.xlane.f32.xlu0 %v42_v10 }
   0xb   :  { %314 = vmatpush3.bf16.msra.mxu0 %v329_v25 }
  0x92   :  { %v41_v11 = vpop.xlane.xlu0 %40 }
  0x93   :  { %v45_v14 = vadd.f32 1.0, %v41_v11 }
  0x96   :  { %v44_v12 = vpop.xlane.xlu0 %43 }
  0x97   :  { %v46_v13 = vadd.f32 1.0, %v44_v12 }
  0x99   :  { %330 = vrsqrt.f32 %v46_v13 }
  0x9a   :  { %332 = vrsqrt.f32 %v45_v14 }
  0xa3   :  { %v331_v15 = vpop.eup %330 }
  0xa4   :  { %v333_v18 = vpop.eup %332 }
  0xd9   :  { %v92_v16 = vpop.f32.mrb[0].mxu0 }
  0xda   :  { %v303_v17 = vpop.f32.mrb[1].mxu0  ;;  %v99_v20 = vmul.f32 %v333_v18, %v92_v16 }
  0xdb   :  { %v95_v19 = vpop.f32.mrb[2].mxu0 }
  0xdc   :  { %v100_v21 = vmul.f32 %v331_v15, %v95_v19  ;;  %v304_v22 = vpop.f32.mrb[3].mxu0 }
  0xde   :  { %v102_v23 = vpack.c.bf16 %v100_v21, %v99_v20 }
  0xe0   :  { %306 = vmatpush3.bf16.msra.mxu1 %v102_v23 }
  0xe1   :  { %319 = vmatprep.subr.bf16.mxu1 %v334_v0 }
  0xe3   :  { %308 = vmatmul.mubr.msk.bf16.vlgmr.msra.gmra.mrb[0].mxu1 %vm38_vm2, %v101_v9 }
  0xe4   :  { %321 = vmatprep.mubr.msk.bf16.mxu1 %vm335_vm1, %v334_v0 }
 0x1b6   :  { %v140_v26 = vpop.f32.mrb[0].mxu1 }
 0x1b7   :  { %v141_v27 = vadd.f32 %v140_v26, %v99_v20  ;;  %v309_v28 = vpop.f32.mrb[1].mxu1 }
 0x1b8   :  { %v143_v30 = vpop.f32.mrb[2].mxu1 }
 0x1b9   :  { %v147_v31 = vmul.f32 %v333_v18, %v141_v27  ;;  %v144_v32 = vadd.f32 %v143_v30, %v100_v21  ;;  %v310_v33 = vpop.f32.mrb[3].mxu1 }
 0x1bb   :  { %v155_v34 = vadd.f32 %v285_v29, %v147_v31  ;;  %v148_v35 = vmul.f32 %v331_v15, %v144_v32 }
 0x1bd   :  { %v157_v36 = vmax.f32 %v155_v34, 0.0  ;;  %v156_v37 = vadd.f32 %v285_v29, %v148_v35 }
 0x1bf   :  { %v158_v38 = vmax.f32 %v156_v37, 0.0  ;;  %270 = vst.msk [vmem:[%s429_s6] sm:$0xff] %vm172_vm4, %v157_v36 }
 0x1c1   :  { %v159_v39 = vpack.c.bf16 %v158_v38, %v157_v36  ;;  %271 = vst.msk [vmem:[%s429_s6 + $0x8] sm:$0xff] %vm172_vm4, %v158_v38 }
 0x1c3   :  { %316 = vmatmul.mubr.msk.bf16.vlgmr.msra.gmra.mrb[4].mxu0 %vm172_vm4, %v159_v39 }
 0x296   :  { %v210_v40 = vpop.f32.mrb[4].mxu0 }
 0x297   :  { %220 = vrot.lane.b32.xlu1 %v210_v40, %s336_s3  ;;  %v317_v41 = vpop.f32.mrb[5].mxu0 }
 0x298   :  { %v213_v42 = vpop.f32.mrb[6].mxu0 }
 0x299   :  { %v217_v43 = vpack.c.bf16 %v213_v42, %v210_v40  ;;  %v318_v44 = vpop.f32.mrb[7].mxu0 }
 0x29b   :  { %222 = vrot.lane.b32.xlu1 %v213_v42, %s336_s3  ;;  %320 = vmatpush3.bf16.msra.mxu1 %v217_v43 }
 0x29e   :  { %322 = vmatmul.mubr.msk.bf16.vlgmr.msra.gmra.mrb[4].mxu1 %vm38_vm2, %v101_v9 }
 0x309   :  { %v221_v45 = vpop.permute.xlu1 %220 }
 0x30d   :  { %v223_v50 = vpop.permute.xlu1 %222 }
 0x371   :  { %v260_v46 = vpop.f32.mrb[4].mxu1 }
 0x372   :  { %v261_v48 = vadd.f32 %v260_v46, %v221_v45  ;;  %v323_v49 = vpop.f32.mrb[5].mxu1 }
 0x373   :  { %v263_v51 = vpop.f32.mrb[6].mxu1 }
 0x374   :  { %v268_v52 = vadd.f32 %v267_v47, %v261_v48  ;;  %v264_v53 = vadd.f32 %v263_v51, %v223_v50  ;;  %v324_v54 = vpop.f32.mrb[7].mxu1 }
 0x376   :  { %273 = vst.msk [vmem:[%s431_s7] sm:$0xff] %vm272_vm5, %v268_v52  ;;  %v269_v55 = vadd.f32 %v267_v47, %v264_v53 }
 0x378   :  { %274 = vst.msk [vmem:[%s431_s7 + $0x8] sm:$0xff] %vm272_vm5, %v269_v55 }

// kernel: hiernet_forward.6
= control target key start
LH: loop header
LB: loop body
LE: loop exit
PB: predicated region body
PF: predicated region fallthrough
CT: control target
= control target key end

     0   :  { %19 = vsyncpa [#allocation5], 0  ;;  %s891_s0 = inlined_call_operand.vmem [shape: s32[4], index: 0, kind: input, shape index: {}]   ;;  %s892_s1 = inlined_call_operand.vmem [shape: f32[8,8], index: 1, kind: input, shape index: {}]   ;;  %s893_s2 = inlined_call_operand.vmem [shape: f32[8,32], index: 2, kind: input, shape index: {}]   ;;  %s894_s3 = inlined_call_operand.vmem [shape: f32[8,1], index: 3, kind: input, shape index: {}]   ;;  %s895_s4 = inlined_call_operand.vmem [shape: bf16[32,32], index: 4, kind: input, shape index: {}]   ;;  %s896_s5 = inlined_call_operand.vmem [shape: f32[1,32], index: 5, kind: input, shape index: {}]   ;;  %s897_s6 = inlined_call_operand.vmem [shape: bf16[32,2], index: 6, kind: input, shape index: {}]   ;;  %s898_s7 = inlined_call_operand.<no memory space> [shape: f32[1], index: 7, kind: input, shape index: {}]   ;;  %s899_s8 = inlined_call_operand.vmem [shape: f32[2,32], index: 8, kind: output, shape index: {0}]   ;;  %s900_s9 = inlined_call_operand.vmem [shape: f32[2,32], index: 9, kind: output, shape index: {1}]   ;;  %s901_s10 = inlined_call_operand.hbm [shape: f32[4,4], index: 10, kind: output, shape index: {2}]   ;;  %s902_s11 = inlined_call_operand.vmem [shape: f32[4,32], index: 11, kind: output, shape index: {3}]   ;;  %s903_s12 = inlined_call_operand.vmem [shape: f32[4,1], index: 12, kind: output, shape index: {4}]  }
   0x1   :  { %20 = vsyncpa [#allocation4], 0  ;;  %s27_s23 = sshll.u32 %s891_s0, 4  ;;  %s28_s23 = int_to_ptr.vmem [resolvable:$true] %s27_s23 }
   0x2   :  { %s631_s24 = scalar_lea.vmem %s28_s23, 16  ;;  %p636_p1 = scmp.lt.s32.totalorder %s28_s23, %s28_s23 }
   0x3   :  { %p632_p0 = scmp.ne.s32.totalorder %s28_s23, %s631_s24  ;;  %p637_p2 = scmp.lt.s32.totalorder %s631_s24, %s631_s24 }
   0x5   :  { %p638_p3 = por %p637_p2, %p636_p1 }
   0x7   :  { %p639_p4 = pnand %p638_p3, %p632_p0 }
   0x9   :  { %642 = shalt.err (!%p639_p4)
}
   0xa   :  { %s669_s25 = smov [#allocation3]  }
   0xb   :  { %30 = dma.vmem_to_smem %s28_s23, 16, %s669_s25, [#allocation5]  }
   0xc   :  { %665 = dma.done.wait [#allocation5], 16  }
   0xd   :  { %666 = vsyncadd [#allocation5], 4294967280 }
   0xe   :  { %48 = sfence }
   0xf   :  { %s743_s26 = sld [smem:[#allocation3]]  ;;  %s745_s27 = sld [smem:[#allocation3 + $0x1]]  ;;  %v167_v0 = vlaneseq  ;;  %v670_v1 = vmov 0.0   ;;  %vm185_vm0 = vcmask 7168   ;;  %vm671_vm1 = vmmov 0   ;;  %v623_v46 = vld [vmem:[%s895_s4] sm:$0xff]  }
  0x10   :  { %583 = vmatprep.subr.mxu0 %v670_v1  ;;  %s748_s0 = sld [smem:[#allocation3 + $0x2]]  ;;  %s750_s28 = sld [smem:[#allocation3 + $0x3]]  ;;  %588 = vmatprep.subr.bf16.mxu1 %v670_v1  ;;  %vm187_vm2 = vcmask 15360   ;;  %vm189_vm3 = vcmask 23552   ;;  %v672_v3 = vmov 0   ;;  %vm71_vm4 = vcmask 1040384  }
  0x11   :  { %v168_v2 = vshrl.u32 %v167_v0, 7  ;;  %585 = vmatprep.mubr.msk.f32.mxu0 %vm671_vm1, %v670_v1  ;;  %592 = vmatprep.mubr.msk.bf16.mxu1 %vm671_vm1, %v670_v1  ;;  %vm73_vm5 = vcmask 1041408   ;;  %vm75_vm10 = vcmask 1042432   ;;  %vm191_vm11 = vcmask 64512   ;;  %v624_v47 = vld [vmem:[%s895_s4 + $0x8] sm:$0xff]  }
  0x12   :  { %622 = vset.pattern.permute.xlu0 %v672_v3  ;;  %589 = vmatpush3.bf16.msra.mxu1 %v623_v46  ;;  %vm104_vm12 = vcmask 254976   ;;  %vm120_vm13 = vcmask 257026   ;;  %vm295_vm14 = vcmask 261120   ;;  %vm265_vm15 = vcmask 27648  }
  0x13   :  { %590 = vmatprep.subr.bf16.mxu1 %v670_v1 }
  0x15   :  { %v169_v4 = vstv %s743_s26  ;;  %v173_v5 = vstv %s745_s27  ;;  %s77_s13 = scalar_lea.vmem %s894_s3, %s743_s26  ;;  %s79_s16 = scalar_lea.vmem %s894_s3, %s745_s27 }
  0x16   :  { %vm170_vm6 = vcmp.eq.s32.totalorder %v168_v2, %v169_v4  ;;  %vm174_vm7 = vcmp.eq.s32.totalorder %v168_v2, %v173_v5  ;;  %v177_v6 = vstv %s748_s0  ;;  %v181_v7 = vstv %s750_s28  ;;  %v78_v8 = vld [vmem:[%s77_s13] sm:$0x1]  ;;  %s81_s19 = scalar_lea.vmem %s894_s3, %s748_s0  ;;  %s83_s22 = scalar_lea.vmem %s894_s3, %s750_s28  ;;  %591 = vmatpush3.bf16.msra.mxu1 %v624_v47 }
  0x17   :  { %v80_v9 = vld [vmem:[%s79_s16] sm:$0x1]  ;;  %v557_v10 = vsel %vm170_vm6, 1.0, %v670_v1  ;;  %v558_v11 = vsel %vm174_vm7, 1.0, %v670_v1  ;;  %vm178_vm8 = vcmp.eq.s32.totalorder %v168_v2, %v177_v6  ;;  %vm182_vm9 = vcmp.eq.s32.totalorder %v168_v2, %v181_v7  ;;  %s144_s25 = scalar_lea.vmem %s892_s1, %s743_s26  ;;  %s147_s13 = scalar_lea.vmem %s892_s1, %s745_s27  ;;  %610 = vmatprep.subr.bf16.mxu1 %v670_v1 }
  0x18   :  { %v82_v12 = vld [vmem:[%s81_s19] sm:$0x1]  ;;  %v559_v14 = vsel %vm178_vm8, 1.0, %v670_v1  ;;  %v560_v15 = vsel %vm182_vm9, 1.0, %v670_v1  ;;  %v186_v16 = vsel %vm185_vm0, %v557_v10, %v558_v11  ;;  %v86_v17 = vrot.slane %v80_v9, 7  ;;  %s150_s15 = scalar_lea.vmem %s892_s1, %s748_s0  ;;  %s153_s18 = scalar_lea.vmem %s892_s1, %s750_s28 }
  0x19   :  { %v84_v13 = vld [vmem:[%s83_s22] sm:$0x1]  ;;  %v188_v19 = vsel %vm187_vm2, %v186_v16, %v559_v14  ;;  %v89_v20 = vrot.slane %v82_v12, 6  ;;  %s54_s20 = scalar_lea.vmem %s893_s2, %s745_s27  ;;  %s57_s23 = scalar_lea.vmem %s893_s2, %s748_s0  ;;  %vm342_vm0 = vcmask 31744  }
  0x1a   :  { %v145_v18 = vld [vmem:[%s144_s25] sm:$0x1]  ;;  %v92_v21 = vrot.slane %v84_v13, 5  ;;  %v190_v24 = vsel %vm189_vm3, %v188_v19, %v560_v15  ;;  %v94_v25 = vsel %vm71_vm4, %v78_v8, %v86_v17  ;;  %s60_s29 = scalar_lea.vmem %s893_s2, %s750_s28 }
  0x1b   :  { %v148_v22 = vld [vmem:[%s147_s13] sm:$0x1]  ;;  %584 = vmatpush3.msra.mxu0 %v190_v24  ;;  %v95_v29 = vsel %vm73_vm5, %v94_v25, %v89_v20  ;;  %s51_s13 = scalar_lea.vmem %s893_s2, %s743_s26 }
  0x1c   :  { %v151_v23 = vld [vmem:[%s150_s15] sm:$0x1]  ;;  %v156_v27 = vrot.slane %v148_v22, 7  ;;  %v96_v31 = vsel %vm75_vm10, %v95_v29, %v92_v21  ;;  %596 = vmatprep.subr.bf16.mxu0 %v670_v1 }
  0x1d   :  { %v154_v26 = vld [vmem:[%s153_s18] sm:$0x1]  ;;  %v159_v28 = vrot.slane %v151_v23, 6  ;;  %627 = vtanh.f32 %v96_v31 }
  0x1e   :  { %v162_v30 = vrot.slane %v154_v26, 5  ;;  %v164_v32 = vsel %vm71_vm4, %v145_v18, %v156_v27  ;;  %v55_v35 = vld [vmem:[%s54_s20] sm:$0x1] }
  0x1f   :  { %v165_v33 = vsel %vm73_vm5, %v164_v32, %v159_v28  ;;  %v58_v36 = vld [vmem:[%s57_s23] sm:$0x1]  ;;  %v63_v38 = vrot.slane %v55_v35, 7 }
  0x20   :  { %v166_v34 = vsel %vm75_vm10, %v165_v33, %v162_v30  ;;  %v61_v37 = vld [vmem:[%s60_s29] sm:$0x1]  ;;  %v66_v39 = vrot.slane %v58_v36, 6  ;;  %v626_v36 = vld [vmem:[%s897_s6 + $0x8] sm:$0xff]  }
  0x21   :  { %586 = vmatmul.mubr.msk.f32.vlgmr.msra.gmra.mrb[0].mxu0 %vm191_vm11, %v166_v34  ;;  %v69_v41 = vrot.slane %v61_v37, 5  ;;  %v52_v42 = vld [vmem:[%s51_s13] sm:$0x1] }
  0x22   :  { %598 = vmatprep.mubr.msk.bf16.mxu0 %vm671_vm1, %v670_v1  ;;  %v72_v43 = vsel %vm71_vm4, %v52_v42, %v63_v38  ;;  %v625_v35 = vld [vmem:[%s897_s6] sm:$0xff]   ;;  %s673_s6 = smov 127  }
  0x23   :  { %v74_v44 = vsel %vm73_vm5, %v72_v43, %v66_v39 }
  0x24   :  { %v76_v45 = vsel %vm75_vm10, %v74_v44, %v69_v41 }
  0x27   :  { %v628_v40 = vpop.eup %627 }
  0x28   :  { %100 = vperm.xlu0 %622, %v628_v40   ;;  %v566_v40 = vld [vmem:[%s896_s5] ss:$0 sm:$0xff]  ;;  %s674_s5 = smov [#allocation6]  }
  0x29   :  { %s518_s21 = sshll.u32 %s674_s5, 4  ;;  %s519_s21 = int_to_ptr.vmem [resolvable:$true] %s518_s21 }
  0x2a   :  { %s643_s22 = scalar_lea.vmem %s519_s21, 64  ;;  %p648_p6 = scmp.lt.s32.totalorder %s519_s21, %s519_s21 }
  0x2b   :  { %p644_p5 = scmp.ne.s32.totalorder %s519_s21, %s643_s22  ;;  %p649_p7 = scmp.lt.s32.totalorder %s643_s22, %s643_s22 }
  0x2d   :  { %p650_p8 = por %p649_p7, %p648_p6 }
  0x2f   :  { %p651_p9 = pnand %p650_p8, %p644_p5 }
  0xa7   :  { %v101_v48 = vpop.permute.xlu0 %100 }
  0xa8   :  { %v103_v49 = vmul.f32 %v101_v48, %v76_v45 }
  0xaa   :  { %v105_v50 = vsel %vm104_vm12, %v103_v49, -inf  ;;  %v112_v51 = vsel %vm104_vm12, %v103_v49, 0.0  ;;  %v121_v52 = vsel %vm120_vm13, %v103_v49, -inf  ;;  %v129_v53 = vrot.slane %v103_v49, 2 }
  0xab   :  { %v106_v54 = vrot.slane %v105_v50, 4  ;;  %v113_v55 = vrot.slane %v112_v51, 4  ;;  %v122_v56 = vrot.slane %v121_v52, 4  ;;  %v282_v57 = vpack.c.bf16 %v103_v49, %v103_v49 }
  0xac   :  { %v131_v58 = vsel %vm104_vm12, %v129_v53, 0.0 }
  0xad   :  { %v107_v59 = vmax.f32 %v105_v50, %v106_v54  ;;  %v114_v60 = vadd.f32 %v113_v55, %v112_v51  ;;  %v123_v61 = vmax.f32 %v121_v52, %v122_v56  ;;  %v132_v62 = vrot.slane %v131_v58, 4  ;;  %593 = vmatmul.mubr.msk.bf16.vlgmr.msra.gmra.mrb[0].mxu1 %vm295_vm14, %v282_v57 }
  0xae   :  { %612 = vmatprep.mubr.msk.bf16.mxu1 %vm671_vm1, %v670_v1 }
  0xaf   :  { %v108_v63 = vrot.slane %v107_v59, 2  ;;  %v115_v0 = vrot.slane %v114_v60, 2  ;;  %v124_v2 = vrot.slane %v123_v61, 2  ;;  %v133_v3 = vadd.f32 %v132_v62, %v131_v58 }
  0xb1   :  { %v109_v4 = vmax.f32 %v107_v59, %v108_v63  ;;  %v116_v5 = vadd.f32 %v115_v0, %v114_v60  ;;  %v125_v6 = vmax.f32 %v123_v61, %v124_v2  ;;  %v134_v7 = vrot.slane %v133_v3, 2 }
  0xb3   :  { %v110_v8 = vrot.slane %v109_v4, 1  ;;  %v117_v9 = vrot.slane %v116_v5, 1  ;;  %v126_v10 = vrot.slane %v125_v6, 1  ;;  %v135_v11 = vadd.f32 %v134_v7, %v133_v3 }
  0xb5   :  { %v111_v12 = vmax.f32 %v109_v4, %v110_v8  ;;  %v118_v13 = vadd.f32 %v117_v9, %v116_v5  ;;  %v127_v14 = vmax.f32 %v125_v6, %v126_v10  ;;  %v136_v15 = vrot.slane %v135_v11, 1 }
  0xb7   :  { %v119_v16 = vmul.f32 0.5, %v118_v13  ;;  %v137_v17 = vadd.f32 %v136_v15, %v135_v11  ;;  %v139_v18 = vsel %vm71_vm4, %v111_v12, %v127_v14 }
  0xb8   :  { %141 = vst.msk [vmem:[%s899_s8] sm:$0x3] %vm104_vm12, %v139_v18 }
  0xb9   :  { %v138_v19 = vmul.f32 0.5, %v137_v17 }
  0xbb   :  { %v140_v20 = vsel %vm71_vm4, %v119_v16, %v138_v19 }
  0xbc   :  { %142 = vst.msk [vmem:[%s900_s9] sm:$0x3] %vm104_vm12, %v140_v20 }
  0xf4   :  { %v261_v21 = vpop.f32.mrb[0].mxu0 }
  0xf5   :  { %v587_v22 = vpop.f32.mrb[1].mxu0  ;;  %v277_v23 = vsel %vm265_vm15, %v261_v21, 0.0  ;;  %266 = vst.msk [vmem:[#allocation6] sm:$0xf] %vm265_vm15, %v261_v21  ;;  %v340_v34 = vpack.c.bf16 %v261_v21, %v261_v21 }
  0xf6   :  { %278 = vadd.xlane.f32.xlu0 %v277_v23 }
 0x180   :  { %v333_v24 = vpop.f32.mrb[0].mxu1 }
 0x181   :  { %v594_v26 = vpop.f32.mrb[1].mxu1 }
 0x182   :  { %v336_v28 = vpop.f32.mrb[2].mxu1 }
 0x183   :  { %v279_v25 = vpop.xlane.xlu0 %278  ;;  %v595_v29 = vpop.f32.mrb[3].mxu1 }
 0x184   :  { %v280_v27 = vadd.f32 1.0, %v279_v25 }
 0x186   :  { %629 = vrsqrt.f32 %v280_v27 }
 0x190   :  { %v630_v30 = vpop.eup %629 }
 0x191   :  { %v339_v31 = vmul.f32 %v630_v30, %v333_v24 }
 0x193   :  { %v341_v32 = vpack.c.bf16 %v339_v31, %v339_v31 }
 0x195   :  { %v347_v33 = vsel %vm73_vm5, %v341_v32, 0 }
 0x196   :  { %597 = vmatpush3.bf16.msra.mxu0 %v347_v33 }
 0x197   :  { %602 = vmatprep.subr.bf16.mxu0 %v670_v1 }
 0x199   :  { %599 = vmatmul.mubr.msk.bf16.vlgmr.msra.gmra.mrb[4].mxu0 %vm342_vm0, %v340_v34 }
 0x19a   :  { %606 = vmatprep.mubr.msk.bf16.mxu0 %vm671_vm1, %v670_v1  ;;  %603 = vmatpush3.bf16.msra.mxu0 %v625_v35  ;;  %vm504_vm1 = vcmask 257024  }
 0x19b   :  { %604 = vmatprep.subr.bf16.mxu0 %v670_v1 }
 0x19e   :  { %605 = vmatpush3.bf16.msra.mxu0 %v626_v36 }
 0x26c   :  { %v383_v37 = vpop.f32.mrb[4].mxu0 }
 0x26d   :  { %v384_v38 = vadd.f32 %v383_v37, %v339_v31  ;;  %v600_v39 = vpop.f32.mrb[5].mxu0 }
 0x26e   :  { %v386_v41 = vpop.f32.mrb[6].mxu0 }
 0x26f   :  { %v389_v42 = vmul.f32 %v630_v30, %v384_v38  ;;  %v601_v43 = vpop.f32.mrb[7].mxu0 }
 0x271   :  { %v396_v44 = vadd.f32 %v566_v40, %v389_v42 }
 0x273   :  { %v397_v45 = vmax.f32 %v396_v44, 0.0 }
 0x275   :  { %v398_v46 = vpack.c.bf16 %v397_v45, %v397_v45  ;;  %505 = vst.msk [vmem:[%s902_s11] sm:$0xf] %vm504_vm1, %v397_v45 }
 0x277   :  { %607 = vmatmul.mubr.msk.bf16.vlgmr.msra.gmra.mrb[8].mxu0 %vm295_vm14, %v398_v46 }
 0x34a   :  { %v448_v1 = vpop.f32.mrb[8].mxu0 }
 0x34b   :  { %v454_v47 = vpack.c.bf16 %v448_v1, %v448_v1  ;;  %456 = vrot.lane.b32.xlu1 %v448_v1, %s673_s6  ;;  %v608_v48 = vpop.f32.mrb[9].mxu0 }
 0x34c   :  { %v451_v49 = vpop.f32.mrb[10].mxu0 }
 0x34d   :  { %v609_v50 = vpop.f32.mrb[11].mxu0  ;;  %v460_v51 = vsel %vm73_vm5, %v454_v47, 0 }
 0x34e   :  { %611 = vmatpush3.bf16.msra.mxu1 %v460_v51 }
 0x351   :  { %613 = vmatmul.mubr.msk.bf16.vlgmr.msra.gmra.mrb[4].mxu1 %vm342_vm0, %v340_v34 }
 0x352   :  { %654 = shalt.err (!%p651_p9)
}
 0x353   :  { %s655_s24 = scalar_lea.hbm %s901_s10, 64 }
 0x354   :  { %p656_p10 = scmp.ne.s32.totalorder %s901_s10, %s655_s24  ;;  %p659_p11 = scmp.lt.u32.totalorder %s655_s24, %s901_s10 }
 0x356   :  { %p661_p12 = pnand %p659_p11, %p656_p10 }
 0x358   :  { %664 = shalt.err (!%p661_p12)
}
 0x359   :  { %521 = dma.vmem_to_hbm [thread:$0]  %s519_s21, 64, %s901_s10, [#allocation4]   ;;  %v502_v54 = vstv %s898_s7  ;;  %vm506_vm2 = vcmask 3072  }
 0x3bd   :  { %v457_v52 = vpop.permute.xlu1 %456 }
 0x424   :  { %v496_v53 = vpop.f32.mrb[4].mxu1 }
 0x425   :  { %v497_v55 = vadd.f32 %v496_v53, %v457_v52  ;;  %v614_v56 = vpop.f32.mrb[5].mxu1 }
 0x426   :  { %v499_v57 = vpop.f32.mrb[6].mxu1 }
 0x427   :  { %v503_v58 = vadd.f32 %v502_v54, %v497_v55  ;;  %v615_v59 = vpop.f32.mrb[7].mxu1 }
 0x429   :  { %507 = vst.msk [vmem:[%s903_s12] sm:$0xf] %vm506_vm2, %v503_v58 }
 0x42a   :  { %667 = dma.done.wait [#allocation4], 64  }
 0x42b   :  { %668 = vsyncadd [#allocation4], 4294967232 }
 0x42c   :  { %537 = vsyncpa [#allocation4], 1 }
 0x42d   :  { %538 = vsyncpa [#allocation5], 1 }

// kernel: hiernet_forward.5
= control target key start
LH: loop header
LB: loop body
LE: loop exit
PB: predicated region body
PF: predicated region fallthrough
CT: control target
= control target key end

     0   :  { %s1134_s0 = inlined_call_operand.vmem [shape: s32[8], index: 0, kind: input, shape index: {}]   ;;  %s1135_s1 = inlined_call_operand.vmem [shape: f32[16,16], index: 1, kind: input, shape index: {}]   ;;  %s1136_s2 = inlined_call_operand.vmem [shape: f32[16,32], index: 2, kind: input, shape index: {}]   ;;  %s1137_s3 = inlined_call_operand.vmem [shape: f32[16,1], index: 3, kind: input, shape index: {}]   ;;  %s1138_s4 = inlined_call_operand.vmem [shape: bf16[32,32], index: 4, kind: input, shape index: {}]   ;;  %s1139_s5 = inlined_call_operand.vmem [shape: f32[1,32], index: 5, kind: input, shape index: {}]   ;;  %s1140_s6 = inlined_call_operand.vmem [shape: bf16[32,2], index: 6, kind: input, shape index: {}]   ;;  %s1141_s7 = inlined_call_operand.<no memory space> [shape: f32[1], index: 7, kind: input, shape index: {}]   ;;  %s1142_s8 = inlined_call_operand.vmem [shape: f32[2,32], index: 8, kind: output, shape index: {0}]   ;;  %s1143_s9 = inlined_call_operand.vmem [shape: f32[2,32], index: 9, kind: output, shape index: {1}]   ;;  %s1144_s10 = inlined_call_operand.vmem [shape: f32[8,8], index: 10, kind: output, shape index: {2}]   ;;  %s1145_s11 = inlined_call_operand.vmem [shape: f32[8,32], index: 11, kind: output, shape index: {3}]   ;;  %s1146_s12 = inlined_call_operand.vmem [shape: f32[8,1], index: 12, kind: output, shape index: {4}]  }
   0x1   :  { %1150 = sst [smem:[#allocation6_spill]] %s1141_s7 }
   0x2   :  { %1151 = sst [smem:[#allocation7_spill]] %s1146_s12 }
   0x3   :  { %19 = vsyncpa [#allocation4], 0  ;;  %s26_s23 = sshll.u32 %s1134_s0, 4  ;;  %s27_s23 = int_to_ptr.vmem [resolvable:$true] %s26_s23 }
   0x4   :  { %s796_s24 = scalar_lea.vmem %s27_s23, 16  ;;  %p801_p1 = scmp.lt.s32.totalorder %s27_s23, %s27_s23 }
   0x5   :  { %p797_p0 = scmp.ne.s32.totalorder %s27_s23, %s796_s24  ;;  %p802_p2 = scmp.lt.s32.totalorder %s796_s24, %s796_s24 }
   0x7   :  { %p803_p3 = por %p802_p2, %p801_p1 }
   0x9   :  { %p804_p4 = pnand %p803_p3, %p797_p0 }
   0xb   :  { %807 = shalt.err (!%p804_p4)
}
   0xc   :  { %s810_s25 = smov [#allocation3]  }
   0xd   :  { %29 = dma.vmem_to_smem %s27_s23, 16, %s810_s25, [#allocation4]  }
   0xe   :  { %808 = dma.done.wait [#allocation4], 16  }
   0xf   :  { %809 = vsyncadd [#allocation4], 4294967280 }
  0x10   :  { %47 = sfence }
  0x11   :  { %s884_s26 = sld [smem:[#allocation3]]  ;;  %s886_s27 = sld [smem:[#allocation3 + $0x1]]  ;;  %v251_v0 = vlaneseq  ;;  %v811_v1 = vmov 0.0|0.0   ;;  %v812_v2 = vmov 0.0   ;;  %vm1149_vm0 = vcmask 7168  }
  0x12   :  { %778 = vmatprep.subr.bf16.mxu0 %v811_v1  ;;  %s888_s0 = sld [smem:[#allocation3 + $0x2]]  ;;  %s890_s28 = sld [smem:[#allocation3 + $0x3]]  ;;  %750 = vmatprep.subr.bf16.mxu1 %v812_v2  ;;  %vm1147_vm1 = vmmov 0   ;;  %vm313_vm4 = vcmask 15360   ;;  %vm316_vm5 = vcmask 23552   ;;  %vm319_vm8 = vcmask 31744  }
  0x13   :  { %s893_s29 = sld [smem:[#allocation3 + $0x4]]  ;;  %s895_s30 = sld [smem:[#allocation3 + $0x5]]  ;;  %v252_v3 = vshrl.u32 %v251_v0, 7  ;;  %747 = vmatprep.mubr.msk.f32.mxu0 %vm1147_vm1, %v812_v2  ;;  %754 = vmatprep.mubr.msk.bf16.mxu1 %vm1147_vm1, %v812_v2  ;;  %vm322_vm9 = vcmask 39936   ;;  %vm325_vm14 = vcmask 48128   ;;  %vm328_vm15 = vcmask 56320  }
  0x14   :  { %s897_s13 = sld [smem:[#allocation3 + $0x6]]  ;;  %s903_s14 = sld [smem:[#allocation3 + $0x7]]  ;;  %v814_v21 = vmov 0  }
  0x15   :  { %v253_v4 = vadd.s32 8, %v252_v3  ;;  %787 = vset.pattern.permute.xlu0 %v814_v21 }
  0x17   :  { %v254_v5 = vstv %s884_s26  ;;  %v261_v6 = vstv %s886_s27  ;;  %s110_s17 = scalar_lea.vmem %s1137_s3, %s886_s27  ;;  %s108_s15 = scalar_lea.vmem %s1137_s3, %s884_s26 }
  0x18   :  { %vm255_vm2 = vcmp.eq.s32.totalorder %v252_v3, %v254_v5  ;;  %vm256_vm3 = vcmp.eq.s32.totalorder %v253_v4, %v254_v5  ;;  %vm262_vm6 = vcmp.eq.s32.totalorder %v252_v3, %v261_v6  ;;  %vm263_vm7 = vcmp.eq.s32.totalorder %v253_v4, %v261_v6  ;;  %s112_s20 = scalar_lea.vmem %s1137_s3, %s888_s0  ;;  %s114_s23 = scalar_lea.vmem %s1137_s3, %s890_s28  ;;  %v111_v27 = vld [vmem:[%s110_s17] sm:$0x1] }
  0x19   :  { %v704_v7 = vsel %vm255_vm2, 1.0, %v812_v2  ;;  %v705_v8 = vsel %vm256_vm3, 1.0, %v812_v2  ;;  %v268_v9 = vstv %s888_s0  ;;  %v275_v10 = vstv %s890_s28  ;;  %s116_s19 = scalar_lea.vmem %s1137_s3, %s893_s29  ;;  %s118_s12 = scalar_lea.vmem %s1137_s3, %s895_s30  ;;  %v113_v29 = vld [vmem:[%s112_s20] sm:$0x1] }
  0x1a   :  { %v282_v11 = vstv %s893_s29  ;;  %v289_v12 = vstv %s895_s30  ;;  %vm269_vm10 = vcmp.eq.s32.totalorder %v252_v3, %v268_v9  ;;  %vm270_vm11 = vcmp.eq.s32.totalorder %v253_v4, %v268_v9  ;;  %s120_s7 = scalar_lea.vmem %s1137_s3, %s897_s13  ;;  %v115_v30 = vld [vmem:[%s114_s23] sm:$0x1]  ;;  %s122_s18 = scalar_lea.vmem %s1137_s3, %s903_s14 }
  0x1b   :  { %vm276_vm12 = vcmp.eq.s32.totalorder %v252_v3, %v275_v10  ;;  %vm277_vm13 = vcmp.eq.s32.totalorder %v253_v4, %v275_v10  ;;  %v706_v13 = vsel %vm262_vm6, 1.0, %v812_v2  ;;  %v707_v14 = vsel %vm263_vm7, 1.0, %v812_v2  ;;  %s203_s24 = scalar_lea.vmem %s1135_s1, %s886_s27  ;;  %v109_v35 = vld [vmem:[%s108_s15] sm:$0x1]  ;;  %s206_s23 = scalar_lea.vmem %s1135_s1, %s888_s0 }
  0x1c   :  { %v708_v15 = vsel %vm269_vm10, 1.0, %v812_v2  ;;  %v709_v16 = vsel %vm270_vm11, 1.0, %v812_v2  ;;  %v710_v17 = vsel %vm276_vm12, 1.0, %v812_v2  ;;  %v711_v18 = vsel %vm277_vm13, 1.0, %v812_v2  ;;  %v117_v36 = vld [vmem:[%s116_s19] sm:$0x1]  ;;  %s209_s16 = scalar_lea.vmem %s1135_s1, %s890_s28  ;;  %s212_s21 = scalar_lea.vmem %s1135_s1, %s893_s29 }
  0x1d   :  { %vm283_vm2 = vcmp.eq.s32.totalorder %v252_v3, %v282_v11  ;;  %vm284_vm3 = vcmp.eq.s32.totalorder %v253_v4, %v282_v11  ;;  %vm94_vm6 = vcmask 1040384   ;;  %vm933_vm7 = vcmp.eq.s32.totalorder %v252_v3, %v289_v12  ;;  %v119_v40 = vld [vmem:[%s118_s12] sm:$0x1]  ;;  %s200_s22 = scalar_lea.vmem %s1135_s1, %s884_s26  ;;  %s218_s17 = scalar_lea.vmem %s1135_s1, %s897_s13 }
  0x1e   :  { %v712_v19 = vsel %vm283_vm2, 1.0, %v812_v2  ;;  %v713_v20 = vsel %vm284_vm3, 1.0, %v812_v2  ;;  %vm937_vm10 = vcmp.eq.s32.totalorder %v253_v4, %v289_v12  ;;  %vm96_vm11 = vcmask 1041408   ;;  %v121_v41 = vld [vmem:[%s120_s7] sm:$0x1]  ;;  %s221_s15 = scalar_lea.vmem %s1135_s1, %s903_s14 }
  0x1f   :  { %v296_v23 = vstv %s897_s13  ;;  %v303_v24 = vstv %s903_s14  ;;  %v311_v25 = vsel %vm1149_vm0, %v704_v7, %v706_v13  ;;  %v312_v26 = vsel %vm1149_vm0, %v705_v8, %v707_v14  ;;  %v123_v46 = vld [vmem:[%s122_s18] sm:$0x1] }
  0x20   :  { %vm98_vm12 = vcmask 1042432   ;;  %vm297_vm13 = vcmp.eq.s32.totalorder %v252_v3, %v296_v23  ;;  %vm298_vm2 = vcmp.eq.s32.totalorder %v253_v4, %v296_v23  ;;  %vm304_vm3 = vcmp.eq.s32.totalorder %v252_v3, %v303_v24  ;;  %v204_v48 = vld [vmem:[%s203_s24] sm:$0x1]  ;;  %s215_s24 = scalar_lea.vmem %s1135_s1, %s895_s30  ;;  %s68_s1 = scalar_lea.vmem %s1136_s2, %s897_s13 }
  0x21   :  { %vm961_vm1 = vcmp.eq.s32.totalorder %v253_v4, %v303_v24  ;;  %vm100_vm0 = vcmask 1043456   ;;  %v714_v31 = vsel %vm933_vm7, 1.0, %v812_v2  ;;  %v715_v32 = vsel %vm937_vm10, 1.0, %v812_v2  ;;  %v207_v53 = vld [vmem:[%s206_s23] sm:$0x1] }
  0x22   :  { %v716_v33 = vsel %vm297_vm13, 1.0, %v812_v2  ;;  %v717_v34 = vsel %vm298_vm2, 1.0, %v812_v2  ;;  %v718_v37 = vsel %vm304_vm3, 1.0, %v812_v2  ;;  %v314_v38 = vsel %vm313_vm4, %v311_v25, %v708_v15  ;;  %v210_v54 = vld [vmem:[%s209_s16] sm:$0x1]  ;;  %s65_s16 = scalar_lea.vmem %s1136_s2, %s895_s30  ;;  %s50_s30 = scalar_lea.vmem %s1136_s2, %s884_s26 }
  0x23   :  { %v315_v39 = vsel %vm313_vm4, %v312_v26, %v709_v16  ;;  %v125_v42 = vrot.slane %v111_v27, 7  ;;  %v719_v43 = vsel %vm961_vm1, 1.0, %v812_v2  ;;  %v317_v44 = vsel %vm316_vm5, %v314_v38, %v710_v17  ;;  %v213_v62 = vld [vmem:[%s212_s21] sm:$0x1]  ;;  %s53_s21 = scalar_lea.vmem %s1136_s2, %s886_s27 }
  0x24   :  { %v318_v45 = vsel %vm316_vm5, %v315_v39, %v711_v18  ;;  %v128_v47 = vrot.slane %v113_v29, 6  ;;  %v320_v49 = vsel %vm319_vm8, %v317_v44, %v712_v19  ;;  %v131_v51 = vrot.slane %v115_v30, 5  ;;  %v201_v4 = vld [vmem:[%s200_s22] sm:$0x1]  ;;  %s56_s22 = scalar_lea.vmem %s1136_s2, %s888_s0  ;;  %s1159_s0 = sld [smem:[#allocation6_spill]] }
  0x25   :  { %v321_v50 = vsel %vm319_vm8, %v318_v45, %v713_v20  ;;  %v134_v52 = vrot.slane %v117_v36, 4  ;;  %v323_v55 = vsel %vm322_vm9, %v320_v49, %v714_v31  ;;  %v137_v57 = vrot.slane %v119_v40, 3  ;;  %v216_v5 = vld [vmem:[%s215_s24] sm:$0x1]  ;;  %s59_s24 = scalar_lea.vmem %s1136_s2, %s890_s28 }
  0x26   :  { %v324_v56 = vsel %vm322_vm9, %v321_v50, %v715_v32  ;;  %v140_v58 = vrot.slane %v121_v41, 2  ;;  %v326_v59 = vsel %vm325_vm14, %v323_v55, %v716_v33  ;;  %v145_v61 = vsel %vm94_vm6, %v109_v35, %v125_v42  ;;  %v219_v10 = vld [vmem:[%s218_s17] sm:$0x1]  ;;  %s62_s17 = scalar_lea.vmem %s1136_s2, %s893_s29 }
  0x27   :  { %v327_v60 = vsel %vm325_vm14, %v324_v56, %v717_v34  ;;  %v224_v63 = vrot.slane %v204_v48, 7  ;;  %v329_v0 = vsel %vm328_vm15, %v326_v59, %v718_v37  ;;  %v146_v3 = vsel %vm96_vm11, %v145_v61, %v128_v47  ;;  %v222_v13 = vld [vmem:[%s221_s15] sm:$0x1] }
  0x28   :  { %v330_v1 = vsel %vm328_vm15, %v327_v60, %v719_v43  ;;  %v227_v6 = vrot.slane %v207_v53, 6  ;;  %v143_v8 = vrot.slane %v123_v46, 1  ;;  %v147_v9 = vsel %vm98_vm12, %v146_v3, %v131_v51  ;;  %v54_v29 = vld [vmem:[%s53_s21] sm:$0x1]  ;;  %s71_s21 = scalar_lea.vmem %s1136_s2, %s903_s14  ;;  %v789_v53 = vld [vmem:[%s1138_s4 + $0x8] sm:$0xff]  }
  0x29   :  { %v779_v7 = vpack.c.bf16 %v330_v1, %v329_v0  ;;  %v230_v11 = vrot.slane %v210_v54, 5  ;;  %vm102_vm1 = vcmask 1044480   ;;  %vm104_vm4 = vcmask 1045504   ;;  %v57_v30 = vld [vmem:[%s56_s22] sm:$0x1] }
  0x2a   :  { %v148_v12 = vsel %vm100_vm0, %v147_v9, %v134_v52  ;;  %v233_v14 = vrot.slane %v213_v62, 4  ;;  %v236_v16 = vrot.slane %v216_v5, 3  ;;  %v244_v17 = vsel %vm94_vm6, %v201_v4, %v224_v63  ;;  %v60_v31 = vld [vmem:[%s59_s24] sm:$0x1] }
  0x2b   :  { %780 = vmatpush3.bf16.msra.mxu0 %v779_v7  ;;  %v149_v15 = vsel %vm102_vm1, %v148_v12, %v137_v57  ;;  %vm106_vm5 = vcmask 1046528   ;;  %v239_v19 = vrot.slane %v219_v10, 2  ;;  %v245_v20 = vsel %vm96_vm11, %v244_v17, %v227_v6  ;;  %v63_v32 = vld [vmem:[%s62_s17] sm:$0x1] }
  0x2c   :  { %v150_v18 = vsel %vm104_vm4, %v149_v15, %v140_v58  ;;  %758 = vmatprep.subr.bf16.mxu0 %v812_v2  ;;  %v242_v23 = vrot.slane %v222_v13, 1  ;;  %v246_v24 = vsel %vm98_vm12, %v245_v20, %v230_v11  ;;  %vm331_vm8 = vcmask 130048   ;;  %v66_v34 = vld [vmem:[%s65_s16] sm:$0x1] }
  0x2d   :  { %v151_v22 = vsel %vm106_vm5, %v150_v18, %v143_v8  ;;  %v247_v25 = vsel %vm100_vm0, %v246_v24, %v233_v14  ;;  %vm1158_vm9 = vmmov 0   ;;  %v74_v33 = vrot.slane %v54_v29, 7  ;;  %v69_v37 = vld [vmem:[%s68_s1] sm:$0x1]  ;;  %s1161_s1 = sld [smem:[#allocation7_spill]] }
  0x2e   :  { %792 = vtanh.f32 %v151_v22  ;;  %v248_v26 = vsel %vm102_vm1, %v247_v25, %v236_v16  ;;  %v77_v35 = vrot.slane %v57_v30, 6  ;;  %v80_v38 = vrot.slane %v60_v31, 5  ;;  %v72_v39 = vld [vmem:[%s71_s21] sm:$0x1] }
  0x2f   :  { %v249_v27 = vsel %vm104_vm4, %v248_v26, %v239_v19  ;;  %v83_v40 = vrot.slane %v63_v32, 4  ;;  %v51_v41 = vld [vmem:[%s50_s30] sm:$0x1]  ;;  %v86_v42 = vrot.slane %v66_v34, 3  ;;  %v89_v44 = vrot.slane %v69_v37, 2 }
  0x30   :  { %v250_v28 = vsel %vm106_vm5, %v249_v27, %v242_v23  ;;  %v95_v43 = vsel %vm94_vm6, %v51_v41, %v74_v33  ;;  %v92_v46 = vrot.slane %v72_v39, 1  ;;  %v788_v52 = vld [vmem:[%s1138_s4] sm:$0xff]   ;;  %vm159_vm14 = vcmask 257024  }
  0x31   :  { %748 = vmatmul.mubr.msk.f32.vlgmr.msra.gmra.mrb[0].mxu0 %vm331_vm8, %v250_v28  ;;  %v97_v45 = vsel %vm96_vm11, %v95_v43, %v77_v35  ;;  %751 = vmatpush3.bf16.msra.mxu1 %v788_v52  ;;  %vm175_vm15 = vcmask 261124   ;;  %vm435_vm7 = vcmask 261120   ;;  %vm196_vm10 = vcmask 254976   ;;  %v790_v41 = vld [vmem:[%s1140_s6] sm:$0xff]  }
  0x32   :  { %760 = vmatprep.mubr.msk.bf16.mxu0 %vm1158_vm9, %v812_v2  ;;  %v99_v47 = vsel %vm98_vm12, %v97_v45, %v80_v38  ;;  %752 = vmatprep.subr.bf16.mxu1 %v812_v2  ;;  %vm405_vm11 = vcmask 64512  }
  0x33   :  { %v101_v48 = vsel %vm100_vm0, %v99_v47, %v83_v40 }
  0x34   :  { %v103_v49 = vsel %vm102_vm1, %v101_v48, %v86_v42  ;;  %v791_v42 = vld [vmem:[%s1140_s6 + $0x8] sm:$0xff]   ;;  %s815_s6 = smov 127  }
  0x35   :  { %v105_v50 = vsel %vm104_vm4, %v103_v49, %v89_v44  ;;  %753 = vmatpush3.bf16.msra.mxu1 %v789_v53 }
  0x36   :  { %v107_v51 = vsel %vm106_vm5, %v105_v50, %v92_v46  ;;  %772 = vmatprep.subr.bf16.mxu1 %v812_v2  ;;  %v725_v46 = vld [vmem:[%s1139_s5] ss:$0 sm:$0xff] }
  0x38   :  { %v793_v36 = vpop.eup %792 }
  0x39   :  { %155 = vperm.xlu0 %787, %v793_v36  }
  0xb8   :  { %v156_v54 = vpop.permute.xlu0 %155 }
  0xb9   :  { %v158_v55 = vmul.f32 %v156_v54, %v107_v51 }
  0xbb   :  { %v160_v56 = vsel %vm159_vm14, %v158_v55, -inf  ;;  %v167_v57 = vsel %vm159_vm14, %v158_v55, 0.0  ;;  %v176_v58 = vsel %vm175_vm15, %v158_v55, -inf  ;;  %v184_v59 = vrot.slane %v158_v55, 4 }
  0xbc   :  { %v161_v60 = vrot.slane %v160_v56, 4  ;;  %v168_v61 = vrot.slane %v167_v57, 4  ;;  %v177_v62 = vrot.slane %v176_v58, 4  ;;  %v422_v63 = vpack.c.bf16 %v158_v55, %v158_v55 }
  0xbd   :  { %v186_v0 = vsel %vm159_vm14, %v184_v59, 0.0 }
  0xbe   :  { %v162_v1 = vmax.f32 %v160_v56, %v161_v60  ;;  %v169_v3 = vadd.f32 %v168_v61, %v167_v57  ;;  %v178_v4 = vmax.f32 %v176_v58, %v177_v62  ;;  %v187_v5 = vrot.slane %v186_v0, 4  ;;  %755 = vmatmul.mubr.msk.bf16.vlgmr.msra.gmra.mrb[0].mxu1 %vm435_vm7, %v422_v63 }
  0xbf   :  { %774 = vmatprep.mubr.msk.bf16.mxu1 %vm1158_vm9, %v812_v2  ;;  %v641_v60 = vstv %s1159_s0 }
  0xc0   :  { %v163_v6 = vrot.slane %v162_v1, 2  ;;  %v170_v7 = vrot.slane %v169_v3, 2  ;;  %v179_v8 = vrot.slane %v178_v4, 2  ;;  %v188_v9 = vadd.f32 %v187_v5, %v186_v0 }
  0xc2   :  { %v164_v10 = vmax.f32 %v162_v1, %v163_v6  ;;  %v171_v11 = vadd.f32 %v170_v7, %v169_v3  ;;  %v180_v12 = vmax.f32 %v178_v4, %v179_v8  ;;  %v189_v13 = vrot.slane %v188_v9, 2 }
  0xc4   :  { %v165_v14 = vrot.slane %v164_v10, 1  ;;  %v172_v15 = vrot.slane %v171_v11, 1  ;;  %v181_v16 = vrot.slane %v180_v12, 1  ;;  %v190_v17 = vadd.f32 %v189_v13, %v188_v9 }
  0xc6   :  { %v166_v18 = vmax.f32 %v164_v10, %v165_v14  ;;  %v173_v19 = vadd.f32 %v172_v15, %v171_v11  ;;  %v182_v20 = vmax.f32 %v180_v12, %v181_v16  ;;  %v191_v21 = vrot.slane %v190_v17, 1 }
  0xc8   :  { %v174_v22 = vmul.f32 0.25, %v173_v19  ;;  %v192_v23 = vadd.f32 %v191_v21, %v190_v17  ;;  %v194_v24 = vsel %vm94_vm6, %v166_v18, %v182_v20 }
  0xc9   :  { %197 = vst.msk [vmem:[%s1142_s8] sm:$0x3] %vm196_vm10, %v194_v24 }
  0xca   :  { %v193_v25 = vmul.f32 0.25, %v192_v23 }
  0xcc   :  { %v195_v26 = vsel %vm94_vm6, %v174_v22, %v193_v25  ;;  %vm1160_vm6 = vcmask 7168  }
  0xcd   :  { %198 = vst.msk [vmem:[%s1143_s9] sm:$0x3] %vm196_vm10, %v195_v26 }
 0x104   :  { %v401_v27 = vpop.f32.mrb[0].mxu0 }
 0x105   :  { %406 = vst.msk [vmem:[%s1144_s10] sm:$0xff] %vm405_vm11, %v401_v27  ;;  %v749_v28 = vpop.f32.mrb[1].mxu0  ;;  %v417_v29 = vsel %vm405_vm11, %v401_v27, 0.0  ;;  %v480_v40 = vpack.c.bf16 %v401_v27, %v401_v27 }
 0x106   :  { %418 = vadd.xlane.f32.xlu0 %v417_v29 }
 0x191   :  { %v473_v30 = vpop.f32.mrb[0].mxu1 }
 0x192   :  { %v756_v31 = vpop.f32.mrb[1].mxu1 }
 0x193   :  { %v476_v32 = vpop.f32.mrb[2].mxu1  ;;  %v419_v33 = vpop.xlane.xlu0 %418 }
 0x194   :  { %v757_v34 = vpop.f32.mrb[3].mxu1  ;;  %v420_v35 = vadd.f32 1.0, %v419_v33 }
 0x196   :  { %794 = vrsqrt.f32 %v420_v35 }
 0x1a0   :  { %v795_v36 = vpop.eup %794 }
 0x1a1   :  { %v479_v37 = vmul.f32 %v795_v36, %v473_v30 }
 0x1a3   :  { %v481_v38 = vpack.c.bf16 %v479_v37, %v479_v37 }
 0x1a5   :  { %v486_v39 = vsel %vm100_vm0, %v481_v38, 0 }
 0x1a6   :  { %759 = vmatpush3.bf16.msra.mxu0 %v486_v39 }
 0x1a7   :  { %764 = vmatprep.subr.bf16.mxu0 %v812_v2 }
 0x1a9   :  { %761 = vmatmul.mubr.msk.bf16.vlgmr.msra.gmra.mrb[4].mxu0 %vm405_vm11, %v480_v40 }
 0x1aa   :  { %768 = vmatprep.mubr.msk.bf16.mxu0 %vm1158_vm9, %v812_v2  ;;  %765 = vmatpush3.bf16.msra.mxu0 %v790_v41 }
 0x1ab   :  { %766 = vmatprep.subr.bf16.mxu0 %v812_v2 }
 0x1ae   :  { %767 = vmatpush3.bf16.msra.mxu0 %v791_v42 }
 0x27c   :  { %v522_v43 = vpop.f32.mrb[4].mxu0 }
 0x27d   :  { %v523_v44 = vadd.f32 %v522_v43, %v479_v37  ;;  %v762_v45 = vpop.f32.mrb[5].mxu0 }
 0x27e   :  { %v525_v47 = vpop.f32.mrb[6].mxu0 }
 0x27f   :  { %v528_v48 = vmul.f32 %v795_v36, %v523_v44  ;;  %v763_v49 = vpop.f32.mrb[7].mxu0 }
 0x281   :  { %v535_v50 = vadd.f32 %v725_v46, %v528_v48 }
 0x283   :  { %v536_v51 = vmax.f32 %v535_v50, 0.0 }
 0x285   :  { %v537_v52 = vpack.c.bf16 %v536_v51, %v536_v51  ;;  %643 = vst.msk [vmem:[%s1145_s11] sm:$0xff] %vm435_vm7, %v536_v51 }
 0x287   :  { %769 = vmatmul.mubr.msk.bf16.vlgmr.msra.gmra.mrb[8].mxu0 %vm435_vm7, %v537_v52 }
 0x35a   :  { %v587_v2 = vpop.f32.mrb[8].mxu0 }
 0x35b   :  { %v593_v53 = vpack.c.bf16 %v587_v2, %v587_v2  ;;  %595 = vrot.lane.b32.xlu1 %v587_v2, %s815_s6  ;;  %v770_v54 = vpop.f32.mrb[9].mxu0 }
 0x35c   :  { %v590_v55 = vpop.f32.mrb[10].mxu0 }
 0x35d   :  { %v771_v56 = vpop.f32.mrb[11].mxu0  ;;  %v599_v57 = vsel %vm100_vm0, %v593_v53, 0 }
 0x35e   :  { %773 = vmatpush3.bf16.msra.mxu1 %v599_v57 }
 0x361   :  { %775 = vmatmul.mubr.msk.bf16.vlgmr.msra.gmra.mrb[4].mxu1 %vm405_vm11, %v480_v40 }
 0x3cd   :  { %v596_v58 = vpop.permute.xlu1 %595 }
 0x434   :  { %v635_v59 = vpop.f32.mrb[4].mxu1 }
 0x435   :  { %v636_v61 = vadd.f32 %v635_v59, %v596_v58  ;;  %v776_v62 = vpop.f32.mrb[5].mxu1 }
 0x436   :  { %v638_v63 = vpop.f32.mrb[6].mxu1 }
 0x437   :  { %v642_v0 = vadd.f32 %v641_v60, %v636_v61  ;;  %v777_v1 = vpop.f32.mrb[7].mxu1 }
 0x439   :  { %644 = vst.msk [vmem:[%s1161_s1] sm:$0xff] %vm1160_vm6, %v642_v0 }
 0x43a   :  { %665 = vsyncpa [#allocation4], 1 }

// kernel: hiernet_forward.7
= control target key start
LH: loop header
LB: loop body
LE: loop exit
PB: predicated region body
PF: predicated region fallthrough
CT: control target
= control target key end

     0   :  { %s773_s0 = inlined_call_operand.vmem [shape: s32[2], index: 0, kind: input, shape index: {}]   ;;  %s774_s1 = inlined_call_operand.vmem [shape: f32[4,32], index: 1, kind: input, shape index: {}]   ;;  %s775_s2 = inlined_call_operand.vmem [shape: f32[4,1], index: 2, kind: input, shape index: {}]   ;;  %s776_s3 = inlined_call_operand.vmem [shape: f32[2,32], index: 3, kind: input, shape index: {}]   ;;  %s777_s4 = inlined_call_operand.vmem [shape: f32[2,32], index: 4, kind: input, shape index: {}]   ;;  %s778_s5 = inlined_call_operand.vmem [shape: f32[2,32], index: 5, kind: input, shape index: {}]   ;;  %s779_s6 = inlined_call_operand.vmem [shape: f32[2,32], index: 6, kind: input, shape index: {}]   ;;  %s780_s7 = inlined_call_operand.vmem [shape: f32[2,8], index: 7, kind: input, shape index: {}]   ;;  %s781_s8 = inlined_call_operand.vmem [shape: bf16[32,64], index: 8, kind: input, shape index: {}]   ;;  %s782_s9 = inlined_call_operand.vmem [shape: bf16[32,64], index: 9, kind: input, shape index: {}]   ;;  %s783_s10 = inlined_call_operand.vmem [shape: bf16[8,64], index: 10, kind: input, shape index: {}]   ;;  %s784_s11 = inlined_call_operand.vmem [shape: f32[1,64], index: 11, kind: input, shape index: {}]   ;;  %s785_s12 = inlined_call_operand.vmem [shape: bf16[64,64], index: 12, kind: input, shape index: {}]   ;;  %s786_s13 = inlined_call_operand.vmem [shape: f32[1,64], index: 13, kind: input, shape index: {}]   ;;  %s787_s14 = inlined_call_operand.vmem [shape: bf16[64,1], index: 14, kind: input, shape index: {}]   ;;  %s788_s15 = inlined_call_operand.<no memory space> [shape: f32[1], index: 15, kind: input, shape index: {}]   ;;  %s789_s16 = inlined_call_operand.vmem [shape: f32[2,1], index: 16, kind: output, shape index: {}]  }
   0x1   :  { %790 = sst [smem:[#allocation6_spill]] %s773_s0 }
   0x2   :  { %22 = vsyncpa [#allocation4], 0  ;;  %s791_s23 = sld [smem:[#allocation6_spill]] }
   0x8   :  { %s29_s24 = sshll.u32 %s791_s23, 4  ;;  %s30_s24 = int_to_ptr.vmem [resolvable:$true] %s29_s24 }
   0x9   :  { %s562_s25 = scalar_lea.vmem %s30_s24, 16  ;;  %p567_p1 = scmp.lt.s32.totalorder %s30_s24, %s30_s24 }
   0xa   :  { %p563_p0 = scmp.ne.s32.totalorder %s30_s24, %s562_s25  ;;  %p568_p2 = scmp.lt.s32.totalorder %s562_s25, %s562_s25 }
   0xc   :  { %p569_p3 = por %p568_p2, %p567_p1 }
   0xe   :  { %p570_p4 = pnand %p569_p3, %p563_p0 }
  0x10   :  { %573 = shalt.err (!%p570_p4)
}
  0x11   :  { %s576_s26 = smov [#allocation3]  }
  0x12   :  { %32 = dma.vmem_to_smem %s30_s24, 16, %s576_s26, [#allocation4]  }
  0x13   :  { %574 = dma.done.wait [#allocation4], 16  }
  0x14   :  { %575 = vsyncadd [#allocation4], 4294967280 }
  0x15   :  { %66 = sfence }
  0x16   :  { %s68_s27 = sld [smem:[#allocation3]]  ;;  %s459_s28 = sld [smem:[#allocation3 + $0x1]]  ;;  %v577_v0 = vmov 0   ;;  %v548_v1 = vld [vmem:[%s782_s9] sm:$0xff]   ;;  %v578_v2 = vmov 0.0   ;;  %vm77_vm0 = vcmask 1040384  }
  0x17   :  { %547 = vset.pattern.permute.xlu0 %v577_v0  ;;  %497 = vmatprep.subr.bf16.mxu0 %v578_v2  ;;  %v549_v3 = vld [vmem:[%s781_s8] sm:$0xff]   ;;  %v550_v13 = vld [vmem:[%s782_s9 + $0x8] sm:$0xff]   ;;  %vm579_vm1 = vmmov 0   ;;  %vm231_vm2 = vcmask 1043456   ;;  %vm125_vm3 = vcmask 261120   ;;  %vm227_vm4 = vcmask 64512  }
  0x18   :  { %505 = vmatprep.subr.bf16.mxu1 %v578_v2  ;;  %498 = vmatpush3.bf16.msra.mxu0 %v548_v1  ;;  %v551_v14 = vld [vmem:[%s781_s8 + $0x8] sm:$0xff]   ;;  %v95_v15 = vld [vmem:[%s776_s3] sm:$0x3]  ;;  %v554_v33 = vld [vmem:[%s785_s12 + $0x10] sm:$0xff]   ;;  %vm325_vm5 = vcmask 523264   ;;  %v380_v1 = vstv %s788_s15  ;;  %vm448_vm6 = vcmask 1024  }
  0x19   :  { %506 = vmatpush3.bf16.msra.mxu1 %v549_v3  ;;  %499 = vmatprep.subr.bf16.mxu0 %v578_v2  ;;  %v96_v16 = vld [vmem:[%s778_s5] sm:$0x3]  ;;  %v553_v32 = vld [vmem:[%s785_s12 + $0x8] sm:$0xff]   ;;  %v555_v34 = vld [vmem:[%s785_s12 + $0x18] sm:$0xff]  }
  0x1a   :  { %507 = vmatprep.subr.bf16.mxu1 %v578_v2  ;;  %501 = vmatprep.mubr.msk.bf16.mxu0 %vm579_vm1, %v578_v2  ;;  %v99_v17 = vld [vmem:[%s777_s4] sm:$0x3]  ;;  %v97_v19 = vadd.f32 %v96_v16, %v95_v15  ;;  %v557_v36 = vld [vmem:[%s787_s14 + $0x8] sm:$0xff]   ;;  %v558_v55 = vld [vmem:[%s787_s14 + $0x10] sm:$0xff]  }
  0x1b   :  { %509 = vmatprep.mubr.msk.bf16.mxu1 %vm579_vm1, %v578_v2  ;;  %v100_v18 = vld [vmem:[%s779_s6] sm:$0x3]  ;;  %v559_v56 = vld [vmem:[%s787_s14 + $0x18] sm:$0xff]  }
  0x1c   :  { %s79_s20 = scalar_lea.vmem %s775_s2, %s68_s27  ;;  %s81_s23 = scalar_lea.vmem %s775_s2, %s459_s28  ;;  %500 = vmatpush3.bf16.msra.mxu0 %v550_v13  ;;  %v101_v20 = vadd.f32 %v100_v18, %v99_v17  ;;  %v225_v23 = vld [vmem:[%s783_s10] sm:$0xf] }
  0x1d   :  { %v80_v4 = vld [vmem:[%s79_s20] sm:$0x1]  ;;  %s72_s26 = scalar_lea.vmem %s774_s1, %s459_s28  ;;  %s69_s0 = scalar_lea.vmem %s774_s1, %s68_s27  ;;  %508 = vmatpush3.bf16.msra.mxu1 %v551_v14  ;;  %513 = vmatprep.subr.bf16.mxu0 %v578_v2  ;;  %v233_v28 = vsel %vm231_vm2, %v225_v23, 0 }
  0x1e   :  { %v82_v5 = vld [vmem:[%s81_s23] sm:$0x1]  ;;  %519 = vmatprep.subr.bf16.mxu1 %v578_v2 }
  0x1f   :  { %v84_v6 = vrot.slane %v82_v5, 7  ;;  %v73_v8 = vld [vmem:[%s72_s26] sm:$0x1] }
  0x20   :  { %v75_v9 = vrot.slane %v73_v8, 7  ;;  %v70_v10 = vld [vmem:[%s69_s0] sm:$0x1] }
  0x21   :  { %v86_v7 = vsel %vm77_vm0, %v80_v4, %v84_v6  ;;  %v224_v29 = vld [vmem:[%s780_s7] sm:$0x3] }
  0x22   :  { %560 = vtanh.f32 %v86_v7  ;;  %v78_v12 = vsel %vm77_vm0, %v70_v10, %v75_v9  ;;  %v226_v30 = vpack.c.bf16 %v224_v29, %v224_v29  ;;  %v552_v31 = vld [vmem:[%s785_s12] sm:$0xff]  }
  0x23   :  { %v556_v35 = vld [vmem:[%s787_s14] sm:$0xff]  }
  0x24   :  { %v467_v47 = vld [vmem:[%s784_s11] ss:$0 sm:$0xff] }
  0x25   :  { %v468_v57 = vld [vmem:[%s786_s13] ss:$0 sm:$0xff] }
  0x2c   :  { %v561_v11 = vpop.eup %560 }
  0x2d   :  { %90 = vperm.xlu0 %547, %v561_v11  }
  0xac   :  { %v91_v21 = vpop.permute.xlu0 %90 }
  0xad   :  { %v93_v22 = vmul.f32 %v91_v21, %v78_v12 }
  0xaf   :  { %v98_v24 = vadd.f32 %v97_v19, %v93_v22  ;;  %v102_v25 = vadd.f32 %v101_v20, %v93_v22 }
  0xb1   :  { %v107_v26 = vpack.c.bf16 %v98_v24, %v98_v24  ;;  %v112_v27 = vpack.c.bf16 %v102_v25, %v102_v25 }
  0xb3   :  { %502 = vmatmul.mubr.msk.bf16.vlgmr.msra.gmra.mrb[0].mxu0 %vm125_vm3, %v112_v27  ;;  %510 = vmatmul.mubr.msk.bf16.vlgmr.msra.gmra.mrb[0].mxu1 %vm125_vm3, %v107_v26 }
  0xb4   :  { %514 = vmatpush3.bf16.msra.mxu0 %v233_v28  ;;  %515 = vmatprep.mubr.msk.bf16.mxu0 %vm579_vm1, %v578_v2 }
  0xb5   :  { %527 = vmatprep.mubr.msk.bf16.mxu1 %vm579_vm1, %v578_v2  ;;  %531 = vmatprep.subr.bf16.mxu0 %v578_v2 }
  0xb6   :  { %520 = vmatpush3.bf16.msra.mxu1 %v552_v31 }
  0xb7   :  { %521 = vmatprep.subr.bf16.mxu1 %v578_v2 }
  0xba   :  { %522 = vmatpush3.bf16.msra.mxu1 %v553_v32 }
  0xbb   :  { %516 = vmatmul.mubr.msk.bf16.vlgmr.msra.gmra.mrb[4].mxu0 %vm227_vm4, %v226_v30  ;;  %523 = vmatprep.subr.bf16.mxu1 %v578_v2 }
  0xbc   :  { %539 = vmatprep.mubr.msk.bf16.mxu0 %vm579_vm1, %v578_v2  ;;  %532 = vmatpush3.bf16.msra.mxu0 %v556_v35 }
  0xbd   :  { %533 = vmatprep.subr.bf16.mxu0 %v578_v2 }
  0xbe   :  { %524 = vmatpush3.bf16.msra.mxu1 %v554_v33 }
  0xbf   :  { %525 = vmatprep.subr.bf16.mxu1 %v578_v2 }
  0xc0   :  { %534 = vmatpush3.bf16.msra.mxu0 %v557_v36 }
  0xc1   :  { %535 = vmatprep.subr.bf16.mxu0 %v578_v2 }
  0xc2   :  { %526 = vmatpush3.bf16.msra.mxu1 %v555_v34 }
  0xc4   :  { %536 = vmatpush3.bf16.msra.mxu0 %v558_v55 }
  0xc5   :  { %537 = vmatprep.subr.bf16.mxu0 %v578_v2 }
  0xc8   :  { %538 = vmatpush3.bf16.msra.mxu0 %v559_v56 }
 0x186   :  { %v163_v37 = vpop.f32.mrb[0].mxu0  ;;  %v218_v38 = vpop.f32.mrb[0].mxu1 }
 0x187   :  { %v219_v39 = vadd.f32 %v218_v38, %v163_v37  ;;  %v503_v40 = vpop.f32.mrb[1].mxu0  ;;  %v511_v41 = vpop.f32.mrb[1].mxu1 }
 0x188   :  { %v166_v42 = vpop.f32.mrb[2].mxu0  ;;  %v221_v43 = vpop.f32.mrb[2].mxu1 }
 0x189   :  { %v504_v44 = vpop.f32.mrb[3].mxu0  ;;  %v512_v45 = vpop.f32.mrb[3].mxu1 }
 0x18e   :  { %v269_v46 = vpop.f32.mrb[4].mxu0 }
 0x18f   :  { %v275_v48 = vadd.f32 %v269_v46, %v219_v39  ;;  %v517_v49 = vpop.f32.mrb[5].mxu0 }
 0x190   :  { %v272_v50 = vpop.f32.mrb[6].mxu0 }
 0x191   :  { %v283_v51 = vadd.f32 %v467_v47, %v275_v48  ;;  %v518_v52 = vpop.f32.mrb[7].mxu0 }
 0x193   :  { %v284_v53 = vmax.f32 %v283_v51, 0.0 }
 0x195   :  { %v293_v54 = vpack.c.bf16 %v284_v53, %v284_v53 }
 0x197   :  { %528 = vmatmul.mubr.msk.bf16.vlgmr.msra.gmra.mrb[4].mxu1 %vm325_vm5, %v293_v54 }
 0x26a   :  { %v363_v58 = vpop.f32.mrb[4].mxu1 }
 0x26b   :  { %v364_v59 = vadd.f32 %v468_v57, %v363_v58  ;;  %v529_v60 = vpop.f32.mrb[5].mxu1 }
 0x26c   :  { %v366_v61 = vpop.f32.mrb[6].mxu1 }
 0x26d   :  { %v369_v62 = vmax.f32 %v364_v59, 0.0  ;;  %v530_v63 = vpop.f32.mrb[7].mxu1 }
 0x26f   :  { %v378_v0 = vpack.c.bf16 %v369_v62, %v369_v62 }
 0x271   :  { %540 = vmatmul.mubr.msk.bf16.vlgmr.msra.gmra.mrb[8].mxu0 %vm325_vm5, %v378_v0 }
 0x344   :  { %v442_v2 = vpop.f32.mrb[8].mxu0 }
 0x345   :  { %v443_v3 = vadd.f32 %v442_v2, %v380_v1  ;;  %v541_v4 = vpop.f32.mrb[9].mxu0 }
 0x346   :  { %v445_v5 = vpop.f32.mrb[10].mxu0 }
 0x347   :  { %449 = vst.msk [vmem:[%s789_s16] sm:$0x3] %vm448_vm6, %v443_v3  ;;  %v542_v6 = vpop.f32.mrb[11].mxu0 }
 0x348   :  { %454 = vsyncpa [#allocation4], 1 }

</bundles_post_ra>
